<compile_context>
chip_gen: v6e
topology: v6e:2x2x1
jax: 0.10.0
libtpu: 0.0.40
codegen_flags: <defaults>
</compile_context>

<pallas_src>
import functools

import jax
import jax.numpy as jnp
from jax.experimental import pallas as pl
from jax.experimental.pallas import tpu as pltpu

LN_EPS = 1e-5                            # PyTorch nn.LayerNorm default
_VMEM_LIMIT_BYTES = 48 * 1024 * 1024     # safe on v5e/v6e (128 MiB) and v7x (64 MiB)
_VMEM_BUDGET_BYTES = 36 * 1024 * 1024    # working-set budget used to size tm


def _round_up(a, b):
    return -(-a // b) * b


def _ln_relu(h, gamma, beta):
    """LayerNorm with folded affine (one multiply-add) + ReLU, all in f32."""
    mu = jnp.mean(h, axis=-1, keepdims=True)
    var = jnp.mean(h * h, axis=-1, keepdims=True) - mu * mu
    scale = gamma * jax.lax.rsqrt(var + LN_EPS)          # (tm, F)
    shift = beta - mu * scale                            # (tm, F)
    return jnp.maximum(h * scale + shift, 0.0)


def rgat_input_kernel(x_ref,
                      w1_ref, b1_ref, g1_ref, be1_ref,
                      w2_ref, b2_ref, g2_ref, be2_ref,
                      o_ref, *, pack):
    # ---- linear1 (bf16 MXU operands, f32 accumulate) + LN + ReLU ----------
    h = jnp.dot(x_ref[...], w1_ref[...],
                preferred_element_type=jnp.float32) + b1_ref[...]
    h = _ln_relu(h, g1_ref[...], be1_ref[...])

    # ---- linear2 + LN + ReLU ----------------------------------------------
    y = jnp.dot(h.astype(w2_ref.dtype), w2_ref[...],
                preferred_element_type=jnp.float32) + b2_ref[...]
    y = _ln_relu(y, g2_ref[...], be2_ref[...])

    # ---- lane-dense store: pack `pack` row-chunks side-by-side -------------
    if pack == 1:
        o_ref[...] = y.astype(o_ref.dtype)
    else:
        rows = y.shape[0] // pack
        o_ref[...] = jnp.concatenate(
            [y[c * rows:(c + 1) * rows, :] for c in range(pack)],
            axis=-1).astype(o_ref.dtype)


def _choose_tm(n, input_dim, h_half, hidden, pack):
    """Largest row tile (capped at 512) that fits the explicit VMEM budget."""
    lane = lambda f: _round_up(max(f, 128), 128)
    # Per-row streaming / intermediate bytes:
    #   x tile  : bf16, double-buffered
    #   out tile: f32,  double-buffered, lane-packed
    #   h, y and the packed-y copy: f32
    per_row = (2 * lane(input_dim) * 2
               + 2 * lane(hidden * pack) * 4 // pack
               + lane(h_half) * 4 + 2 * lane(hidden) * 4)
    # Grid-resident operands (worst case: still double-buffered).
    resident = (2 * (input_dim * lane(h_half) * 2 + h_half * lane(hidden) * 2)
                + 6 * 2 * 8 * 128 * 4)
    tm_cap = max(64, (_VMEM_BUDGET_BYTES - resident) // per_row)
    tm = min(512, tm_cap, _round_up(n, 128))
    return max(64, (tm // 64) * 64)      # multiple of 64: sublane-safe for bf16 & packing


def _run_pallas(x_bf, w1_bf, b1, g1, be1, w2_bf, b2, g2, be2,
                *, tm, pack, single_buffer_weights):
    n_pad, input_dim = x_bf.shape
    h_half = w1_bf.shape[1]
    hidden = w2_bf.shape[1]

    if single_buffer_weights:
        # Constant-index operands: a single VMEM buffer is enough.
        const_spec = lambda shape: pl.BlockSpec(shape, lambda i: (0, 0),
                                                pipeline_mode=pl.Buffered(1))
    else:
        const_spec = lambda shape: pl.BlockSpec(shape, lambda i: (0, 0))

    kernel = functools.partial(rgat_input_kernel, pack=pack)
    return pl.pallas_call(
        kernel,
        out_shape=jax.ShapeDtypeStruct((n_pad // pack, hidden * pack), jnp.float32),
        grid_spec=pltpu.PrefetchScalarGridSpec(
            num_scalar_prefetch=0,
            grid=(n_pad // tm,),
            in_specs=[
                pl.BlockSpec((tm, input_dim), lambda i: (i, 0)),   # x tile (streamed)
                const_spec((input_dim, h_half)),                   # W1
                const_spec((1, h_half)),                           # b1
                const_spec((1, h_half)),                           # gamma1
                const_spec((1, h_half)),                           # beta1
                const_spec((h_half, hidden)),                      # W2
                const_spec((1, hidden)),                           # b2
                const_spec((1, hidden)),                           # gamma2
                const_spec((1, hidden)),                           # beta2
            ],
            out_specs=pl.BlockSpec((tm // pack, hidden * pack), lambda i: (i, 0)),
        ),
        compiler_params=pltpu.CompilerParams(
            dimension_semantics=("parallel",),
            vmem_limit_bytes=_VMEM_LIMIT_BYTES),
    )(x_bf, w1_bf, b1, g1, be1, w2_bf, b2, g2, be2)


def rgat_input_layer(x, params, *, tm=None):
    """x: [N, input_dim] float32. Returns [N, hidden_size] float32."""
    N, input_dim = x.shape
    w1, b1, g1, be1, w2, b2, g2, be2 = params
    h_half = w1.shape[1]
    hidden = w2.shape[1]

    # Lane packing factor: stored last dim becomes >= 128 lanes when possible.
    pack = 128 // hidden if (hidden < 128 and 128 % hidden == 0) else 1

    if tm is None:
        tm = _choose_tm(N, input_dim, h_half, hidden, pack)
    tm = max(64, (tm // 64) * 64)

    # bf16 MXU operands; accumulation / LayerNorm math stay f32 in the kernel.
    x_bf = x.astype(jnp.bfloat16)
    w1_bf = w1.astype(jnp.bfloat16)
    w2_bf = w2.astype(jnp.bfloat16)

    # Ragged N: zero-pad rows to a tile multiple; padded rows dropped below.
    n_pad = _round_up(N, tm)
    if n_pad != N:
        x_bf = jnp.pad(x_bf, ((0, n_pad - N), (0, 0)))

    args = (x_bf, w1_bf, b1, g1, be1, w2_bf, b2, g2, be2)
    try:
        out_packed = _run_pallas(*args, tm=tm, pack=pack,
                                 single_buffer_weights=True)
        out_packed = jax.block_until_ready(out_packed)
    except Exception:  # pl.Buffered(1) not accepted on this JAX/Mosaic version
        out_packed = _run_pallas(*args, tm=tm, pack=pack,
                                 single_buffer_weights=False)

    # Undo the lane packing: (n_pad//pack, hidden*pack) -> (n_pad, hidden).
    num_tiles = n_pad // tm
    rows = tm // pack
    out = out_packed.reshape(num_tiles, rows, pack, hidden)
    out = out.transpose(0, 2, 1, 3).reshape(n_pad, hidden)
    return out[:N]


def init_params(key, input_dim, hidden_size):
    """Synthetic params matching nn.Linear / nn.LayerNorm shapes.
    Linear weights stored as [in, out] (PyTorch weight transposed)."""
    h_half = hidden_size // 2
    k1, k2, k3, k4 = jax.random.split(key, 4)
    s1 = 1.0 / jnp.sqrt(input_dim)
    s2 = 1.0 / jnp.sqrt(h_half)
    w1 = jax.random.uniform(k1, (input_dim, h_half), jnp.float32, -s1, s1)
    b1 = jax.random.uniform(k2, (1, h_half), jnp.float32, -s1, s1)
    w2 = jax.random.uniform(k3, (h_half, hidden_size), jnp.float32, -s2, s2)
    b2 = jax.random.uniform(k4, (1, hidden_size), jnp.float32, -s2, s2)
    g1 = jnp.ones((1, h_half), jnp.float32)
    be1 = jnp.zeros((1, h_half), jnp.float32)
    g2 = jnp.ones((1, hidden_size), jnp.float32)
    be2 = jnp.zeros((1, hidden_size), jnp.float32)
    return (w1, b1, g1, be1, w2, b2, g2, be2)


def _layernorm_ref(h, gamma, beta):
    mu = jnp.mean(h, axis=-1, keepdims=True)
    var = jnp.mean((h - mu) ** 2, axis=-1, keepdims=True)
    return (h - mu) * jax.lax.rsqrt(var + LN_EPS) * gamma + beta


def reference(x, params):
    """f32 reference applying the same bf16 operand rounding as the kernel."""
    w1, b1, g1, be1, w2, b2, g2, be2 = params
    to_bf = lambda a: a.astype(jnp.bfloat16).astype(jnp.float32)
    h = to_bf(x) @ to_bf(w1) + b1
    h = jnp.maximum(_layernorm_ref(h, g1, be1), 0.0)
    y = to_bf(h) @ to_bf(w2) + b2
    y = jnp.maximum(_layernorm_ref(y, g2, be2), 0.0)
    return y


if __name__ == "__main__":
    # Small synthetic "graph": N nodes (deliberately NOT a tile multiple, to
    # exercise the ragged-N padding path) with input_dim features.
    N, input_dim, gnn_hidden_size = 200, 32, 64

    key = jax.random.PRNGKey(0)
    kx, kp = jax.random.split(key)
    x = jax.random.normal(kx, (N, input_dim), jnp.float32)
    params = init_params(kp, input_dim, gnn_hidden_size)

    out = rgat_input_layer(x, params)
    out = jax.block_until_ready(out)

    ref = reference(x, params)
    assert out.shape == (N, gnn_hidden_size)
    assert bool(jnp.isfinite(out).all())
    assert jnp.allclose(out, ref, atol=5e-3, rtol=5e-3), "mismatch vs reference"

    print("KERNEL_OK")
</pallas_src>

<mosaic_0001>
module attributes {stable_mosaic.version = 11 : i64} {
  func.func @rgat_input_kernel(%arg0: i32, %arg1: memref<256x32xbf16, #tpu.memory_space<vmem>>, %arg2: memref<32x32xbf16, #tpu.memory_space<vmem>>, %arg3: memref<1x32xf32, #tpu.memory_space<vmem>>, %arg4: memref<1x32xf32, #tpu.memory_space<vmem>>, %arg5: memref<1x32xf32, #tpu.memory_space<vmem>>, %arg6: memref<32x64xbf16, #tpu.memory_space<vmem>>, %arg7: memref<1x64xf32, #tpu.memory_space<vmem>>, %arg8: memref<1x64xf32, #tpu.memory_space<vmem>>, %arg9: memref<1x64xf32, #tpu.memory_space<vmem>>, %arg10: memref<128x128xf32, #tpu.memory_space<vmem>>) attributes {dimension_semantics = [#tpu.dimension_semantics<parallel>], iteration_bounds = array<i64: 1>, scalar_prefetch = 0 : i64, scratch_operands = 0 : i64, tpu.core_type = #tpu.core_type<tc>, window_params = [{transform_indices = @transform_0, window_bounds = array<i64: 256, 32>}, {pipeline_mode = #tpu.pipeline_mode<synchronous>, transform_indices = @transform_1, window_bounds = array<i64: 32, 32>}, {pipeline_mode = #tpu.pipeline_mode<synchronous>, transform_indices = @transform_2, window_bounds = array<i64: 1, 32>}, {pipeline_mode = #tpu.pipeline_mode<synchronous>, transform_indices = @transform_3, window_bounds = array<i64: 1, 32>}, {pipeline_mode = #tpu.pipeline_mode<synchronous>, transform_indices = @transform_4, window_bounds = array<i64: 1, 32>}, {pipeline_mode = #tpu.pipeline_mode<synchronous>, transform_indices = @transform_5, window_bounds = array<i64: 32, 64>}, {pipeline_mode = #tpu.pipeline_mode<synchronous>, transform_indices = @transform_6, window_bounds = array<i64: 1, 64>}, {pipeline_mode = #tpu.pipeline_mode<synchronous>, transform_indices = @transform_7, window_bounds = array<i64: 1, 64>}, {pipeline_mode = #tpu.pipeline_mode<synchronous>, transform_indices = @transform_8, window_bounds = array<i64: 1, 64>}, {transform_indices = @transform_9, window_bounds = array<i64: 128, 128>}]} {
    %c0 = arith.constant 0 : index
    %c0_0 = arith.constant 0 : index
    %0 = vector.load %arg1[%c0, %c0_0] : memref<256x32xbf16, #tpu.memory_space<vmem>>, vector<256x32xbf16>
    %c0_1 = arith.constant 0 : index
    %c0_2 = arith.constant 0 : index
    %1 = vector.load %arg2[%c0_1, %c0_2] : memref<32x32xbf16, #tpu.memory_space<vmem>>, vector<32x32xbf16>
    %cst = arith.constant dense<0.000000e+00> : vector<256x32xf32>
    %2 = tpu.matmul %0, %1, %cst {dimension_numbers = #tpu.dot_dimension_numbers<[1], [0], [0], [1], [0, 0, 1, 1], [], []>} : vector<256x32xbf16>, vector<32x32xbf16>, vector<256x32xf32> -> vector<256x32xf32>
    %c0_3 = arith.constant 0 : index
    %c0_4 = arith.constant 0 : index
    %3 = vector.load %arg3[%c0_3, %c0_4] : memref<1x32xf32, #tpu.memory_space<vmem>>, vector<1x32xf32>
    %4 = vector.broadcast %3 : vector<1x32xf32> to vector<256x32xf32>
    %5 = arith.addf %2, %4 : vector<256x32xf32>
    %c0_5 = arith.constant 0 : index
    %c0_6 = arith.constant 0 : index
    %6 = vector.load %arg4[%c0_5, %c0_6] : memref<1x32xf32, #tpu.memory_space<vmem>>, vector<1x32xf32>
    %c0_7 = arith.constant 0 : index
    %c0_8 = arith.constant 0 : index
    %7 = vector.load %arg5[%c0_7, %c0_8] : memref<1x32xf32, #tpu.memory_space<vmem>>, vector<1x32xf32>
    %cst_9 = arith.constant dense<0.000000e+00> : vector<256xf32>
    %8 = vector.multi_reduction <add>, %5, %cst_9 [1] : vector<256x32xf32> to vector<256xf32>
    %9 = vector.shape_cast %8 : vector<256xf32> to vector<256x1xf32>
    %cst_10 = arith.constant 3.200000e+01 : f32
    %10 = vector.broadcast %cst_10 : f32 to vector<256x1xf32>
    %11 = arith.divf %9, %10 : vector<256x1xf32>
    %12 = arith.mulf %5, %5 : vector<256x32xf32>
    %cst_11 = arith.constant dense<0.000000e+00> : vector<256xf32>
    %13 = vector.multi_reduction <add>, %12, %cst_11 [1] : vector<256x32xf32> to vector<256xf32>
    %14 = vector.shape_cast %13 : vector<256xf32> to vector<256x1xf32>
    %cst_12 = arith.constant 3.200000e+01 : f32
    %15 = vector.broadcast %cst_12 : f32 to vector<256x1xf32>
    %16 = arith.divf %14, %15 : vector<256x1xf32>
    %17 = arith.mulf %11, %11 : vector<256x1xf32>
    %18 = arith.subf %16, %17 : vector<256x1xf32>
    %cst_13 = arith.constant 9.99999974E-6 : f32
    %19 = vector.broadcast %cst_13 : f32 to vector<256x1xf32>
    %20 = arith.addf %18, %19 : vector<256x1xf32>
    %21 = math.rsqrt %20 : vector<256x1xf32>
    %22 = vector.broadcast %6 : vector<1x32xf32> to vector<256x32xf32>
    %23 = vector.broadcast %21 : vector<256x1xf32> to vector<256x32xf32>
    %24 = arith.mulf %22, %23 : vector<256x32xf32>
    %25 = vector.broadcast %11 : vector<256x1xf32> to vector<256x32xf32>
    %26 = arith.mulf %25, %24 : vector<256x32xf32>
    %27 = vector.broadcast %7 : vector<1x32xf32> to vector<256x32xf32>
    %28 = arith.subf %27, %26 : vector<256x32xf32>
    %29 = arith.mulf %5, %24 : vector<256x32xf32>
    %30 = arith.addf %29, %28 : vector<256x32xf32>
    %cst_14 = arith.constant 0.000000e+00 : f32
    %31 = vector.broadcast %cst_14 : f32 to vector<256x32xf32>
    %32 = arith.maximumf %30, %31 : vector<256x32xf32>
    %33 = arith.truncf %32 : vector<256x32xf32> to vector<256x32xbf16>
    %c0_15 = arith.constant 0 : index
    %c0_16 = arith.constant 0 : index
    %34 = vector.load %arg6[%c0_15, %c0_16] : memref<32x64xbf16, #tpu.memory_space<vmem>>, vector<32x64xbf16>
    %cst_17 = arith.constant dense<0.000000e+00> : vector<256x64xf32>
    %35 = tpu.matmul %33, %34, %cst_17 {dimension_numbers = #tpu.dot_dimension_numbers<[1], [0], [0], [1], [0, 0, 1, 1], [], []>} : vector<256x32xbf16>, vector<32x64xbf16>, vector<256x64xf32> -> vector<256x64xf32>
    %c0_18 = arith.constant 0 : index
    %c0_19 = arith.constant 0 : index
    %36 = vector.load %arg7[%c0_18, %c0_19] : memref<1x64xf32, #tpu.memory_space<vmem>>, vector<1x64xf32>
    %37 = vector.broadcast %36 : vector<1x64xf32> to vector<256x64xf32>
    %38 = arith.addf %35, %37 : vector<256x64xf32>
    %c0_20 = arith.constant 0 : index
    %c0_21 = arith.constant 0 : index
    %39 = vector.load %arg8[%c0_20, %c0_21] : memref<1x64xf32, #tpu.memory_space<vmem>>, vector<1x64xf32>
    %c0_22 = arith.constant 0 : index
    %c0_23 = arith.constant 0 : index
    %40 = vector.load %arg9[%c0_22, %c0_23] : memref<1x64xf32, #tpu.memory_space<vmem>>, vector<1x64xf32>
    %cst_24 = arith.constant dense<0.000000e+00> : vector<256xf32>
    %41 = vector.multi_reduction <add>, %38, %cst_24 [1] : vector<256x64xf32> to vector<256xf32>
    %42 = vector.shape_cast %41 : vector<256xf32> to vector<256x1xf32>
    %cst_25 = arith.constant 6.400000e+01 : f32
    %43 = vector.broadcast %cst_25 : f32 to vector<256x1xf32>
    %44 = arith.divf %42, %43 : vector<256x1xf32>
    %45 = arith.mulf %38, %38 : vector<256x64xf32>
    %cst_26 = arith.constant dense<0.000000e+00> : vector<256xf32>
    %46 = vector.multi_reduction <add>, %45, %cst_26 [1] : vector<256x64xf32> to vector<256xf32>
    %47 = vector.shape_cast %46 : vector<256xf32> to vector<256x1xf32>
    %cst_27 = arith.constant 6.400000e+01 : f32
    %48 = vector.broadcast %cst_27 : f32 to vector<256x1xf32>
    %49 = arith.divf %47, %48 : vector<256x1xf32>
    %50 = arith.mulf %44, %44 : vector<256x1xf32>
    %51 = arith.subf %49, %50 : vector<256x1xf32>
    %cst_28 = arith.constant 9.99999974E-6 : f32
    %52 = vector.broadcast %cst_28 : f32 to vector<256x1xf32>
    %53 = arith.addf %51, %52 : vector<256x1xf32>
    %54 = math.rsqrt %53 : vector<256x1xf32>
    %55 = vector.broadcast %39 : vector<1x64xf32> to vector<256x64xf32>
    %56 = vector.broadcast %54 : vector<256x1xf32> to vector<256x64xf32>
    %57 = arith.mulf %55, %56 : vector<256x64xf32>
    %58 = vector.broadcast %44 : vector<256x1xf32> to vector<256x64xf32>
    %59 = arith.mulf %58, %57 : vector<256x64xf32>
    %60 = vector.broadcast %40 : vector<1x64xf32> to vector<256x64xf32>
    %61 = arith.subf %60, %59 : vector<256x64xf32>
    %62 = arith.mulf %38, %57 : vector<256x64xf32>
    %63 = arith.addf %62, %61 : vector<256x64xf32>
    %cst_29 = arith.constant 0.000000e+00 : f32
    %64 = vector.broadcast %cst_29 : f32 to vector<256x64xf32>
    %65 = arith.maximumf %63, %64 : vector<256x64xf32>
    %66 = vector.extract_strided_slice %65 {offsets = [0, 0], sizes = [128, 64], strides = [1, 1]} : vector<256x64xf32> to vector<128x64xf32>
    %67 = vector.extract_strided_slice %65 {offsets = [128, 0], sizes = [128, 64], strides = [1, 1]} : vector<256x64xf32> to vector<128x64xf32>
    %68 = tpu.concatenate %66, %67 in 1 : vector<128x64xf32>, vector<128x64xf32> -> vector<128x128xf32>
    %c0_30 = arith.constant 0 : index
    %c0_31 = arith.constant 0 : index
    %69 = vector.load %arg10[%c0_30, %c0_31] : memref<128x128xf32, #tpu.memory_space<vmem>>, vector<128x128xf32>
    tpu.vector_store %arg10[%c0_30, %c0_31], %68 {strides = array<i32>} : memref<128x128xf32, #tpu.memory_space<vmem>>, vector<128x128xf32>,
    return
  }
  func.func @transform_0(%arg0: i32) -> (i32, i32) {
    %c0_i32 = arith.constant 0 : i32
    %c0_i32_0 = arith.constant 0 : i32
    return %arg0, %c0_i32 : i32, i32
  }
  func.func @transform_1(%arg0: i32) -> (i32, i32) {
    %c0_i32 = arith.constant 0 : i32
    %c0_i32_0 = arith.constant 0 : i32
    %c0_i32_1 = arith.constant 0 : i32
    return %c0_i32, %c0_i32_0 : i32, i32
  }
  func.func @transform_2(%arg0: i32) -> (i32, i32) {
    %c0_i32 = arith.constant 0 : i32
    %c0_i32_0 = arith.constant 0 : i32
    %c0_i32_1 = arith.constant 0 : i32
    return %c0_i32, %c0_i32_0 : i32, i32
  }
  func.func @transform_3(%arg0: i32) -> (i32, i32) {
    %c0_i32 = arith.constant 0 : i32
    %c0_i32_0 = arith.constant 0 : i32
    %c0_i32_1 = arith.constant 0 : i32
    return %c0_i32, %c0_i32_0 : i32, i32
  }
  func.func @transform_4(%arg0: i32) -> (i32, i32) {
    %c0_i32 = arith.constant 0 : i32
    %c0_i32_0 = arith.constant 0 : i32
    %c0_i32_1 = arith.constant 0 : i32
    return %c0_i32, %c0_i32_0 : i32, i32
  }
  func.func @transform_5(%arg0: i32) -> (i32, i32) {
    %c0_i32 = arith.constant 0 : i32
    %c0_i32_0 = arith.constant 0 : i32
    %c0_i32_1 = arith.constant 0 : i32
    return %c0_i32, %c0_i32_0 : i32, i32
  }
  func.func @transform_6(%arg0: i32) -> (i32, i32) {
    %c0_i32 = arith.constant 0 : i32
    %c0_i32_0 = arith.constant 0 : i32
    %c0_i32_1 = arith.constant 0 : i32
    return %c0_i32, %c0_i32_0 : i32, i32
  }
  func.func @transform_7(%arg0: i32) -> (i32, i32) {
    %c0_i32 = arith.constant 0 : i32
    %c0_i32_0 = arith.constant 0 : i32
    %c0_i32_1 = arith.constant 0 : i32
    return %c0_i32, %c0_i32_0 : i32, i32
  }
  func.func @transform_8(%arg0: i32) -> (i32, i32) {
    %c0_i32 = arith.constant 0 : i32
    %c0_i32_0 = arith.constant 0 : i32
    %c0_i32_1 = arith.constant 0 : i32
    return %c0_i32, %c0_i32_0 : i32, i32
  }
  func.func @transform_9(%arg0: i32) -> (i32, i32) {
    %c0_i32 = arith.constant 0 : i32
    %c0_i32_0 = arith.constant 0 : i32
    return %arg0, %c0_i32 : i32, i32
  }
}

module attributes {stable_mosaic.version = 11 : i64} {
  func.func @rgat_input_kernel(%arg0: i32, %arg1: memref<256x32xbf16, #tpu.memory_space<vmem>>, %arg2: memref<32x32xbf16, #tpu.memory_space<vmem>>, %arg3: memref<1x32xf32, #tpu.memory_space<vmem>>, %arg4: memref<1x32xf32, #tpu.memory_space<vmem>>, %arg5: memref<1x32xf32, #tpu.memory_space<vmem>>, %arg6: memref<32x64xbf16, #tpu.memory_space<vmem>>, %arg7: memref<1x64xf32, #tpu.memory_space<vmem>>, %arg8: memref<1x64xf32, #tpu.memory_space<vmem>>, %arg9: memref<1x64xf32, #tpu.memory_space<vmem>>, %arg10: memref<128x128xf32, #tpu.memory_space<vmem>>) attributes {dimension_semantics = [#tpu.dimension_semantics<parallel>], iteration_bounds = array<i64: 1>, scalar_prefetch = 0 : i64, scratch_operands = 0 : i64, tpu.core_type = #tpu.core_type<tc>, window_params = [{transform_indices = @transform_0, window_bounds = array<i64: 256, 32>}, {pipeline_mode = #tpu.pipeline_mode<synchronous>, transform_indices = @transform_1, window_bounds = array<i64: 32, 32>}, {pipeline_mode = #tpu.pipeline_mode<synchronous>, transform_indices = @transform_2, window_bounds = array<i64: 1, 32>}, {pipeline_mode = #tpu.pipeline_mode<synchronous>, transform_indices = @transform_3, window_bounds = array<i64: 1, 32>}, {pipeline_mode = #tpu.pipeline_mode<synchronous>, transform_indices = @transform_4, window_bounds = array<i64: 1, 32>}, {pipeline_mode = #tpu.pipeline_mode<synchronous>, transform_indices = @transform_5, window_bounds = array<i64: 32, 64>}, {pipeline_mode = #tpu.pipeline_mode<synchronous>, transform_indices = @transform_6, window_bounds = array<i64: 1, 64>}, {pipeline_mode = #tpu.pipeline_mode<synchronous>, transform_indices = @transform_7, window_bounds = array<i64: 1, 64>}, {pipeline_mode = #tpu.pipeline_mode<synchronous>, transform_indices = @transform_8, window_bounds = array<i64: 1, 64>}, {transform_indices = @transform_9, window_bounds = array<i64: 128, 128>}]} {
    %c0 = arith.constant 0 : index
    %c0_0 = arith.constant 0 : index
    %0 = vector.load %arg1[%c0, %c0_0] : memref<256x32xbf16, #tpu.memory_space<vmem>>, vector<256x32xbf16>
    %c0_1 = arith.constant 0 : index
    %c0_2 = arith.constant 0 : index
    %1 = vector.load %arg2[%c0_1, %c0_2] : memref<32x32xbf16, #tpu.memory_space<vmem>>, vector<32x32xbf16>
    %cst = arith.constant dense<0.000000e+00> : vector<256x32xf32>
    %2 = tpu.matmul %0, %1, %cst {dimension_numbers = #tpu.dot_dimension_numbers<[1], [0], [0], [1], [0, 0, 1, 1], [], []>} : vector<256x32xbf16>, vector<32x32xbf16>, vector<256x32xf32> -> vector<256x32xf32>
    %c0_3 = arith.constant 0 : index
    %c0_4 = arith.constant 0 : index
    %3 = vector.load %arg3[%c0_3, %c0_4] : memref<1x32xf32, #tpu.memory_space<vmem>>, vector<1x32xf32>
    %4 = vector.broadcast %3 : vector<1x32xf32> to vector<256x32xf32>
    %5 = arith.addf %2, %4 : vector<256x32xf32>
    %c0_5 = arith.constant 0 : index
    %c0_6 = arith.constant 0 : index
    %6 = vector.load %arg4[%c0_5, %c0_6] : memref<1x32xf32, #tpu.memory_space<vmem>>, vector<1x32xf32>
    %c0_7 = arith.constant 0 : index
    %c0_8 = arith.constant 0 : index
    %7 = vector.load %arg5[%c0_7, %c0_8] : memref<1x32xf32, #tpu.memory_space<vmem>>, vector<1x32xf32>
    %cst_9 = arith.constant dense<0.000000e+00> : vector<256xf32>
    %8 = vector.multi_reduction <add>, %5, %cst_9 [1] : vector<256x32xf32> to vector<256xf32>
    %9 = vector.shape_cast %8 : vector<256xf32> to vector<256x1xf32>
    %cst_10 = arith.constant 3.200000e+01 : f32
    %10 = vector.broadcast %cst_10 : f32 to vector<256x1xf32>
    %11 = arith.divf %9, %10 : vector<256x1xf32>
    %12 = arith.mulf %5, %5 : vector<256x32xf32>
    %cst_11 = arith.constant dense<0.000000e+00> : vector<256xf32>
    %13 = vector.multi_reduction <add>, %12, %cst_11 [1] : vector<256x32xf32> to vector<256xf32>
    %14 = vector.shape_cast %13 : vector<256xf32> to vector<256x1xf32>
    %cst_12 = arith.constant 3.200000e+01 : f32
    %15 = vector.broadcast %cst_12 : f32 to vector<256x1xf32>
    %16 = arith.divf %14, %15 : vector<256x1xf32>
    %17 = arith.mulf %11, %11 : vector<256x1xf32>
    %18 = arith.subf %16, %17 : vector<256x1xf32>
    %cst_13 = arith.constant 9.99999974E-6 : f32
    %19 = vector.broadcast %cst_13 : f32 to vector<256x1xf32>
    %20 = arith.addf %18, %19 : vector<256x1xf32>
    %21 = math.rsqrt %20 : vector<256x1xf32>
    %22 = vector.broadcast %6 : vector<1x32xf32> to vector<256x32xf32>
    %23 = vector.broadcast %21 : vector<256x1xf32> to vector<256x32xf32>
    %24 = arith.mulf %22, %23 : vector<256x32xf32>
    %25 = vector.broadcast %11 : vector<256x1xf32> to vector<256x32xf32>
    %26 = arith.mulf %25, %24 : vector<256x32xf32>
    %27 = vector.broadcast %7 : vector<1x32xf32> to vector<256x32xf32>
    %28 = arith.subf %27, %26 : vector<256x32xf32>
    %29 = arith.mulf %5, %24 : vector<256x32xf32>
    %30 = arith.addf %29, %28 : vector<256x32xf32>
    %cst_14 = arith.constant 0.000000e+00 : f32
    %31 = vector.broadcast %cst_14 : f32 to vector<256x32xf32>
    %32 = arith.maximumf %30, %31 : vector<256x32xf32>
    %33 = arith.truncf %32 : vector<256x32xf32> to vector<256x32xbf16>
    %c0_15 = arith.constant 0 : index
    %c0_16 = arith.constant 0 : index
    %34 = vector.load %arg6[%c0_15, %c0_16] : memref<32x64xbf16, #tpu.memory_space<vmem>>, vector<32x64xbf16>
    %cst_17 = arith.constant dense<0.000000e+00> : vector<256x64xf32>
    %35 = tpu.matmul %33, %34, %cst_17 {dimension_numbers = #tpu.dot_dimension_numbers<[1], [0], [0], [1], [0, 0, 1, 1], [], []>} : vector<256x32xbf16>, vector<32x64xbf16>, vector<256x64xf32> -> vector<256x64xf32>
    %c0_18 = arith.constant 0 : index
    %c0_19 = arith.constant 0 : index
    %36 = vector.load %arg7[%c0_18, %c0_19] : memref<1x64xf32, #tpu.memory_space<vmem>>, vector<1x64xf32>
    %37 = vector.broadcast %36 : vector<1x64xf32> to vector<256x64xf32>
    %38 = arith.addf %35, %37 : vector<256x64xf32>
    %c0_20 = arith.constant 0 : index
    %c0_21 = arith.constant 0 : index
    %39 = vector.load %arg8[%c0_20, %c0_21] : memref<1x64xf32, #tpu.memory_space<vmem>>, vector<1x64xf32>
    %c0_22 = arith.constant 0 : index
    %c0_23 = arith.constant 0 : index
    %40 = vector.load %arg9[%c0_22, %c0_23] : memref<1x64xf32, #tpu.memory_space<vmem>>, vector<1x64xf32>
    %cst_24 = arith.constant dense<0.000000e+00> : vector<256xf32>
    %41 = vector.multi_reduction <add>, %38, %cst_24 [1] : vector<256x64xf32> to vector<256xf32>
    %42 = vector.shape_cast %41 : vector<256xf32> to vector<256x1xf32>
    %cst_25 = arith.constant 6.400000e+01 : f32
    %43 = vector.broadcast %cst_25 : f32 to vector<256x1xf32>
    %44 = arith.divf %42, %43 : vector<256x1xf32>
    %45 = arith.mulf %38, %38 : vector<256x64xf32>
    %cst_26 = arith.constant dense<0.000000e+00> : vector<256xf32>
    %46 = vector.multi_reduction <add>, %45, %cst_26 [1] : vector<256x64xf32> to vector<256xf32>
    %47 = vector.shape_cast %46 : vector<256xf32> to vector<256x1xf32>
    %cst_27 = arith.constant 6.400000e+01 : f32
    %48 = vector.broadcast %cst_27 : f32 to vector<256x1xf32>
    %49 = arith.divf %47, %48 : vector<256x1xf32>
    %50 = arith.mulf %44, %44 : vector<256x1xf32>
    %51 = arith.subf %49, %50 : vector<256x1xf32>
    %cst_28 = arith.constant 9.99999974E-6 : f32
    %52 = vector.broadcast %cst_28 : f32 to vector<256x1xf32>
    %53 = arith.addf %51, %52 : vector<256x1xf32>
    %54 = math.rsqrt %53 : vector<256x1xf32>
    %55 = vector.broadcast %39 : vector<1x64xf32> to vector<256x64xf32>
    %56 = vector.broadcast %54 : vector<256x1xf32> to vector<256x64xf32>
    %57 = arith.mulf %55, %56 : vector<256x64xf32>
    %58 = vector.broadcast %44 : vector<256x1xf32> to vector<256x64xf32>
    %59 = arith.mulf %58, %57 : vector<256x64xf32>
    %60 = vector.broadcast %40 : vector<1x64xf32> to vector<256x64xf32>
    %61 = arith.subf %60, %59 : vector<256x64xf32>
    %62 = arith.mulf %38, %57 : vector<256x64xf32>
    %63 = arith.addf %62, %61 : vector<256x64xf32>
    %cst_29 = arith.constant 0.000000e+00 : f32
    %64 = vector.broadcast %cst_29 : f32 to vector<256x64xf32>
    %65 = arith.maximumf %63, %64 : vector<256x64xf32>
    %66 = vector.extract_strided_slice %65 {offsets = [0, 0], sizes = [128, 64], strides = [1, 1]} : vector<256x64xf32> to vector<128x64xf32>
    %67 = vector.extract_strided_slice %65 {offsets = [128, 0], sizes = [128, 64], strides = [1, 1]} : vector<256x64xf32> to vector<128x64xf32>
    %68 = tpu.concatenate %66, %67 in 1 : vector<128x64xf32>, vector<128x64xf32> -> vector<128x128xf32>
    %c0_30 = arith.constant 0 : index
    %c0_31 = arith.constant 0 : index
    %69 = vector.load %arg10[%c0_30, %c0_31] : memref<128x128xf32, #tpu.memory_space<vmem>>, vector<128x128xf32>
    tpu.vector_store %arg10[%c0_30, %c0_31], %68 {strides = array<i32>} : memref<128x128xf32, #tpu.memory_space<vmem>>, vector<128x128xf32>,
    return
  }
  func.func @transform_0(%arg0: i32) -> (i32, i32) {
    %c0_i32 = arith.constant 0 : i32
    %c0_i32_0 = arith.constant 0 : i32
    return %arg0, %c0_i32 : i32, i32
  }
  func.func @transform_1(%arg0: i32) -> (i32, i32) {
    %c0_i32 = arith.constant 0 : i32
    %c0_i32_0 = arith.constant 0 : i32
    %c0_i32_1 = arith.constant 0 : i32
    return %c0_i32, %c0_i32_0 : i32, i32
  }
  func.func @transform_2(%arg0: i32) -> (i32, i32) {
    %c0_i32 = arith.constant 0 : i32
    %c0_i32_0 = arith.constant 0 : i32
    %c0_i32_1 = arith.constant 0 : i32
    return %c0_i32, %c0_i32_0 : i32, i32
  }
  func.func @transform_3(%arg0: i32) -> (i32, i32) {
    %c0_i32 = arith.constant 0 : i32
    %c0_i32_0 = arith.constant 0 : i32
    %c0_i32_1 = arith.constant 0 : i32
    return %c0_i32, %c0_i32_0 : i32, i32
  }
  func.func @transform_4(%arg0: i32) -> (i32, i32) {
    %c0_i32 = arith.constant 0 : i32
    %c0_i32_0 = arith.constant 0 : i32
    %c0_i32_1 = arith.constant 0 : i32
    return %c0_i32, %c0_i32_0 : i32, i32
  }
  func.func @transform_5(%arg0: i32) -> (i32, i32) {
    %c0_i32 = arith.constant 0 : i32
    %c0_i32_0 = arith.constant 0 : i32
    %c0_i32_1 = arith.constant 0 : i32
    return %c0_i32, %c0_i32_0 : i32, i32
  }
  func.func @transform_6(%arg0: i32) -> (i32, i32) {
    %c0_i32 = arith.constant 0 : i32
    %c0_i32_0 = arith.constant 0 : i32
    %c0_i32_1 = arith.constant 0 : i32
    return %c0_i32, %c0_i32_0 : i32, i32
  }
  func.func @transform_7(%arg0: i32) -> (i32, i32) {
    %c0_i32 = arith.constant 0 : i32
    %c0_i32_0 = arith.constant 0 : i32
    %c0_i32_1 = arith.constant 0 : i32
    return %c0_i32, %c0_i32_0 : i32, i32
  }
  func.func @transform_8(%arg0: i32) -> (i32, i32) {
    %c0_i32 = arith.constant 0 : i32
    %c0_i32_0 = arith.constant 0 : i32
    %c0_i32_1 = arith.constant 0 : i32
    return %c0_i32, %c0_i32_0 : i32, i32
  }
  func.func @transform_9(%arg0: i32) -> (i32, i32) {
    %c0_i32 = arith.constant 0 : i32
    %c0_i32_0 = arith.constant 0 : i32
    return %arg0, %c0_i32 : i32, i32
  }
}

</mosaic_0001>

<bundles_post_ra>
// kernel: tpu_custom_call.1
= control target key start
LH: loop header
LB: loop body
LE: loop exit
PB: predicated region body
PF: predicated region fallthrough
CT: control target
= control target key end

     0   :  { %vm169_vm0 = vcmask 261120   ;;  %s3612_s0 = inlined_call_operand.vmem [shape: bf16[256,32], index: 0, kind: input, shape index: {}]   ;;  %s3613_s1 = inlined_call_operand.vmem [shape: bf16[32,32], index: 1, kind: input, shape index: {}]   ;;  %s3614_s2 = inlined_call_operand.vmem [shape: f32[1,32], index: 2, kind: input, shape index: {}]   ;;  %s3615_s3 = inlined_call_operand.vmem [shape: f32[1,32], index: 3, kind: input, shape index: {}]   ;;  %s3616_s4 = inlined_call_operand.vmem [shape: f32[1,32], index: 4, kind: input, shape index: {}]   ;;  %s3617_s5 = inlined_call_operand.vmem [shape: bf16[32,64], index: 5, kind: input, shape index: {}]   ;;  %s3618_s6 = inlined_call_operand.vmem [shape: f32[1,64], index: 6, kind: input, shape index: {}]   ;;  %s3619_s7 = inlined_call_operand.vmem [shape: f32[1,64], index: 7, kind: input, shape index: {}]   ;;  %s3620_s8 = inlined_call_operand.vmem [shape: f32[1,64], index: 8, kind: input, shape index: {}]   ;;  %s3621_s9 = inlined_call_operand.hbm [shape: f32[128,128], index: 9, kind: output, shape index: {}]  }
   0x1   :  { %v2156_v0 = vld [vmem:[%s3613_s1 + $0x8] sm:$0xff]   ;;  %v2157_v1 = vld [vmem:[%s3613_s1] sm:$0xff]   ;;  %v2160_v4 = vld [vmem:[%s3612_s0 + $0x10] sm:$0xff]  }
   0x2   :  { %2080 = vmatprep.subr.bf16.mxu0 %v2156_v0  ;;  %v2158_v2 = vld [vmem:[%s3612_s0] sm:$0xff]   ;;  %v2159_v3 = vld [vmem:[%s3612_s0 + $0x8] sm:$0xff]   ;;  %v2161_v5 = vld [vmem:[%s3612_s0 + $0x18] sm:$0xff]  }
   0x3   :  { %2081 = vmatpush3.bf16.msra.mxu0 %v2156_v0  ;;  %2084 = vmatprep.mubr.msk.bf16.mxu0 %vm169_vm0, %v2158_v2  ;;  %v2162_v6 = vld [vmem:[%s3612_s0 + $0x20] sm:$0xff]  }
   0x4   :  { %2082 = vmatprep.subr.bf16.mxu0 %v2157_v1 }
   0x7   :  { %2083 = vmatpush3.bf16.msra.mxu0 %v2157_v1 }
   0xa   :  { %2085 = vmatmul.mubr.msk.bf16.vlgmr.msra.gmra.mxu0 %vm169_vm0, %v2159_v3 }
   0xb   :  { %2088 = vmatprep.mubr.msk.bf16.mxu0 %vm169_vm0, %v2160_v4 }
  0x12   :  { %2089 = vmatmul.mubr.msk.bf16.gmra.mxu0 %vm169_vm0, %v2161_v5 }
  0x13   :  { %2092 = vmatprep.mubr.msk.bf16.mxu0 %vm169_vm0, %v2162_v6 }
  0x14   :  { %14 = vsyncpa [#allocation3], 0  ;;  %v2163_v7 = vld [vmem:[%s3612_s0 + $0x28] sm:$0xff]   ;;  %v2164_v8 = vld [vmem:[%s3612_s0 + $0x30] sm:$0xff]   ;;  %vm1252_vm1 = vcmask 523264   ;;  %s2327_s10 = smov [#allocation2]  }
  0x15   :  { %v2165_v9 = vld [vmem:[%s3612_s0 + $0x38] sm:$0xff]   ;;  %v2166_v10 = vld [vmem:[%s3612_s0 + $0x40] sm:$0xff]   ;;  %v2167_v11 = vld [vmem:[%s3612_s0 + $0x48] sm:$0xff]   ;;  %s1975_s11 = sshll.u32 %s2327_s10, 4  ;;  %s1976_s11 = int_to_ptr.vmem [resolvable:$true] %s1975_s11 }
  0x16   :  { %v2168_v12 = vld [vmem:[%s3612_s0 + $0x50] sm:$0xff]   ;;  %v2169_v13 = vld [vmem:[%s3612_s0 + $0x58] sm:$0xff]   ;;  %v2170_v14 = vld [vmem:[%s3612_s0 + $0x60] sm:$0xff]   ;;  %s2304_s12 = scalar_lea.vmem %s1976_s11, 2048  ;;  %p2309_p1 = scmp.lt.s32.totalorder %s1976_s11, %s1976_s11 }
  0x17   :  { %v2171_v15 = vld [vmem:[%s3612_s0 + $0x68] sm:$0xff]   ;;  %v2172_v16 = vld [vmem:[%s3612_s0 + $0x70] sm:$0xff]   ;;  %v2173_v17 = vld [vmem:[%s3612_s0 + $0x78] sm:$0xff]   ;;  %p2305_p0 = scmp.ne.s32.totalorder %s1976_s11, %s2304_s12  ;;  %p2310_p2 = scmp.lt.s32.totalorder %s2304_s12, %s2304_s12 }
  0x18   :  { %v2453_v18 = vld [vmem:[%s3614_s2] ss:$0 sm:$0xff] }
  0x19   :  { %p2311_p3 = por %p2310_p2, %p2309_p1 }
  0x1a   :  { %2093 = vmatmul.mubr.msk.bf16.gmra.mxu0 %vm169_vm0, %v2163_v7 }
  0x1b   :  { %2096 = vmatprep.mubr.msk.bf16.mxu0 %vm169_vm0, %v2164_v8  ;;  %p2312_p4 = pnand %p2311_p3, %p2305_p0 }
  0x22   :  { %2097 = vmatmul.mubr.msk.bf16.gmra.mxu0 %vm169_vm0, %v2165_v9 }
  0x23   :  { %2100 = vmatprep.mubr.msk.bf16.mxu0 %vm169_vm0, %v2166_v10 }
  0x2a   :  { %2101 = vmatmul.mubr.msk.bf16.gmra.mxu0 %vm169_vm0, %v2167_v11 }
  0x2b   :  { %2104 = vmatprep.mubr.msk.bf16.mxu0 %vm169_vm0, %v2168_v12 }
  0x32   :  { %2105 = vmatmul.mubr.msk.bf16.gmra.mxu0 %vm169_vm0, %v2169_v13 }
  0x33   :  { %2108 = vmatprep.mubr.msk.bf16.mxu0 %vm169_vm0, %v2170_v14 }
  0x3a   :  { %2109 = vmatmul.mubr.msk.bf16.gmra.mxu0 %vm169_vm0, %v2171_v15 }
  0x3b   :  { %2112 = vmatprep.mubr.msk.bf16.mxu0 %vm169_vm0, %v2172_v16 }
  0x42   :  { %2113 = vmatmul.mubr.msk.bf16.gmra.mxu0 %vm169_vm0, %v2173_v17 }
  0xca   :  { %v2086_v19 = vpop.f32.mrf.mxu0 }
  0xcb   :  { %v2456_v20 = vadd.f32 %v2086_v19, %v2453_v18 }
  0xcc   :  { %v252_v21 = vpop.f32.mrf.mxu0 }
  0xcd   :  { %v2459_v22 = vadd.f32 %v2453_v18, %v252_v21  ;;  %v387_v23 = vsel %vm169_vm0, %v2456_v20, 0.0  ;;  %v512_v27 = vmul.f32 %v2456_v20, %v2456_v20 }
  0xce   :  { %388 = vadd.xlane.f32.xlu1 %v387_v23  ;;  %v2087_v24 = vpop.f32.mrf.mxu0 }
  0xcf   :  { %v2464_v25 = vadd.f32 %v2087_v24, %v2453_v18  ;;  %v381_v26 = vsel %vm169_vm0, %v2459_v22, 0.0  ;;  %v548_v33 = vsel %vm169_vm0, %v512_v27, 0.0  ;;  %v510_v34 = vmul.f32 %v2459_v22, %v2459_v22 }
  0xd0   :  { %v255_v28 = vpop.f32.mrf.mxu0  ;;  %382 = vadd.xlane.f32.xlu0 %v381_v26 }
  0xd1   :  { %v2471_v29 = vadd.f32 %v2453_v18, %v255_v28  ;;  %v390_v30 = vsel %vm169_vm0, %v2464_v25, 0.0  ;;  %v513_v31 = vmul.f32 %v2464_v25, %v2464_v25  ;;  %v542_v39 = vsel %vm169_vm0, %v510_v34, 0.0 }
  0xd2   :  { %391 = vadd.xlane.f32.xlu1 %v390_v30  ;;  %v2090_v32 = vpop.f32.mrf.mxu0 }
  0xd3   :  { %v551_v36 = vsel %vm169_vm0, %v513_v31, 0.0  ;;  %v511_v37 = vmul.f32 %v2471_v29, %v2471_v29  ;;  %v2489_v43 = vadd.f32 %v2090_v32, %v2453_v18  ;;  %v384_v44 = vsel %vm169_vm0, %v2471_v29, 0.0  ;;  %v2174_v31 = vld [vmem:[%s3617_s5 + $0x8] sm:$0xff]  }
  0xd4   :  { %v268_v35 = vpop.f32.mrf.mxu0  ;;  %549 = vadd.xlane.f32.xlu0 %v548_v33  ;;  %2116 = vmatprep.subr.bf16.mxu1 %v2174_v31 }
  0xd5   :  { %v545_v41 = vsel %vm169_vm0, %v511_v37, 0.0  ;;  %v2499_v48 = vadd.f32 %v2453_v18, %v268_v35  ;;  %v399_v49 = vsel %vm169_vm0, %v2489_v43, 0.0  ;;  %v516_v54 = vmul.f32 %v2489_v43, %v2489_v43  ;;  %2117 = vmatpush3.bf16.msra.mxu1 %v2174_v31  ;;  %v2175_v37 = vld [vmem:[%s3617_s5] sm:$0xff]  }
  0xd6   :  { %552 = vadd.xlane.f32.xlu1 %v551_v36  ;;  %v2091_v38 = vpop.f32.mrf.mxu0  ;;  %2118 = vmatprep.subr.bf16.mxu1 %v2175_v37 }
  0xd7   :  { %v2485_v40 = vadd.f32 %v2091_v38, %v2453_v18  ;;  %v393_v53 = vsel %vm169_vm0, %v2499_v48, 0.0  ;;  %v560_v58 = vsel %vm169_vm0, %v516_v54, 0.0  ;;  %v514_v59 = vmul.f32 %v2499_v48, %v2499_v48 }
  0xd8   :  { %543 = vadd.xlane.f32.xlu0 %v542_v39  ;;  %v271_v42 = vpop.f32.mrf.mxu0 }
  0xd9   :  { %v2494_v45 = vadd.f32 %v2453_v18, %v271_v42  ;;  %v402_v46 = vsel %vm169_vm0, %v2485_v40, 0.0  ;;  %v517_v51 = vmul.f32 %v2485_v40, %v2485_v40  ;;  %v554_v0 = vsel %vm169_vm0, %v514_v59, 0.0  ;;  %2119 = vmatpush3.bf16.msra.mxu1 %v2175_v37 }
  0xda   :  { %546 = vadd.xlane.f32.xlu1 %v545_v41  ;;  %v2094_v47 = vpop.f32.mrf.mxu0 }
  0xdb   :  { %v396_v50 = vsel %vm169_vm0, %v2494_v45, 0.0  ;;  %v563_v55 = vsel %vm169_vm0, %v517_v51, 0.0  ;;  %v515_v56 = vmul.f32 %v2494_v45, %v2494_v45  ;;  %v2522_v63 = vadd.f32 %v2094_v47, %v2453_v18 }
  0xdc   :  { %385 = vadd.xlane.f32.xlu0 %v384_v44  ;;  %v284_v52 = vpop.f32.mrf.mxu0 }
  0xdd   :  { %v557_v61 = vsel %vm169_vm0, %v515_v56, 0.0  ;;  %v2531_v4 = vadd.f32 %v2453_v18, %v284_v52  ;;  %v411_v5 = vsel %vm169_vm0, %v2522_v63, 0.0  ;;  %v520_v10 = vmul.f32 %v2522_v63, %v2522_v63 }
  0xde   :  { %403 = vadd.xlane.f32.xlu1 %v402_v46  ;;  %v2095_v57 = vpop.f32.mrf.mxu0 }
  0xdf   :  { %v2518_v60 = vadd.f32 %v2095_v57, %v2453_v18  ;;  %v405_v9 = vsel %vm169_vm0, %v2531_v4, 0.0  ;;  %v572_v14 = vsel %vm169_vm0, %v520_v10, 0.0  ;;  %v518_v15 = vmul.f32 %v2531_v4, %v2531_v4 }
  0xe0   :  { %400 = vadd.xlane.f32.xlu0 %v399_v49  ;;  %v287_v62 = vpop.f32.mrf.mxu0 }
  0xe1   :  { %v2526_v1 = vadd.f32 %v2453_v18, %v287_v62  ;;  %v414_v2 = vsel %vm169_vm0, %v2518_v60, 0.0  ;;  %v521_v7 = vmul.f32 %v2518_v60, %v2518_v60  ;;  %v566_v23 = vsel %vm169_vm0, %v518_v15, 0.0 }
  0xe2   :  { %397 = vadd.xlane.f32.xlu1 %v396_v50  ;;  %v2098_v3 = vpop.f32.mrf.mxu0 }
  0xe3   :  { %v408_v6 = vsel %vm169_vm0, %v2526_v1, 0.0  ;;  %v575_v11 = vsel %vm169_vm0, %v521_v7, 0.0  ;;  %v519_v12 = vmul.f32 %v2526_v1, %v2526_v1  ;;  %v2554_v21 = vadd.f32 %v2098_v3, %v2453_v18 }
  0xe4   :  { %394 = vadd.xlane.f32.xlu0 %v393_v53  ;;  %v300_v8 = vpop.f32.mrf.mxu0 }
  0xe5   :  { %v569_v17 = vsel %vm169_vm0, %v519_v12, 0.0  ;;  %v2563_v28 = vadd.f32 %v2453_v18, %v300_v8  ;;  %v423_v30 = vsel %vm169_vm0, %v2554_v21, 0.0  ;;  %v524_v36 = vmul.f32 %v2554_v21, %v2554_v21 }
  0xe6   :  { %564 = vadd.xlane.f32.xlu1 %v563_v55  ;;  %v2099_v13 = vpop.f32.mrf.mxu0 }
  0xe7   :  { %v2550_v16 = vadd.f32 %v2099_v13, %v2453_v18  ;;  %v417_v35 = vsel %vm169_vm0, %v2563_v28, 0.0  ;;  %v584_v42 = vsel %vm169_vm0, %v524_v36, 0.0  ;;  %v522_v44 = vmul.f32 %v2563_v28, %v2563_v28 }
  0xe8   :  { %561 = vadd.xlane.f32.xlu0 %v560_v58  ;;  %v303_v19 = vpop.f32.mrf.mxu0 }
  0xe9   :  { %v2558_v24 = vadd.f32 %v2453_v18, %v303_v19  ;;  %v426_v26 = vsel %vm169_vm0, %v2550_v16, 0.0  ;;  %v525_v33 = vmul.f32 %v2550_v16, %v2550_v16  ;;  %v578_v51 = vsel %vm169_vm0, %v522_v44, 0.0 }
  0xea   :  { %558 = vadd.xlane.f32.xlu1 %v557_v61  ;;  %v2102_v27 = vpop.f32.mrf.mxu0 }
  0xeb   :  { %v420_v32 = vsel %vm169_vm0, %v2558_v24, 0.0  ;;  %v587_v38 = vsel %vm169_vm0, %v525_v33, 0.0  ;;  %v523_v39 = vmul.f32 %v2558_v24, %v2558_v24  ;;  %v2592_v50 = vadd.f32 %v2102_v27, %v2453_v18 }
  0xec   :  { %555 = vadd.xlane.f32.xlu0 %v554_v0  ;;  %v316_v34 = vpop.f32.mrf.mxu0 }
  0xed   :  { %v581_v47 = vsel %vm169_vm0, %v523_v39, 0.0  ;;  %v2601_v55 = vadd.f32 %v2453_v18, %v316_v34  ;;  %v435_v56 = vsel %vm169_vm0, %v2592_v50, 0.0  ;;  %v528_v62 = vmul.f32 %v2592_v50, %v2592_v50 }
  0xee   :  { %415 = vadd.xlane.f32.xlu1 %v414_v2  ;;  %v2103_v41 = vpop.f32.mrf.mxu0 }
  0xef   :  { %v2588_v46 = vadd.f32 %v2103_v41, %v2453_v18  ;;  %v429_v61 = vsel %vm169_vm0, %v2601_v55, 0.0 }
  0xf0   :  { %412 = vadd.xlane.f32.xlu0 %v411_v5  ;;  %v319_v49 = vpop.f32.mrf.mxu0  ;;  %v596_v5 = vsel %vm169_vm0, %v528_v62, 0.0 }
  0xf1   :  { %v2596_v52 = vadd.f32 %v2453_v18, %v319_v49  ;;  %v438_v53 = vsel %vm169_vm0, %v2588_v46, 0.0  ;;  %v529_v58 = vmul.f32 %v2588_v46, %v2588_v46 }
  0xf2   :  { %409 = vadd.xlane.f32.xlu1 %v408_v6  ;;  %v2106_v54 = vpop.f32.mrf.mxu0  ;;  %v526_v6 = vmul.f32 %v2601_v55, %v2601_v55 }
  0xf3   :  { %v432_v57 = vsel %vm169_vm0, %v2596_v52, 0.0  ;;  %v599_v0 = vsel %vm169_vm0, %v529_v58, 0.0  ;;  %v527_v2 = vmul.f32 %v2596_v52, %v2596_v52  ;;  %v2624_v10 = vadd.f32 %v2106_v54, %v2453_v18 }
  0xf4   :  { %406 = vadd.xlane.f32.xlu0 %v405_v9  ;;  %v332_v59 = vpop.f32.mrf.mxu0 }
  0xf5   :  { %v593_v8 = vsel %vm169_vm0, %v527_v2, 0.0  ;;  %v2633_v15 = vadd.f32 %v2453_v18, %v332_v59 }
  0xf6   :  { %576 = vadd.xlane.f32.xlu1 %v575_v11  ;;  %v2107_v3 = vpop.f32.mrf.mxu0  ;;  %v590_v11 = vsel %vm169_vm0, %v526_v6, 0.0 }
  0xf7   :  { %v2620_v7 = vadd.f32 %v2107_v3, %v2453_v18  ;;  %v441_v27 = vsel %vm169_vm0, %v2633_v15, 0.0 }
  0xf8   :  { %573 = vadd.xlane.f32.xlu0 %v572_v14  ;;  %v335_v9 = vpop.f32.mrf.mxu0 }
  0xf9   :  { %v2628_v12 = vadd.f32 %v2453_v18, %v335_v9  ;;  %v450_v13 = vsel %vm169_vm0, %v2620_v7, 0.0 }
  0xfa   :  { %570 = vadd.xlane.f32.xlu1 %v569_v17  ;;  %v2110_v14 = vpop.f32.mrf.mxu0  ;;  %v447_v17 = vsel %vm169_vm0, %v2624_v10, 0.0 }
  0xfb   :  { %v444_v19 = vsel %vm169_vm0, %v2628_v12, 0.0  ;;  %v2656_v39 = vadd.f32 %v2110_v14, %v2453_v18 }
  0xfc   :  { %567 = vadd.xlane.f32.xlu0 %v566_v23  ;;  %v533_v23 = vmul.f32 %v2620_v7, %v2620_v7 }
  0xfd   :  { %v536_v58 = vmul.f32 %v2656_v39, %v2656_v39 }
  0xfe   :  { %427 = vadd.xlane.f32.xlu1 %v426_v26  ;;  %v348_v26 = vpop.f32.mrf.mxu0  ;;  %v611_v31 = vsel %vm169_vm0, %v533_v23, 0.0 }
  0xff   :  { %v2665_v49 = vadd.f32 %v2453_v18, %v348_v26  ;;  %v620_v2 = vsel %vm169_vm0, %v536_v58, 0.0 }
 0x100   :  { %424 = vadd.xlane.f32.xlu0 %v423_v30  ;;  %v532_v30 = vmul.f32 %v2624_v10, %v2624_v10  ;;  %v2111_v33 = vpop.f32.mrf.mxu0 }
 0x101   :  { %v2652_v36 = vadd.f32 %v2111_v33, %v2453_v18  ;;  %v534_v3 = vmul.f32 %v2665_v49, %v2665_v49 }
 0x102   :  { %421 = vadd.xlane.f32.xlu1 %v420_v32  ;;  %v531_v32 = vmul.f32 %v2628_v12, %v2628_v12  ;;  %v608_v34 = vsel %vm169_vm0, %v532_v30, 0.0 }
 0x103   :  { %v462_v44 = vsel %vm169_vm0, %v2652_v36, 0.0  ;;  %v537_v54 = vmul.f32 %v2652_v36, %v2652_v36  ;;  %v614_v9 = vsel %vm169_vm0, %v534_v3, 0.0 }
 0x104   :  { %418 = vadd.xlane.f32.xlu0 %v417_v35  ;;  %v530_v35 = vmul.f32 %v2633_v15, %v2633_v15  ;;  %v605_v37 = vsel %vm169_vm0, %v531_v32, 0.0 }
 0x105   :  { %v623_v59 = vsel %vm169_vm0, %v537_v54, 0.0 }
 0x106   :  { %588 = vadd.xlane.f32.xlu1 %v587_v38  ;;  %v351_v38 = vpop.f32.mrf.mxu0  ;;  %v602_v41 = vsel %vm169_vm0, %v530_v35, 0.0 }
 0x108   :  { %585 = vadd.xlane.f32.xlu0 %v584_v42  ;;  %v2660_v42 = vadd.f32 %v2453_v18, %v351_v38 }
 0x10a   :  { %582 = vadd.xlane.f32.xlu1 %v581_v47  ;;  %v2114_v47 = vpop.f32.mrf.mxu0 }
 0x10c   :  { %579 = vadd.xlane.f32.xlu0 %v578_v51  ;;  %v459_v51 = vsel %vm169_vm0, %v2656_v39, 0.0 }
 0x10e   :  { %439 = vadd.xlane.f32.xlu1 %v438_v53  ;;  %v456_v53 = vsel %vm169_vm0, %v2660_v42, 0.0 }
 0x110   :  { %436 = vadd.xlane.f32.xlu0 %v435_v56  ;;  %v364_v56 = vpop.f32.mrf.mxu0 }
 0x111   :  { %v2697_v14 = vadd.f32 %v2453_v18, %v364_v56 }
 0x112   :  { %433 = vadd.xlane.f32.xlu1 %v432_v57  ;;  %v453_v57 = vsel %vm169_vm0, %v2665_v49, 0.0  ;;  %v2115_v62 = vpop.f32.mrf.mxu0 }
 0x113   :  { %v465_v26 = vsel %vm169_vm0, %v2697_v14, 0.0 }
 0x114   :  { %430 = vadd.xlane.f32.xlu0 %v429_v61  ;;  %v535_v61 = vmul.f32 %v2660_v42, %v2660_v42  ;;  %v367_v6 = vpop.f32.mrf.mxu0 }
 0x116   :  { %600 = vadd.xlane.f32.xlu1 %v599_v0  ;;  %v2681_v0 = vadd.f32 %v2115_v62, %v2453_v18 }
 0x118   :  { %597 = vadd.xlane.f32.xlu0 %v596_v5  ;;  %v617_v5 = vsel %vm169_vm0, %v535_v61, 0.0  ;;  %v541_v30 = vmul.f32 %v2681_v0, %v2681_v0 }
 0x11a   :  { %594 = vadd.xlane.f32.xlu1 %v593_v8  ;;  %v2688_v8 = vadd.f32 %v2114_v47, %v2453_v18  ;;  %v635_v33 = vsel %vm169_vm0, %v541_v30, 0.0 }
 0x11c   :  { %591 = vadd.xlane.f32.xlu0 %v590_v11  ;;  %3630 = vst [vmem:[#allocation5_spill] sm:$0xff] %v2688_v8  ;;  %v474_v11 = vsel %vm169_vm0, %v2681_v0, 0.0  ;;  %v540_v32 = vmul.f32 %v2688_v8, %v2688_v8 }
 0x11e   :  { %451 = vadd.xlane.f32.xlu1 %v450_v13  ;;  %v2694_v13 = vadd.f32 %v2453_v18, %v367_v6 }
 0x120   :  { %448 = vadd.xlane.f32.xlu0 %v447_v17  ;;  %v471_v17 = vsel %vm169_vm0, %v2688_v8, 0.0  ;;  %v539_v23 = vmul.f32 %v2694_v13, %v2694_v13 }
 0x122   :  { %445 = vadd.xlane.f32.xlu1 %v444_v19  ;;  %v468_v19 = vsel %vm169_vm0, %v2694_v13, 0.0  ;;  %v629_v18 = vsel %vm169_vm0, %v539_v23, 0.0 }
 0x124   :  { %442 = vadd.xlane.f32.xlu0 %v441_v27  ;;  %v538_v27 = vmul.f32 %v2697_v14, %v2697_v14 }
 0x126   :  { %612 = vadd.xlane.f32.xlu1 %v611_v31  ;;  %v626_v31 = vsel %vm169_vm0, %v538_v27, 0.0 }
 0x128   :  { %609 = vadd.xlane.f32.xlu0 %v608_v34  ;;  %v632_v34 = vsel %vm169_vm0, %v540_v32, 0.0 }
 0x12a   :  { %606 = vadd.xlane.f32.xlu1 %v605_v37 }
 0x12c   :  { %603 = vadd.xlane.f32.xlu0 %v602_v41 }
 0x12e   :  { %463 = vadd.xlane.f32.xlu1 %v462_v44 }
 0x130   :  { %460 = vadd.xlane.f32.xlu0 %v459_v51 }
 0x132   :  { %457 = vadd.xlane.f32.xlu1 %v456_v53 }
 0x134   :  { %454 = vadd.xlane.f32.xlu0 %v453_v57 }
 0x136   :  { %624 = vadd.xlane.f32.xlu1 %v623_v59 }
 0x138   :  { %621 = vadd.xlane.f32.xlu0 %v620_v2 }
 0x13a   :  { %618 = vadd.xlane.f32.xlu1 %v617_v5 }
 0x13c   :  { %615 = vadd.xlane.f32.xlu0 %v614_v9 }
 0x13e   :  { %475 = vadd.xlane.f32.xlu1 %v474_v11 }
 0x140   :  { %472 = vadd.xlane.f32.xlu0 %v471_v17 }
 0x142   :  { %469 = vadd.xlane.f32.xlu1 %v468_v19 }
 0x144   :  { %466 = vadd.xlane.f32.xlu0 %v465_v26 }
 0x146   :  { %630 = vadd.xlane.f32.xlu1 %v629_v18 }
 0x148   :  { %627 = vadd.xlane.f32.xlu0 %v626_v31 }
 0x14a   :  { %636 = vadd.xlane.f32.xlu1 %v635_v33 }
 0x14c   :  { %633 = vadd.xlane.f32.xlu0 %v632_v34 }
 0x157   :  { %v389_v35 = vpop.xlane.xlu1 %388 }
 0x158   :  { %v2717_v38 = vmul.f32 0.03125, %v389_v35 }
 0x159   :  { %v383_v37 = vpop.xlane.xlu0 %382 }
 0x15a   :  { %v672_v51 = vmul.f32 %v2717_v38, %v2717_v38  ;;  %v2721_v53 = vmul.f32 0.03125, %v383_v37 }
 0x15b   :  { %v392_v41 = vpop.xlane.xlu1 %391 }
 0x15c   :  { %v481_v44 = vmul.f32 0.03125, %v392_v41  ;;  %v670_v62 = vmul.f32 %v2721_v53, %v2721_v53 }
 0x15d   :  { %v550_v47 = vpop.xlane.xlu0 %549 }
 0x15e   :  { %v640_v54 = vmul.f32 0.03125, %v550_v47  ;;  %v673_v57 = vmul.f32 %v481_v44, %v481_v44 }
 0x15f   :  { %v553_v56 = vpop.xlane.xlu1 %552 }
 0x160   :  { %v704_v58 = vsub.f32 %v640_v54, %v672_v51  ;;  %v641_v59 = vmul.f32 0.03125, %v553_v56 }
 0x161   :  { %v544_v61 = vpop.xlane.xlu0 %543 }
 0x162   :  { %v736_v2 = vadd.f32 1e-05, %v704_v58  ;;  %v705_v3 = vsub.f32 %v641_v59, %v673_v57  ;;  %v638_v5 = vmul.f32 0.03125, %v544_v61  ;;  %v2738_v59 = vld [vmem:[%s3615_s3] ss:$0 sm:$0xff] }
 0x163   :  { %v547_v6 = vpop.xlane.xlu1 %546 }
 0x164   :  { %v737_v9 = vadd.f32 1e-05, %v705_v3  ;;  %v702_v11 = vsub.f32 %v638_v5, %v670_v62  ;;  %2176 = vrsqrt.f32 %v736_v2  ;;  %v639_v27 = vmul.f32 0.03125, %v547_v6 }
 0x165   :  { %v386_v17 = vpop.xlane.xlu0 %385 }
 0x166   :  { %2178 = vrsqrt.f32 %v737_v9  ;;  %v734_v19 = vadd.f32 1e-05, %v702_v11  ;;  %v479_v23 = vmul.f32 0.03125, %v386_v17 }
 0x167   :  { %v404_v26 = vpop.xlane.xlu1 %403 }
 0x168   :  { %2180 = vrsqrt.f32 %v734_v19  ;;  %v671_v18 = vmul.f32 %v479_v23, %v479_v23  ;;  %v2725_v34 = vmul.f32 0.03125, %v404_v26 }
 0x169   :  { %v401_v30 = vpop.xlane.xlu0 %400 }
 0x16a   :  { %v703_v31 = vsub.f32 %v639_v27, %v671_v18  ;;  %v2727_v37 = vmul.f32 0.03125, %v401_v30  ;;  %v677_v51 = vmul.f32 %v2725_v34, %v2725_v34 }
 0x16b   :  { %v398_v32 = vpop.xlane.xlu1 %397 }
 0x16c   :  { %v735_v33 = vadd.f32 1e-05, %v703_v31  ;;  %v2729_v41 = vmul.f32 0.03125, %v398_v32  ;;  %v676_v61 = vmul.f32 %v2727_v37, %v2727_v37 }
 0x16d   :  { %v395_v35 = vpop.xlane.xlu0 %394 }
 0x16e   :  { %2182 = vrsqrt.f32 %v735_v33  ;;  %v2733_v56 = vmul.f32 0.03125, %v395_v35  ;;  %v675_v5 = vmul.f32 %v2729_v41, %v2729_v41 }
 0x16f   :  { %v565_v47 = vpop.xlane.xlu1 %564 }
 0x170   :  { %v645_v54 = vmul.f32 0.03125, %v565_v47  ;;  %v674_v27 = vmul.f32 %v2733_v56, %v2733_v56 }
 0x171   :  { %v562_v57 = vpop.xlane.xlu0 %561  ;;  %v2177_v58 = vpop.eup %2176 }
 0x172   :  { %v709_v62 = vsub.f32 %v645_v54, %v677_v51  ;;  %v644_v2 = vmul.f32 0.03125, %v562_v57  ;;  %v806_v30 = vmul.f32 %v2177_v58, %v2738_v59  ;;  %v2754_v58 = vld [vmem:[%s3616_s4] ss:$0 sm:$0xff] }
 0x173   :  { %v2179_v3 = vpop.eup %2178  ;;  %v559_v6 = vpop.xlane.xlu1 %558 }
 0x174   :  { %v741_v9 = vadd.f32 1e-05, %v709_v62  ;;  %v708_v11 = vsub.f32 %v644_v2, %v676_v61  ;;  %v643_v17 = vmul.f32 0.03125, %v559_v6  ;;  %v807_v19 = vmul.f32 %v2179_v3, %v2738_v59 }
 0x175   :  { %v2181_v26 = vpop.eup %2180  ;;  %v556_v18 = vpop.xlane.xlu0 %555  ;;  %v838_v2 = vmul.f32 %v806_v30, %v2717_v38 }
 0x176   :  { %2184 = vrsqrt.f32 %v741_v9  ;;  %v740_v31 = vadd.f32 1e-05, %v708_v11  ;;  %v707_v32 = vsub.f32 %v643_v17, %v675_v5  ;;  %v642_v33 = vmul.f32 0.03125, %v556_v18 }
 0x177   :  { %v416_v35 = vpop.xlane.xlu1 %415  ;;  %v804_v47 = vmul.f32 %v2181_v26, %v2738_v59  ;;  %v839_v51 = vmul.f32 %v807_v19, %v481_v44  ;;  %v876_v38 = vsub.f32 %v2754_v58, %v838_v2  ;;  %v909_v26 = vmul.f32 %v807_v19, %v2464_v25 }
 0x178   :  { %2186 = vrsqrt.f32 %v740_v31  ;;  %v739_v54 = vadd.f32 1e-05, %v707_v32  ;;  %v706_v57 = vsub.f32 %v642_v33, %v674_v27  ;;  %v2758_v11 = vmul.f32 0.03125, %v416_v35 }
 0x179   :  { %v413_v61 = vpop.xlane.xlu0 %412  ;;  %v836_v62 = vmul.f32 %v804_v47, %v2721_v53  ;;  %v877_v9 = vsub.f32 %v2754_v58, %v839_v51  ;;  %v906_v33 = vmul.f32 %v804_v47, %v2459_v22  ;;  %v908_v51 = vmul.f32 %v806_v30, %v2456_v20 }
 0x17a   :  { %2188 = vrsqrt.f32 %v739_v54  ;;  %v738_v3 = vadd.f32 1e-05, %v706_v57  ;;  %v2763_v18 = vmul.f32 0.03125, %v413_v61  ;;  %v681_v57 = vmul.f32 %v2758_v11, %v2758_v11 }
 0x17b   :  { %v2183_v5 = vpop.eup %2182  ;;  %v410_v6 = vpop.xlane.xlu1 %409  ;;  %v874_v53 = vsub.f32 %v2754_v58, %v836_v62  ;;  %v941_v54 = vadd.f32 %v909_v26, %v877_v9  ;;  %v940_v61 = vadd.f32 %v908_v51, %v876_v38 }
 0x17c   :  { %v805_v44 = vmul.f32 %v2183_v5, %v2738_v59  ;;  %2190 = vrsqrt.f32 %v738_v3  ;;  %v2765_v31 = vmul.f32 0.03125, %v410_v6  ;;  %v680_v3 = vmul.f32 %v2763_v18, %v2763_v18 }
 0x17d   :  { %v407_v17 = vpop.xlane.xlu0 %406  ;;  %v938_v19 = vadd.f32 %v906_v33, %v874_v53  ;;  %v973_v9 = vmax.f32 %v941_v54, 0.0  ;;  %v972_v33 = vmax.f32 %v940_v61, 0.0 }
 0x17e   :  { %v837_v27 = vmul.f32 %v805_v44, %v479_v23  ;;  %v907_v2 = vmul.f32 %v805_v44, %v2471_v29  ;;  %v2773_v25 = vmul.f32 0.03125, %v407_v17  ;;  %v679_v5 = vmul.f32 %v2765_v31, %v2765_v31 }
 0x17f   :  { %v577_v32 = vpop.xlane.xlu1 %576 }
 0x180   :  { %v875_v35 = vsub.f32 %v2754_v58, %v837_v27  ;;  %v649_v62 = vmul.f32 0.03125, %v577_v32  ;;  %v678_v53 = vmul.f32 %v2773_v25, %v2773_v25  ;;  %v970_v32 = vmax.f32 %v938_v19, 0.0 }
 0x181   :  { %v574_v23 = vpop.xlane.xlu0 %573 }
 0x182   :  { %v713_v22 = vsub.f32 %v649_v62, %v681_v57  ;;  %v648_v47 = vmul.f32 0.03125, %v574_v23  ;;  %v939_v20 = vadd.f32 %v907_v2, %v875_v35 }
 0x183   :  { %v2185_v30 = vpop.eup %2184  ;;  %v571_v6 = vpop.xlane.xlu1 %570 }
 0x184   :  { %v745_v26 = vadd.f32 1e-05, %v713_v22  ;;  %v712_v27 = vsub.f32 %v648_v47, %v680_v3  ;;  %v647_v29 = vmul.f32 0.03125, %v571_v6  ;;  %v971_v44 = vmax.f32 %v939_v20, 0.0 }
 0x185   :  { %v2187_v17 = vpop.eup %2186  ;;  %v568_v38 = vpop.xlane.xlu0 %567  ;;  %v811_v51 = vmul.f32 %v2185_v30, %v2738_v59  ;;  %v1003_v6 = vpack.c.bf16 %v973_v9, %v972_v33 }
 0x186   :  { %2192 = vrsqrt.f32 %v745_v26  ;;  %v744_v35 = vadd.f32 1e-05, %v712_v27  ;;  %v711_v57 = vsub.f32 %v647_v29, %v679_v5  ;;  %v646_v62 = vmul.f32 0.03125, %v568_v38 }
 0x187   :  { %v2189_v2 = vpop.eup %2188  ;;  %v428_v23 = vpop.xlane.xlu1 %427  ;;  %v1002_v54 = vpack.c.bf16 %v971_v44, %v970_v32  ;;  %v810_v3 = vmul.f32 %v2187_v17, %v2738_v59  ;;  %v843_v22 = vmul.f32 %v811_v51, %v2725_v34 }
 0x188   :  { %2194 = vrsqrt.f32 %v744_v35  ;;  %v743_v47 = vadd.f32 1e-05, %v711_v57  ;;  %v710_v20 = vsub.f32 %v646_v62, %v678_v53  ;;  %v809_v61 = vmul.f32 %v2189_v2, %v2738_v59 }
 0x189   :  { %v2191_v8 = vpop.eup %2190  ;;  %2120 = vmatprep.mubr.msk.bf16.mxu1 %vm169_vm0, %v1002_v54  ;;  %v425_v19 = vpop.xlane.xlu0 %424  ;;  %v842_v30 = vmul.f32 %v810_v3, %v2727_v37  ;;  %v881_v26 = vsub.f32 %v2754_v58, %v843_v22  ;;  %v912_v44 = vmul.f32 %v810_v3, %v2489_v43  ;;  %v2793_v17 = vmul.f32 0.03125, %v428_v23 }
 0x18a   :  { %2196 = vrsqrt.f32 %v743_v47  ;;  %v742_v5 = vadd.f32 1e-05, %v710_v20  ;;  %2121 = vmatmul.mubr.msk.bf16.vlgmr.msra.gmra.mxu1 %vm169_vm0, %v1003_v6  ;;  %v808_v34 = vmul.f32 %v2191_v8, %v2738_v59  ;;  %v841_v29 = vmul.f32 %v809_v61, %v2729_v41 }
 0x18b   :  { %v422_v27 = vpop.xlane.xlu1 %421  ;;  %v880_v9 = vsub.f32 %v2754_v58, %v842_v30  ;;  %v913_v37 = vmul.f32 %v811_v51, %v2485_v40  ;;  %v911_v33 = vmul.f32 %v809_v61, %v2494_v45  ;;  %v2799_v8 = vmul.f32 0.03125, %v425_v19 }
 0x18c   :  { %2198 = vrsqrt.f32 %v742_v5  ;;  %v840_v38 = vmul.f32 %v808_v34, %v2733_v56  ;;  %v879_v32 = vsub.f32 %v2754_v58, %v841_v29  ;;  %v2801_v41 = vmul.f32 0.03125, %v422_v27 }
 0x18d   :  { %v419_v53 = vpop.xlane.xlu0 %418  ;;  %v944_v35 = vadd.f32 %v912_v44, %v880_v9  ;;  %v910_v62 = vmul.f32 %v808_v34, %v2499_v48  ;;  %v945_v23 = vadd.f32 %v913_v37, %v881_v26  ;;  %v685_v40 = vmul.f32 %v2793_v17, %v2793_v17 }
 0x18e   :  { %v878_v43 = vsub.f32 %v2754_v58, %v840_v38  ;;  %v943_v2 = vadd.f32 %v911_v33, %v879_v32  ;;  %v2807_v51 = vmul.f32 0.03125, %v419_v53  ;;  %v684_v22 = vmul.f32 %v2799_v8, %v2799_v8 }
 0x18f   :  { %v589_v57 = vpop.xlane.xlu1 %588  ;;  %v976_v3 = vmax.f32 %v944_v35, 0.0  ;;  %v683_v48 = vmul.f32 %v2801_v41, %v2801_v41  ;;  %v977_v5 = vmax.f32 %v945_v23, 0.0 }
 0x190   :  { %v653_v56 = vmul.f32 0.03125, %v589_v57  ;;  %v942_v45 = vadd.f32 %v910_v62, %v878_v43  ;;  %v975_v30 = vmax.f32 %v943_v2, 0.0  ;;  %v682_v44 = vmul.f32 %v2807_v51, %v2807_v51 }
 0x191   :  { %v586_v54 = vpop.xlane.xlu0 %585  ;;  %v1005_v38 = vpack.c.bf16 %v977_v5, %v976_v3 }
 0x192   :  { %v717_v47 = vsub.f32 %v653_v56, %v685_v40  ;;  %v652_v20 = vmul.f32 0.03125, %v586_v54  ;;  %v974_v61 = vmax.f32 %v942_v45, 0.0 }
 0x193   :  { %v2193_v6 = vpop.eup %2192  ;;  %v583_v19 = vpop.xlane.xlu1 %582 }
 0x194   :  { %v749_v26 = vadd.f32 1e-05, %v717_v47  ;;  %v716_v27 = vsub.f32 %v652_v20, %v684_v22  ;;  %v651_v34 = vmul.f32 0.03125, %v583_v19  ;;  %v815_v29 = vmul.f32 %v2193_v6, %v2738_v59 }
 0x195   :  { %v2195_v9 = vpop.eup %2194  ;;  %v580_v37 = vpop.xlane.xlu0 %579  ;;  %v1004_v53 = vpack.c.bf16 %v975_v30, %v974_v61 }
 0x196   :  { %2200 = vrsqrt.f32 %v749_v26  ;;  %v748_v32 = vadd.f32 1e-05, %v716_v27  ;;  %v715_v33 = vsub.f32 %v651_v34, %v683_v48  ;;  %v650_v35 = vmul.f32 0.03125, %v580_v37 }
 0x197   :  { %v2197_v57 = vpop.eup %2196  ;;  %2124 = vmatprep.mubr.msk.bf16.mxu1 %vm169_vm0, %v1004_v53  ;;  %v440_v43 = vpop.xlane.xlu1 %439  ;;  %v814_v62 = vmul.f32 %v2195_v9, %v2738_v59  ;;  %v847_v2 = vmul.f32 %v815_v29, %v2758_v11  ;;  %v917_v30 = vmul.f32 %v815_v29, %v2518_v60 }
 0x198   :  { %2202 = vrsqrt.f32 %v748_v32  ;;  %v747_v23 = vadd.f32 1e-05, %v715_v33  ;;  %v714_v40 = vsub.f32 %v650_v35, %v682_v44  ;;  %2125 = vmatmul.mubr.msk.bf16.gmra.mxu1 %vm169_vm0, %v1005_v38  ;;  %v813_v45 = vmul.f32 %v2197_v57, %v2738_v59 }
 0x199   :  { %v2199_v56 = vpop.eup %2198  ;;  %v437_v54 = vpop.xlane.xlu0 %436  ;;  %v846_v3 = vmul.f32 %v814_v62, %v2763_v18  ;;  %v885_v47 = vsub.f32 %v2754_v58, %v847_v2  ;;  %v916_v19 = vmul.f32 %v814_v62, %v2522_v63  ;;  %v2827_v61 = vmul.f32 0.03125, %v440_v43 }
 0x19a   :  { %2204 = vrsqrt.f32 %v747_v23  ;;  %v746_v22 = vadd.f32 1e-05, %v714_v40  ;;  %v812_v6 = vmul.f32 %v2199_v56, %v2738_v59  ;;  %v845_v11 = vmul.f32 %v813_v45, %v2765_v31 }
 0x19b   :  { %v434_v20 = vpop.xlane.xlu1 %433  ;;  %v884_v48 = vsub.f32 %v2754_v58, %v846_v3  ;;  %v915_v27 = vmul.f32 %v813_v45, %v2526_v1  ;;  %v2833_v9 = vmul.f32 0.03125, %v437_v54  ;;  %v949_v38 = vadd.f32 %v917_v30, %v885_v47 }
 0x19c   :  { %2206 = vrsqrt.f32 %v746_v22  ;;  %v844_v18 = vmul.f32 %v812_v6, %v2773_v25  ;;  %v883_v26 = vsub.f32 %v2754_v58, %v845_v11  ;;  %v2835_v31 = vmul.f32 0.03125, %v434_v20 }
 0x19d   :  { %v431_v5 = vpop.xlane.xlu0 %430  ;;  %v948_v34 = vadd.f32 %v916_v19, %v884_v48  ;;  %v914_v37 = vmul.f32 %v812_v6, %v2531_v4  ;;  %v689_v60 = vmul.f32 %v2827_v61, %v2827_v61  ;;  %v688_v35 = vmul.f32 %v2833_v9, %v2833_v9 }
 0x19e   :  { %v882_v63 = vsub.f32 %v2754_v58, %v844_v18  ;;  %v947_v53 = vadd.f32 %v915_v27, %v883_v26  ;;  %v2841_v29 = vmul.f32 0.03125, %v431_v5  ;;  %v687_v4 = vmul.f32 %v2835_v31, %v2835_v31 }
 0x19f   :  { %v601_v44 = vpop.xlane.xlu1 %600  ;;  %v980_v33 = vmax.f32 %v948_v34, 0.0  ;;  %v981_v56 = vmax.f32 %v949_v38, 0.0 }
 0x1a0   :  { %v657_v25 = vmul.f32 0.03125, %v601_v44  ;;  %v946_v1 = vadd.f32 %v914_v37, %v882_v63  ;;  %v979_v40 = vmax.f32 %v947_v53, 0.0  ;;  %v686_v20 = vmul.f32 %v2841_v29, %v2841_v29 }
 0x1a1   :  { %v598_v32 = vpop.xlane.xlu0 %597  ;;  %v1007_v48 = vpack.c.bf16 %v981_v56, %v980_v33 }
 0x1a2   :  { %v721_v57 = vsub.f32 %v657_v25, %v689_v60  ;;  %v656_v43 = vmul.f32 0.03125, %v598_v32  ;;  %v978_v23 = vmax.f32 %v946_v1, 0.0 }
 0x1a3   :  { %v2201_v62 = vpop.eup %2200  ;;  %v595_v2 = vpop.xlane.xlu1 %594 }
 0x1a4   :  { %v753_v54 = vadd.f32 1e-05, %v721_v57  ;;  %v720_v45 = vsub.f32 %v656_v43, %v688_v35  ;;  %v655_v3 = vmul.f32 0.03125, %v595_v2  ;;  %v819_v22 = vmul.f32 %v2201_v62, %v2738_v59 }
 0x1a5   :  { %v2203_v47 = vpop.eup %2202  ;;  %v592_v6 = vpop.xlane.xlu0 %591  ;;  %v1006_v11 = vpack.c.bf16 %v979_v40, %v978_v23 }
 0x1a6   :  { %2208 = vrsqrt.f32 %v753_v54  ;;  %v752_v19 = vadd.f32 1e-05, %v720_v45  ;;  %v719_v30 = vsub.f32 %v655_v3, %v687_v4  ;;  %v654_v5 = vmul.f32 0.03125, %v592_v6 }
 0x1a7   :  { %v2205_v18 = vpop.eup %2204  ;;  %2128 = vmatprep.mubr.msk.bf16.mxu1 %vm169_vm0, %v1006_v11  ;;  %v452_v26 = vpop.xlane.xlu1 %451  ;;  %v818_v27 = vmul.f32 %v2203_v47, %v2738_v59  ;;  %v851_v34 = vmul.f32 %v819_v22, %v2793_v17  ;;  %v921_v62 = vmul.f32 %v819_v22, %v2550_v16 }
 0x1a8   :  { %2210 = vrsqrt.f32 %v752_v19  ;;  %v751_v44 = vadd.f32 1e-05, %v719_v30  ;;  %v718_v63 = vsub.f32 %v654_v5, %v686_v20  ;;  %2129 = vmatmul.mubr.msk.bf16.gmra.mxu1 %vm169_vm0, %v1007_v48  ;;  %v817_v38 = vmul.f32 %v2205_v18, %v2738_v59 }
 0x1a9   :  { %v2207_v37 = vpop.eup %2206  ;;  %v449_v53 = vpop.xlane.xlu0 %448  ;;  %v850_v60 = vmul.f32 %v818_v27, %v2799_v8  ;;  %v889_v32 = vsub.f32 %v2754_v58, %v851_v34  ;;  %v920_v57 = vmul.f32 %v818_v27, %v2554_v21  ;;  %v2861_v43 = vmul.f32 0.03125, %v452_v26 }
 0x1aa   :  { %2212 = vrsqrt.f32 %v751_v44  ;;  %v750_v25 = vadd.f32 1e-05, %v718_v63  ;;  %v816_v33 = vmul.f32 %v2207_v37, %v2738_v59  ;;  %v849_v17 = vmul.f32 %v817_v38, %v2801_v41 }
 0x1ab   :  { %v446_v1 = vpop.xlane.xlu1 %445  ;;  %v888_v35 = vsub.f32 %v2754_v58, %v850_v60  ;;  %v919_v23 = vmul.f32 %v817_v38, %v2558_v24  ;;  %v2867_v56 = vmul.f32 0.03125, %v449_v53  ;;  %v953_v47 = vadd.f32 %v921_v62, %v889_v32 }
 0x1ac   :  { %2214 = vrsqrt.f32 %v750_v25  ;;  %v848_v8 = vmul.f32 %v816_v33, %v2807_v51  ;;  %v887_v2 = vsub.f32 %v2754_v58, %v849_v17  ;;  %v2869_v41 = vmul.f32 0.03125, %v446_v1 }
 0x1ad   :  { %v443_v4 = vpop.xlane.xlu0 %442  ;;  %v952_v40 = vadd.f32 %v920_v57, %v888_v35  ;;  %v918_v45 = vmul.f32 %v816_v33, %v2563_v28  ;;  %v693_v16 = vmul.f32 %v2861_v43, %v2861_v43  ;;  %v692_v11 = vmul.f32 %v2867_v56, %v2867_v56 }
 0x1ae   :  { %v886_v21 = vsub.f32 %v2754_v58, %v848_v8  ;;  %v951_v3 = vadd.f32 %v919_v23, %v887_v2  ;;  %v2875_v22 = vmul.f32 0.03125, %v443_v4  ;;  %v691_v28 = vmul.f32 %v2869_v41, %v2869_v41 }
 0x1af   :  { %v613_v54 = vpop.xlane.xlu1 %612  ;;  %v984_v6 = vmax.f32 %v952_v40, 0.0  ;;  %v985_v27 = vmax.f32 %v953_v47, 0.0 }
 0x1b0   :  { %v661_v51 = vmul.f32 0.03125, %v613_v54  ;;  %v950_v24 = vadd.f32 %v918_v45, %v886_v21  ;;  %v983_v26 = vmax.f32 %v951_v3, 0.0  ;;  %v690_v38 = vmul.f32 %v2875_v22, %v2875_v22 }
 0x1b1   :  { %v610_v20 = vpop.xlane.xlu0 %609  ;;  %v1009_v32 = vpack.c.bf16 %v985_v27, %v984_v6 }
 0x1b2   :  { %v725_v48 = vsub.f32 %v661_v51, %v693_v16  ;;  %v660_v19 = vmul.f32 0.03125, %v610_v20  ;;  %v982_v18 = vmax.f32 %v950_v24, 0.0 }
 0x1b3   :  { %v2209_v30 = vpop.eup %2208  ;;  %v607_v5 = vpop.xlane.xlu1 %606 }
 0x1b4   :  { %v757_v34 = vadd.f32 1e-05, %v725_v48  ;;  %v724_v44 = vsub.f32 %v660_v19, %v692_v11  ;;  %v659_v63 = vmul.f32 0.03125, %v607_v5  ;;  %v823_v37 = vmul.f32 %v2209_v30, %v2738_v59 }
 0x1b5   :  { %v2211_v53 = vpop.eup %2210  ;;  %v604_v60 = vpop.xlane.xlu0 %603  ;;  %v1008_v25 = vpack.c.bf16 %v983_v26, %v982_v18 }
 0x1b6   :  { %2216 = vrsqrt.f32 %v757_v34  ;;  %v756_v1 = vadd.f32 1e-05, %v724_v44  ;;  %v723_v33 = vsub.f32 %v659_v63, %v691_v28  ;;  %v658_v17 = vmul.f32 0.03125, %v604_v60 }
 0x1b7   :  { %v2213_v35 = vpop.eup %2212  ;;  %2132 = vmatprep.mubr.msk.bf16.mxu1 %vm169_vm0, %v1008_v25  ;;  %v464_v57 = vpop.xlane.xlu1 %463  ;;  %v822_v62 = vmul.f32 %v2211_v53, %v2738_v59  ;;  %v855_v4 = vmul.f32 %v823_v37, %v2827_v61  ;;  %v925_v6 = vmul.f32 %v823_v37, %v2588_v46 }
 0x1b8   :  { %2218 = vrsqrt.f32 %v756_v1  ;;  %v755_v8 = vadd.f32 1e-05, %v723_v33  ;;  %v722_v2 = vsub.f32 %v658_v17, %v690_v38  ;;  %2133 = vmatmul.mubr.msk.bf16.gmra.mxu1 %vm169_vm0, %v1009_v32  ;;  %v821_v54 = vmul.f32 %v2213_v35, %v2738_v59 }
 0x1b9   :  { %v2215_v23 = vpop.eup %2214  ;;  %v461_v40 = vpop.xlane.xlu0 %460  ;;  %v854_v21 = vmul.f32 %v822_v62, %v2833_v9  ;;  %v893_v3 = vsub.f32 %v2754_v58, %v855_v4  ;;  %v924_v20 = vmul.f32 %v822_v62, %v2592_v50  ;;  %v2895_v24 = vmul.f32 0.03125, %v464_v57 }
 0x1ba   :  { %2220 = vrsqrt.f32 %v755_v8  ;;  %v754_v45 = vadd.f32 1e-05, %v722_v2  ;;  %v820_v16 = vmul.f32 %v2215_v23, %v2738_v59  ;;  %v853_v61 = vmul.f32 %v821_v54, %v2835_v31 }
 0x1bb   :  { %v458_v47 = vpop.xlane.xlu1 %457  ;;  %v892_v51 = vsub.f32 %v2754_v58, %v854_v21  ;;  %v923_v19 = vmul.f32 %v821_v54, %v2596_v52  ;;  %v2901_v28 = vmul.f32 0.03125, %v461_v40  ;;  %v957_v27 = vadd.f32 %v925_v6, %v893_v3 }
 0x1bc   :  { %2222 = vrsqrt.f32 %v754_v45  ;;  %v852_v9 = vmul.f32 %v820_v16, %v2841_v29  ;;  %v891_v48 = vsub.f32 %v2754_v58, %v853_v61  ;;  %v2903_v31 = vmul.f32 0.03125, %v458_v47 }
 0x1bd   :  { %v455_v11 = vpop.xlane.xlu0 %454  ;;  %v956_v30 = vadd.f32 %v924_v20, %v892_v51  ;;  %v922_v18 = vmul.f32 %v820_v16, %v2601_v55  ;;  %v697_v46 = vmul.f32 %v2895_v24, %v2895_v24  ;;  %v696_v37 = vmul.f32 %v2901_v28, %v2901_v28 }
 0x1be   :  { %v890_v50 = vsub.f32 %v2754_v58, %v852_v9  ;;  %v955_v26 = vadd.f32 %v923_v19, %v891_v48  ;;  %v2909_v34 = vmul.f32 0.03125, %v455_v11  ;;  %v695_v55 = vmul.f32 %v2903_v31, %v2903_v31 }
 0x1bf   :  { %v625_v5 = vpop.xlane.xlu1 %624  ;;  %v988_v63 = vmax.f32 %v956_v30, 0.0  ;;  %v989_v33 = vmax.f32 %v957_v27, 0.0 }
 0x1c0   :  { %v665_v29 = vmul.f32 0.03125, %v625_v5  ;;  %v954_v52 = vadd.f32 %v922_v18, %v890_v50  ;;  %v987_v1 = vmax.f32 %v955_v26, 0.0  ;;  %v694_v8 = vmul.f32 %v2909_v34, %v2909_v34 }
 0x1c1   :  { %v622_v44 = vpop.xlane.xlu0 %621  ;;  %v1011_v40 = vpack.c.bf16 %v989_v33, %v988_v63 }
 0x1c2   :  { %v729_v53 = vsub.f32 %v665_v29, %v697_v46  ;;  %v664_v38 = vmul.f32 0.03125, %v622_v44  ;;  %v986_v32 = vmax.f32 %v954_v52, 0.0 }
 0x1c3   :  { %v2217_v60 = vpop.eup %2216  ;;  %v619_v25 = vpop.xlane.xlu1 %618 }
 0x1c4   :  { %v761_v17 = vadd.f32 1e-05, %v729_v53  ;;  %v728_v35 = vsub.f32 %v664_v38, %v696_v37  ;;  %v663_v57 = vmul.f32 0.03125, %v619_v25  ;;  %v827_v62 = vmul.f32 %v2217_v60, %v2738_v59 }
 0x1c5   :  { %v2219_v4 = vpop.eup %2218  ;;  %v616_v2 = vpop.xlane.xlu0 %615  ;;  %v1010_v23 = vpack.c.bf16 %v987_v1, %v986_v32 }
 0x1c6   :  { %2224 = vrsqrt.f32 %v761_v17  ;;  %v760_v54 = vadd.f32 1e-05, %v728_v35  ;;  %v727_v21 = vsub.f32 %v663_v57, %v695_v55  ;;  %v662_v45 = vmul.f32 0.03125, %v616_v2 }
 0x1c7   :  { %v2221_v3 = vpop.eup %2220  ;;  %2136 = vmatprep.mubr.msk.bf16.mxu1 %vm169_vm0, %v1010_v23  ;;  %v476_v47 = vpop.xlane.xlu1 %475  ;;  %v826_v16 = vmul.f32 %v2219_v4, %v2738_v59  ;;  %v859_v61 = vmul.f32 %v827_v62, %v2861_v43  ;;  %v929_v46 = vmul.f32 %v827_v62, %v2620_v7 }
 0x1c8   :  { %2226 = vrsqrt.f32 %v760_v54  ;;  %v759_v51 = vadd.f32 1e-05, %v727_v21  ;;  %v726_v20 = vsub.f32 %v662_v45, %v694_v8  ;;  %2137 = vmatmul.mubr.msk.bf16.gmra.mxu1 %vm169_vm0, %v1011_v40  ;;  %v825_v9 = vmul.f32 %v2221_v3, %v2738_v59 }
 0x1c9   :  { %v2223_v6 = vpop.eup %2222  ;;  %v473_v11 = vpop.xlane.xlu0 %472  ;;  %v858_v48 = vmul.f32 %v826_v16, %v2867_v56  ;;  %v897_v30 = vsub.f32 %v2754_v58, %v859_v61  ;;  %v928_v26 = vmul.f32 %v826_v16, %v2624_v10  ;;  %v2935_v37 = vmul.f32 0.03125, %v476_v47 }
 0x1ca   :  { %2228 = vrsqrt.f32 %v759_v51  ;;  %v758_v19 = vadd.f32 1e-05, %v726_v20  ;;  %v824_v50 = vmul.f32 %v2223_v6, %v2738_v59  ;;  %v857_v43 = vmul.f32 %v825_v9, %v2869_v41 }
 0x1cb   :  { %v470_v5 = vpop.xlane.xlu1 %469  ;;  %v896_v18 = vsub.f32 %v2754_v58, %v858_v48  ;;  %v927_v52 = vmul.f32 %v825_v9, %v2628_v12  ;;  %v961_v55 = vadd.f32 %v929_v46, %v897_v30  ;;  %v2943_v25 = vmul.f32 0.03125, %v473_v11 }
 0x1cc   :  { %2230 = vrsqrt.f32 %v758_v19  ;;  %v2929_v27 = vmul.f32 0.03125, %v470_v5  ;;  %v856_v56 = vmul.f32 %v824_v50, %v2875_v22  ;;  %v895_v44 = vsub.f32 %v2754_v58, %v857_v43 }
 0x1cd   :  { %v467_v29 = vpop.xlane.xlu0 %466  ;;  %v960_v63 = vadd.f32 %v928_v26, %v896_v18  ;;  %v926_v38 = vmul.f32 %v824_v50, %v2633_v15  ;;  %v701_v15 = vmul.f32 %v2935_v37, %v2935_v37  ;;  %v993_v2 = vmax.f32 %v961_v55, 0.0 }
 0x1ce   :  { %v2937_v41 = vmul.f32 0.03125, %v467_v29  ;;  %v894_v10 = vsub.f32 %v2754_v58, %v856_v56  ;;  %v959_v60 = vadd.f32 %v927_v52, %v895_v44  ;;  %v699_v7 = vmul.f32 %v2929_v27, %v2929_v27 }
 0x1cf   :  { %v631_v53 = vpop.xlane.xlu1 %630  ;;  %v992_v1 = vmax.f32 %v960_v63, 0.0  ;;  %v700_v3 = vmul.f32 %v2943_v25, %v2943_v25 }
 0x1d0   :  { %v667_v22 = vmul.f32 0.03125, %v631_v53  ;;  %v958_v12 = vadd.f32 %v926_v38, %v894_v10  ;;  %v698_v33 = vmul.f32 %v2937_v41, %v2937_v41  ;;  %v991_v8 = vmax.f32 %v959_v60, 0.0 }
 0x1d1   :  { %v628_v32 = vpop.xlane.xlu0 %627  ;;  %v1013_v61 = vpack.c.bf16 %v993_v2, %v992_v1 }
 0x1d2   :  { %v731_v17 = vsub.f32 %v667_v22, %v699_v7  ;;  %v666_v35 = vmul.f32 0.03125, %v628_v32  ;;  %v990_v4 = vmax.f32 %v958_v12, 0.0 }
 0x1d3   :  { %v2225_v57 = vpop.eup %2224  ;;  %v637_v62 = vpop.xlane.xlu1 %636 }
 0x1d4   :  { %v763_v23 = vadd.f32 1e-05, %v731_v17  ;;  %v730_v40 = vsub.f32 %v666_v35, %v698_v33  ;;  %v669_v54 = vmul.f32 0.03125, %v637_v62  ;;  %v831_v21 = vmul.f32 %v2225_v57, %v2738_v59 }
 0x1d5   :  { %v2227_v45 = vpop.eup %2226  ;;  %v634_v47 = vpop.xlane.xlu0 %633  ;;  %v1012_v16 = vpack.c.bf16 %v991_v8, %v990_v4 }
 0x1d6   :  { %2232 = vrsqrt.f32 %v763_v23  ;;  %v762_v51 = vadd.f32 1e-05, %v730_v40  ;;  %v733_v20 = vsub.f32 %v669_v54, %v701_v15  ;;  %v668_v6 = vmul.f32 0.03125, %v634_v47 }
 0x1d7   :  { %v2229_v11 = vpop.eup %2228  ;;  %2140 = vmatprep.mubr.msk.bf16.mxu1 %vm169_vm0, %v1012_v16  ;;  %v830_v9 = vmul.f32 %v2227_v45, %v2738_v59  ;;  %v863_v48 = vmul.f32 %v831_v21, %v2895_v24  ;;  %v3631_v16 = vld [vmem:[#allocation5_spill] sm:$0xff] }
 0x1d8   :  { %2234 = vrsqrt.f32 %v762_v51  ;;  %v765_v19 = vadd.f32 1e-05, %v733_v20  ;;  %v732_v30 = vsub.f32 %v668_v6, %v700_v3  ;;  %2141 = vmatmul.mubr.msk.bf16.gmra.mxu1 %vm169_vm0, %v1013_v61  ;;  %v829_v5 = vmul.f32 %v2229_v11, %v2738_v59 }
 0x1d9   :  { %v2231_v50 = vpop.eup %2230  ;;  %v862_v43 = vmul.f32 %v830_v9, %v2901_v28  ;;  %v901_v24 = vsub.f32 %v2754_v58, %v863_v48  ;;  %v932_v56 = vmul.f32 %v830_v9, %v2656_v39  ;;  %v933_v28 = vmul.f32 %v831_v21, %v2652_v36 }
 0x1da   :  { %2236 = vrsqrt.f32 %v765_v19  ;;  %v764_v18 = vadd.f32 1e-05, %v732_v30  ;;  %v828_v26 = vmul.f32 %v2231_v50, %v2738_v59  ;;  %v861_v46 = vmul.f32 %v829_v5, %v2903_v31 }
 0x1db   :  { %v900_v29 = vsub.f32 %v2754_v58, %v862_v43  ;;  %v931_v63 = vmul.f32 %v829_v5, %v2660_v42  ;;  %v965_v60 = vadd.f32 %v933_v28, %v901_v24 }
 0x1dc   :  { %2238 = vrsqrt.f32 %v764_v18  ;;  %v860_v44 = vmul.f32 %v828_v26, %v2909_v34  ;;  %v899_v52 = vsub.f32 %v2754_v58, %v861_v46  ;;  %v930_v31 = vmul.f32 %v828_v26, %v2665_v49 }
 0x1dd   :  { %v964_v53 = vadd.f32 %v932_v56, %v900_v29  ;;  %v997_v12 = vmax.f32 %v965_v60, 0.0 }
 0x1de   :  { %v898_v10 = vsub.f32 %v2754_v58, %v860_v44  ;;  %v963_v38 = vadd.f32 %v931_v63, %v899_v52 }
 0x1df   :  { %v996_v7 = vmax.f32 %v964_v53, 0.0 }
 0x1e0   :  { %v962_v55 = vadd.f32 %v930_v31, %v898_v10  ;;  %v995_v39 = vmax.f32 %v963_v38, 0.0 }
 0x1e1   :  { %v1015_v42 = vpack.c.bf16 %v997_v12, %v996_v7 }
 0x1e2   :  { %v994_v22 = vmax.f32 %v962_v55, 0.0 }
 0x1e3   :  { %v2233_v32 = vpop.eup %2232 }
 0x1e4   :  { %v1014_v34 = vpack.c.bf16 %v995_v39, %v994_v22  ;;  %v833_v1 = vmul.f32 %v2233_v32, %v2738_v59 }
 0x1e5   :  { %v2235_v33 = vpop.eup %2234 }
 0x1e6   :  { %2144 = vmatprep.mubr.msk.bf16.mxu1 %vm169_vm0, %v1014_v34  ;;  %v832_v36 = vmul.f32 %v2235_v33, %v2738_v59  ;;  %v865_v17 = vmul.f32 %v833_v1, %v2929_v27  ;;  %v935_v15 = vmul.f32 %v833_v1, %v2694_v13 }
 0x1e7   :  { %v2237_v49 = vpop.eup %2236  ;;  %2145 = vmatmul.mubr.msk.bf16.gmra.mxu1 %vm169_vm0, %v1015_v42 }
 0x1e8   :  { %v864_v35 = vmul.f32 %v832_v36, %v2937_v41  ;;  %v903_v57 = vsub.f32 %v2754_v58, %v865_v17  ;;  %v835_v62 = vmul.f32 %v2237_v49, %v2738_v59  ;;  %v934_v8 = vmul.f32 %v832_v36, %v2697_v14 }
 0x1e9   :  { %v2239_v4 = vpop.eup %2238 }
 0x1ea   :  { %v902_v2 = vsub.f32 %v2754_v58, %v864_v35  ;;  %v967_v23 = vadd.f32 %v935_v15, %v903_v57  ;;  %v834_v40 = vmul.f32 %v2239_v4, %v2738_v59  ;;  %v867_v27 = vmul.f32 %v835_v62, %v2935_v37 }
 0x1eb   :  { %v937_v45 = vmul.f32 %v835_v62, %v2681_v0  ;;  %v2992_v0 = vld [vmem:[%s3618_s6] ss:$0 sm:$0xff] }
 0x1ec   :  { %v966_v54 = vadd.f32 %v934_v8, %v902_v2  ;;  %v866_v21 = vmul.f32 %v834_v40, %v2943_v25  ;;  %v905_v41 = vsub.f32 %v2754_v58, %v867_v27  ;;  %v999_v13 = vmax.f32 %v967_v23, 0.0 }
 0x1ed   :  { %v936_v14 = vmul.f32 %v834_v40, %v3631_v16 }
 0x1ee   :  { %v998_v3 = vmax.f32 %v966_v54, 0.0  ;;  %v904_v47 = vsub.f32 %v2754_v58, %v866_v21  ;;  %v969_v61 = vadd.f32 %v937_v45, %v905_v41 }
 0x1f0   :  { %v1016_v51 = vpack.c.bf16 %v999_v13, %v998_v3  ;;  %v968_v20 = vadd.f32 %v936_v14, %v904_v47  ;;  %v1001_v37 = vmax.f32 %v969_v61, 0.0 }
 0x1f2   :  { %2148 = vmatprep.mubr.msk.bf16.mxu1 %vm169_vm0, %v1016_v51  ;;  %v1000_v59 = vmax.f32 %v968_v20, 0.0 }
 0x1f4   :  { %v1017_v6 = vpack.c.bf16 %v1001_v37, %v1000_v59 }
 0x1f6   :  { %2149 = vmatmul.mubr.msk.bf16.gmra.mxu1 %vm169_vm0, %v1017_v6 }
 0x24a   :  { %v2122_v25 = vpop.f32.mrf.mxu1 }
 0x24b   :  { %v2995_v58 = vadd.f32 %v2122_v25, %v2992_v0 }
 0x24c   :  { %v1123_v11 = vpop.f32.mrf.mxu1 }
 0x24d   :  { %v2998_v9 = vadd.f32 %v2992_v0, %v1123_v11  ;;  %v1259_v48 = vsel %vm1252_vm1, %v2995_v58, 0.0 }
 0x24e   :  { %1260 = vadd.xlane.f32.xlu0 %v1259_v48  ;;  %v2123_v19 = vpop.f32.mrf.mxu1 }
 0x24f   :  { %v3003_v30 = vadd.f32 %v2123_v19, %v2992_v0  ;;  %v1253_v18 = vsel %vm1252_vm1, %v2998_v9, 0.0 }
 0x250   :  { %v1126_v5 = vpop.f32.mrf.mxu1 }
 0x251   :  { %v3006_v50 = vadd.f32 %v2992_v0, %v1126_v5  ;;  %v1262_v43 = vsel %vm1252_vm1, %v3003_v30, 0.0 }
 0x252   :  { %1263 = vadd.xlane.f32.xlu1 %v1262_v43  ;;  %1254 = vadd.xlane.f32.xlu0 %v1253_v18 }
 0x253   :  { %v1256_v26 = vsel %vm1252_vm1, %v3006_v50, 0.0 }
 0x256   :  { %1257 = vadd.xlane.f32.xlu1 %v1256_v26 }
 0x258   :  { %v2126_v46 = vpop.f32.mrf.mxu1 }
 0x259   :  { %v3015_v29 = vadd.f32 %v2126_v46, %v2992_v0 }
 0x25a   :  { %v1139_v24 = vpop.f32.mrf.mxu1 }
 0x25b   :  { %v3018_v56 = vadd.f32 %v2992_v0, %v1139_v24  ;;  %v1271_v44 = vsel %vm1252_vm1, %v3015_v29, 0.0 }
 0x25c   :  { %1272 = vadd.xlane.f32.xlu0 %v1271_v44  ;;  %v2127_v52 = vpop.f32.mrf.mxu1 }
 0x25d   :  { %v3023_v63 = vadd.f32 %v2127_v52, %v2992_v0  ;;  %v1265_v31 = vsel %vm1252_vm1, %v3018_v56, 0.0 }
 0x25e   :  { %v1142_v28 = vpop.f32.mrf.mxu1 }
 0x25f   :  { %v3026_v53 = vadd.f32 %v2992_v0, %v1142_v28  ;;  %v1274_v10 = vsel %vm1252_vm1, %v3023_v63, 0.0 }
 0x260   :  { %1275 = vadd.xlane.f32.xlu1 %v1274_v10  ;;  %1266 = vadd.xlane.f32.xlu0 %v1265_v31 }
 0x261   :  { %v1268_v38 = vsel %vm1252_vm1, %v3026_v53, 0.0 }
 0x264   :  { %1269 = vadd.xlane.f32.xlu1 %v1268_v38 }
 0x268   :  { %v3034_v60 = vpop.f32.mrf.mxu1 }
 0x26a   :  { %v3036_v55 = vpop.f32.mrf.mxu1 }
 0x26c   :  { %v3038_v7 = vpop.f32.mrf.mxu1 }
 0x26e   :  { %v3040_v22 = vpop.f32.mrf.mxu1 }
 0x278   :  { %v3042_v39 = vpop.f32.mrf.mxu1 }
 0x27a   :  { %v3044_v32 = vpop.f32.mrf.mxu1 }
 0x27c   :  { %v3046_v12 = vpop.f32.mrf.mxu1 }
 0x27e   :  { %v3048_v34 = vpop.f32.mrf.mxu1 }
 0x288   :  { %v2138_v1 = vpop.f32.mrf.mxu1 }
 0x289   :  { %v3051_v33 = vadd.f32 %v2138_v1, %v2992_v0 }
 0x28a   :  { %v1187_v42 = vpop.f32.mrf.mxu1 }
 0x28b   :  { %v3054_v36 = vadd.f32 %v2992_v0, %v1187_v42  ;;  %v1307_v17 = vsel %vm1252_vm1, %v3051_v33, 0.0  ;;  %v1400_v8 = vmul.f32 %v3051_v33, %v3051_v33 }
 0x28c   :  { %1308 = vadd.xlane.f32.xlu0 %v1307_v17  ;;  %v2139_v49 = vpop.f32.mrf.mxu1 }
 0x28d   :  { %v3059_v35 = vadd.f32 %v2139_v49, %v2992_v0  ;;  %v1301_v4 = vsel %vm1252_vm1, %v3054_v36, 0.0  ;;  %v1468_v23 = vsel %vm1252_vm1, %v1400_v8, 0.0  ;;  %v1398_v27 = vmul.f32 %v3054_v36, %v3054_v36 }
 0x28e   :  { %v1190_v57 = vpop.f32.mrf.mxu1 }
 0x28f   :  { %v3062_v15 = vadd.f32 %v2992_v0, %v1190_v57  ;;  %v1310_v62 = vsel %vm1252_vm1, %v3059_v35, 0.0  ;;  %v1401_v40 = vmul.f32 %v3059_v35, %v3059_v35  ;;  %v1462_v21 = vsel %vm1252_vm1, %v1398_v27, 0.0 }
 0x290   :  { %1311 = vadd.xlane.f32.xlu1 %v1310_v62  ;;  %1302 = vadd.xlane.f32.xlu0 %v1301_v4 }
 0x291   :  { %v1304_v2 = vsel %vm1252_vm1, %v3062_v15, 0.0  ;;  %v1471_v54 = vsel %vm1252_vm1, %v1401_v40, 0.0  ;;  %v1399_v41 = vmul.f32 %v3062_v15, %v3062_v15 }
 0x293   :  { %v1465_v16 = vsel %vm1252_vm1, %v1399_v41, 0.0 }
 0x294   :  { %1305 = vadd.xlane.f32.xlu1 %v1304_v2  ;;  %1469 = vadd.xlane.f32.xlu0 %v1468_v23 }
 0x298   :  { %1472 = vadd.xlane.f32.xlu1 %v1471_v54  ;;  %1463 = vadd.xlane.f32.xlu0 %v1462_v21  ;;  %v2142_v45 = vpop.f32.mrf.mxu1 }
 0x299   :  { %v3082_v13 = vadd.f32 %v2142_v45, %v2992_v0 }
 0x29a   :  { %v1203_v3 = vpop.f32.mrf.mxu1 }
 0x29b   :  { %v3085_v47 = vadd.f32 %v2992_v0, %v1203_v3  ;;  %v1319_v14 = vsel %vm1252_vm1, %v3082_v13, 0.0  ;;  %v1404_v25 = vmul.f32 %v3082_v13, %v3082_v13 }
 0x29c   :  { %1466 = vadd.xlane.f32.xlu1 %v1465_v16  ;;  %1320 = vadd.xlane.f32.xlu0 %v1319_v14  ;;  %v2143_v61 = vpop.f32.mrf.mxu1 }
 0x29d   :  { %v3091_v51 = vadd.f32 %v2143_v61, %v2992_v0  ;;  %v1313_v6 = vsel %vm1252_vm1, %v3085_v47, 0.0  ;;  %v1480_v48 = vsel %vm1252_vm1, %v1404_v25, 0.0  ;;  %v1402_v5 = vmul.f32 %v3085_v47, %v3085_v47 }
 0x29e   :  { %v1206_v20 = vpop.f32.mrf.mxu1 }
 0x29f   :  { %v3094_v59 = vadd.f32 %v2992_v0, %v1206_v20  ;;  %v1322_v37 = vsel %vm1252_vm1, %v3091_v51, 0.0  ;;  %v1405_v19 = vmul.f32 %v3091_v51, %v3091_v51  ;;  %v1474_v18 = vsel %vm1252_vm1, %v1402_v5, 0.0 }
 0x2a0   :  { %1323 = vadd.xlane.f32.xlu1 %v1322_v37  ;;  %1314 = vadd.xlane.f32.xlu0 %v1313_v6  ;;  %v3161_v37 = vadd.f32 %v2992_v0, %v3040_v22  ;;  %v3178_v5 = vadd.f32 %v2992_v0, %v3036_v55 }
 0x2a1   :  { %v1316_v11 = vsel %vm1252_vm1, %v3094_v59, 0.0  ;;  %v1483_v43 = vsel %vm1252_vm1, %v1405_v19, 0.0  ;;  %v1403_v46 = vmul.f32 %v3094_v59, %v3094_v59 }
 0x2a2   :  { %3632 = vst [vmem:[#allocation5_spill] sm:$0xff] %v3161_v37  ;;  %3634 = vst [vmem:[#allocation7_spill] sm:$0xff] %v3178_v5 }
 0x2a3   :  { %v1477_v10 = vsel %vm1252_vm1, %v1403_v46, 0.0  ;;  %v3193_v46 = vadd.f32 %v3046_v12, %v2992_v0 }
 0x2a4   :  { %1317 = vadd.xlane.f32.xlu1 %v1316_v11  ;;  %1481 = vadd.xlane.f32.xlu0 %v1480_v48  ;;  %v3169_v11 = vadd.f32 %v3038_v7, %v2992_v0  ;;  %v1280_v48 = vsel %vm1252_vm1, %v3161_v37, 0.0 }
 0x2a5   :  { %3636 = vst [vmem:[#allocation9_spill] sm:$0xff] %v3193_v46  ;;  %v1298_v12 = vsel %vm1252_vm1, %v3193_v46, 0.0 }
 0x2a6   :  { %3633 = vst [vmem:[#allocation6_spill] sm:$0xff] %v3169_v11  ;;  %v1286_v7 = vsel %vm1252_vm1, %v3169_v11, 0.0 }
 0x2a7   :  { %v2146_v26 = vpop.f32.mrf.mxu1 }
 0x2a8   :  { %1484 = vadd.xlane.f32.xlu1 %v1483_v43  ;;  %1475 = vadd.xlane.f32.xlu0 %v1474_v18  ;;  %v3114_v24 = vadd.f32 %v2146_v26, %v2992_v0  ;;  %v3182_v43 = vadd.f32 %v2992_v0, %v3048_v34  ;;  %v3189_v26 = vadd.f32 %v3034_v60, %v2992_v0  ;;  %v1277_v34 = vsel %vm1252_vm1, %v3178_v5, 0.0 }
 0x2a9   :  { %v1219_v44 = vpop.f32.mrf.mxu1 }
 0x2aa   :  { %v1331_v52 = vsel %vm1252_vm1, %v3114_v24, 0.0  ;;  %v3119_v28 = vadd.f32 %v2992_v0, %v1219_v44  ;;  %v1408_v57 = vmul.f32 %v3114_v24, %v3114_v24  ;;  %3635 = vst [vmem:[#allocation8_spill] sm:$0xff] %v3182_v43  ;;  %v1292_v55 = vsel %vm1252_vm1, %v3182_v43, 0.0 }
 0x2ab   :  { %v2147_v31 = vpop.f32.mrf.mxu1 }
 0x2ac   :  { %1478 = vadd.xlane.f32.xlu1 %v1477_v10  ;;  %1332 = vadd.xlane.f32.xlu0 %v1331_v52  ;;  %v3123_v38 = vadd.f32 %v2147_v31, %v2992_v0  ;;  %v1325_v49 = vsel %vm1252_vm1, %v3119_v28, 0.0  ;;  %v1492_v4 = vsel %vm1252_vm1, %v1408_v57, 0.0  ;;  %v1406_v2 = vmul.f32 %v3119_v28, %v3119_v28 }
 0x2ad   :  { %v1222_v1 = vpop.f32.mrf.mxu1  ;;  %v3201_v52 = vadd.f32 %v2992_v0, %v3044_v32  ;;  %v1283_v10 = vsel %vm1252_vm1, %v3189_v26, 0.0  ;;  %v3212_v31 = vadd.f32 %v3042_v39, %v2992_v0  ;;  %v1382_v39 = vmul.f32 %v2998_v9, %v2998_v9 }
 0x2ae   :  { %v1334_v42 = vsel %vm1252_vm1, %v3123_v38, 0.0  ;;  %v3128_v17 = vadd.f32 %v2992_v0, %v1222_v1  ;;  %v1409_v8 = vmul.f32 %v3123_v38, %v3123_v38  ;;  %v1486_v54 = vsel %vm1252_vm1, %v1406_v2, 0.0 }
 0x2af   :  { %3637 = vst [vmem:[#allocation10_spill] sm:$0xff] %v3201_v52  ;;  %3638 = vst [vmem:[#allocation11_spill] sm:$0xff] %v3212_v31  ;;  %v1289_v32 = vsel %vm1252_vm1, %v3201_v52, 0.0  ;;  %v1295_v57 = vsel %vm1252_vm1, %v3212_v31, 0.0  ;;  %v1384_v2 = vmul.f32 %v2995_v58, %v2995_v58 }
 0x2b0   :  { %1335 = vadd.xlane.f32.xlu1 %v1334_v42  ;;  %1326 = vadd.xlane.f32.xlu0 %v1325_v49  ;;  %v1328_v62 = vsel %vm1252_vm1, %v3128_v17, 0.0  ;;  %v1495_v27 = vsel %vm1252_vm1, %v1409_v8, 0.0  ;;  %v1407_v21 = vmul.f32 %v3128_v17, %v3128_v17  ;;  %v1383_v8 = vmul.f32 %v3006_v50, %v3006_v50 }
 0x2b2   :  { %v1489_v61 = vsel %vm1252_vm1, %v1407_v21, 0.0  ;;  %v1386_v21 = vmul.f32 %v3018_v56, %v3018_v56 }
 0x2b4   :  { %1329 = vadd.xlane.f32.xlu1 %v1328_v62  ;;  %1493 = vadd.xlane.f32.xlu0 %v1492_v4  ;;  %v1414_v4 = vsel %vm1252_vm1, %v1382_v39, 0.0 }
 0x2b6   :  { %v2150_v23 = vpop.f32.mrf.mxu1 }
 0x2b7   :  { %v3142_v40 = vadd.f32 %v2150_v23, %v2992_v0  ;;  %v1417_v23 = vsel %vm1252_vm1, %v1383_v8, 0.0 }
 0x2b8   :  { %1496 = vadd.xlane.f32.xlu1 %v1495_v27  ;;  %1487 = vadd.xlane.f32.xlu0 %v1486_v54  ;;  %v1235_v41 = vpop.f32.mrf.mxu1  ;;  %v1420_v27 = vsel %vm1252_vm1, %v1384_v2, 0.0  ;;  %v1385_v54 = vmul.f32 %v3003_v30, %v3003_v30 }
 0x2b9   :  { %v1343_v45 = vsel %vm1252_vm1, %v3142_v40, 0.0  ;;  %v3151_v16 = vadd.f32 %v2992_v0, %v1235_v41  ;;  %v1412_v25 = vmul.f32 %v3142_v40, %v3142_v40 }
 0x2ba   :  { %v2151_v3 = vpop.f32.mrf.mxu1  ;;  %v1423_v41 = vsel %vm1252_vm1, %v1385_v54, 0.0 }
 0x2bb   :  { %v3154_v14 = vadd.f32 %v2151_v3, %v2992_v0  ;;  %v1337_v6 = vsel %vm1252_vm1, %v3151_v16, 0.0  ;;  %v1504_v19 = vsel %vm1252_vm1, %v1412_v25, 0.0  ;;  %v1410_v22 = vmul.f32 %v3151_v16, %v3151_v16 }
 0x2bc   :  { %1490 = vadd.xlane.f32.xlu1 %v1489_v61  ;;  %1344 = vadd.xlane.f32.xlu0 %v1343_v45  ;;  %v1238_v44 = vpop.f32.mrf.mxu1  ;;  %v1426_v45 = vsel %vm1252_vm1, %v1386_v21, 0.0  ;;  %v1387_v3 = vmul.f32 %v3026_v53, %v3026_v53  ;;  %v1388_v61 = vmul.f32 %v3015_v29, %v3015_v29  ;;  %v1389_v25 = vmul.f32 %v3023_v63, %v3023_v63 }
 0x2bd   :  { %v1346_v20 = vsel %vm1252_vm1, %v3154_v14, 0.0  ;;  %v1498_v18 = vsel %vm1252_vm1, %v1410_v22, 0.0  ;;  %v3204_v60 = vadd.f32 %v2992_v0, %v1238_v44  ;;  %v1413_v42 = vmul.f32 %v3154_v14, %v3154_v14 }
 0x2be   :  { %v1393_v44 = vmul.f32 %v3169_v11, %v3169_v11 }
 0x2bf   :  { %v1340_v1 = vsel %vm1252_vm1, %v3204_v60, 0.0  ;;  %v1507_v49 = vsel %vm1252_vm1, %v1413_v42, 0.0  ;;  %v1411_v0 = vmul.f32 %v3204_v60, %v3204_v60  ;;  %v1396_v42 = vmul.f32 %v3212_v31, %v3212_v31 }
 0x2c0   :  { %1347 = vadd.xlane.f32.xlu1 %v1346_v20  ;;  %1338 = vadd.xlane.f32.xlu0 %v1337_v6  ;;  %v1429_v20 = vsel %vm1252_vm1, %v1387_v3, 0.0  ;;  %v1432_v6 = vsel %vm1252_vm1, %v1388_v61, 0.0 }
 0x2c1   :  { %v1501_v62 = vsel %vm1252_vm1, %v1411_v0, 0.0  ;;  %v1397_v0 = vmul.f32 %v3193_v46, %v3193_v46 }
 0x2c3   :  { %v1459_v39 = vsel %vm1252_vm1, %v1397_v0, 0.0 }
 0x2c4   :  { %1281 = vadd.xlane.f32.xlu1 %v1280_v48  ;;  %1505 = vadd.xlane.f32.xlu0 %v1504_v19  ;;  %v1390_v48 = vmul.f32 %v3178_v5, %v3178_v5  ;;  %v1435_v19 = vsel %vm1252_vm1, %v1389_v25, 0.0 }
 0x2c6   :  { %v1438_v22 = vsel %vm1252_vm1, %v1390_v48, 0.0 }
 0x2c8   :  { %1287 = vadd.xlane.f32.xlu1 %v1286_v7  ;;  %1499 = vadd.xlane.f32.xlu0 %v1498_v18  ;;  %v1391_v7 = vmul.f32 %v3161_v37, %v3161_v37  ;;  %v1392_v18 = vmul.f32 %v3189_v26, %v3189_v26 }
 0x2cc   :  { %1293 = vadd.xlane.f32.xlu1 %v1292_v55  ;;  %1278 = vadd.xlane.f32.xlu0 %v1277_v34  ;;  %v1441_v55 = vsel %vm1252_vm1, %v1391_v7, 0.0  ;;  %v1444_v34 = vsel %vm1252_vm1, %v1392_v18, 0.0 }
 0x2d0   :  { %1299 = vadd.xlane.f32.xlu1 %v1298_v12  ;;  %1284 = vadd.xlane.f32.xlu0 %v1283_v10  ;;  %v1394_v12 = vmul.f32 %v3201_v52, %v3201_v52  ;;  %v1447_v10 = vsel %vm1252_vm1, %v1393_v44, 0.0 }
 0x2d4   :  { %1341 = vadd.xlane.f32.xlu1 %v1340_v1  ;;  %1290 = vadd.xlane.f32.xlu0 %v1289_v32  ;;  %v1450_v1 = vsel %vm1252_vm1, %v1394_v12, 0.0  ;;  %v1395_v32 = vmul.f32 %v3182_v43, %v3182_v43 }
 0x2d8   :  { %1508 = vadd.xlane.f32.xlu1 %v1507_v49  ;;  %1296 = vadd.xlane.f32.xlu0 %v1295_v57  ;;  %v1453_v49 = vsel %vm1252_vm1, %v1395_v32, 0.0  ;;  %v1456_v57 = vsel %vm1252_vm1, %v1396_v42, 0.0 }
 0x2dc   :  { %1502 = vadd.xlane.f32.xlu1 %v1501_v62  ;;  %1415 = vadd.xlane.f32.xlu0 %v1414_v4  ;;  %v3274_v62 = vpop.xlane.xlu0 %1260  ;;  %v3276_v4 = vpop.xlane.xlu1 %1263 }
 0x2e0   :  { %1418 = vadd.xlane.f32.xlu1 %v1417_v23  ;;  %1421 = vadd.xlane.f32.xlu0 %v1420_v27  ;;  %v3278_v8 = vpop.xlane.xlu0 %1254  ;;  %v3280_v2 = vpop.xlane.xlu1 %1257 }
 0x2e4   :  { %1424 = vadd.xlane.f32.xlu1 %v1423_v41  ;;  %1427 = vadd.xlane.f32.xlu0 %v1426_v45 }
 0x2e5   :  { %v3282_v23 = vpop.xlane.xlu0 %1272 }
 0x2e8   :  { %1430 = vadd.xlane.f32.xlu1 %v1429_v20  ;;  %1433 = vadd.xlane.f32.xlu0 %v1432_v6 }
 0x2e9   :  { %v3284_v27 = vpop.xlane.xlu1 %1275  ;;  %v3286_v54 = vpop.xlane.xlu0 %1266 }
 0x2ec   :  { %1436 = vadd.xlane.f32.xlu1 %v1435_v19  ;;  %1439 = vadd.xlane.f32.xlu0 %v1438_v22 }
 0x2ed   :  { %v3288_v21 = vpop.xlane.xlu1 %1269 }
 0x2f0   :  { %1442 = vadd.xlane.f32.xlu1 %v1441_v55  ;;  %1445 = vadd.xlane.f32.xlu0 %v1444_v34 }
 0x2f4   :  { %1448 = vadd.xlane.f32.xlu1 %v1447_v10  ;;  %1451 = vadd.xlane.f32.xlu0 %v1450_v1 }
 0x2f8   :  { %1454 = vadd.xlane.f32.xlu1 %v1453_v49  ;;  %1457 = vadd.xlane.f32.xlu0 %v1456_v57 }
 0x2fc   :  { %1460 = vadd.xlane.f32.xlu1 %v1459_v39 }
 0x315   :  { %v1309_v41 = vpop.xlane.xlu0 %1308 }
 0x316   :  { %v1368_v61 = vmul.f32 0.015625, %v1309_v41 }
 0x318   :  { %v1560_v19 = vmul.f32 %v1368_v61, %v1368_v61 }
 0x319   :  { %v1312_v45 = vpop.xlane.xlu1 %1311  ;;  %v1303_v3 = vpop.xlane.xlu0 %1302 }
 0x31a   :  { %v3290_v20 = vmul.f32 0.015625, %v1312_v45  ;;  %v3292_v6 = vmul.f32 0.015625, %v1303_v3 }
 0x31c   :  { %v1561_v18 = vmul.f32 %v3290_v20, %v3290_v20  ;;  %v1558_v55 = vmul.f32 %v3292_v6, %v3292_v6 }
 0x31d   :  { %v1306_v25 = vpop.xlane.xlu1 %1305  ;;  %v1470_v48 = vpop.xlane.xlu0 %1469 }
 0x31e   :  { %v1528_v22 = vmul.f32 0.015625, %v1470_v48  ;;  %v3298_v12 = vmul.f32 0.015625, %v1306_v25 }
 0x320   :  { %v1592_v7 = vsub.f32 %v1528_v22, %v1560_v19  ;;  %v1559_v39 = vmul.f32 %v3298_v12, %v3298_v12 }
 0x321   :  { %v1473_v34 = vpop.xlane.xlu1 %1472  ;;  %v1464_v44 = vpop.xlane.xlu0 %1463 }
 0x322   :  { %v1624_v10 = vadd.f32 1e-05, %v1592_v7  ;;  %v1529_v1 = vmul.f32 0.015625, %v1473_v34  ;;  %v1526_v32 = vmul.f32 0.015625, %v1464_v44 }
 0x324   :  { %2240 = vrsqrt.f32 %v1624_v10  ;;  %v1593_v42 = vsub.f32 %v1529_v1, %v1561_v18  ;;  %v1590_v49 = vsub.f32 %v1526_v32, %v1558_v55  ;;  %v3313_v32 = vld [vmem:[%s3619_s7] ss:$0 sm:$0xff] }
 0x325   :  { %v1467_v57 = vpop.xlane.xlu1 %1466  ;;  %v1321_v0 = vpop.xlane.xlu0 %1320 }
 0x326   :  { %v1625_v41 = vadd.f32 1e-05, %v1593_v42  ;;  %v1622_v45 = vadd.f32 1e-05, %v1590_v49  ;;  %v1527_v3 = vmul.f32 0.015625, %v1467_v57  ;;  %v3302_v7 = vmul.f32 0.015625, %v1321_v0 }
 0x328   :  { %2242 = vrsqrt.f32 %v1625_v41  ;;  %v1591_v48 = vsub.f32 %v1527_v3, %v1559_v39  ;;  %v1564_v10 = vmul.f32 %v3302_v7, %v3302_v7 }
 0x329   :  { %2244 = vrsqrt.f32 %v1622_v45  ;;  %v1324_v19 = vpop.xlane.xlu1 %1323  ;;  %v1315_v25 = vpop.xlane.xlu0 %1314 }
 0x32a   :  { %v1623_v22 = vadd.f32 1e-05, %v1591_v48  ;;  %v3304_v34 = vmul.f32 0.015625, %v1324_v19  ;;  %v3306_v18 = vmul.f32 0.015625, %v1315_v25 }
 0x32c   :  { %2246 = vrsqrt.f32 %v1623_v22  ;;  %v1565_v57 = vmul.f32 %v3304_v34, %v3304_v34  ;;  %v1562_v0 = vmul.f32 %v3306_v18, %v3306_v18 }
 0x32d   :  { %v1318_v55 = vpop.xlane.xlu1 %1317  ;;  %v1482_v44 = vpop.xlane.xlu0 %1481 }
 0x32e   :  { %v1532_v1 = vmul.f32 0.015625, %v1482_v44  ;;  %v3319_v39 = vmul.f32 0.015625, %v1318_v55 }
 0x330   :  { %v1596_v42 = vsub.f32 %v1532_v1, %v1564_v10  ;;  %v3325_v10 = vld [vmem:[%s3620_s8] ss:$0 sm:$0xff]  ;;  %s2326_s8 = smov 64  }
 0x331   :  { %v2241_v49 = vpop.eup %2240  ;;  %v1485_v41 = vpop.xlane.xlu1 %1484 }
 0x332   :  { %v1476_v45 = vpop.xlane.xlu0 %1475  ;;  %v1628_v3 = vadd.f32 1e-05, %v1596_v42  ;;  %v1533_v48 = vmul.f32 0.015625, %v1485_v41  ;;  %v1694_v25 = vmul.f32 %v2241_v49, %v3313_v32  ;;  %v1563_v42 = vmul.f32 %v3319_v39, %v3319_v39 }
 0x333   :  { %v1530_v19 = vmul.f32 0.015625, %v1476_v45 }
 0x334   :  { %2248 = vrsqrt.f32 %v1628_v3  ;;  %v1597_v22 = vsub.f32 %v1533_v48, %v1565_v57  ;;  %v1726_v1 = vmul.f32 %v1694_v25, %v1368_v61  ;;  %v1796_v57 = vmul.f32 %v1694_v25, %v3051_v33 }
 0x335   :  { %v1594_v44 = vsub.f32 %v1530_v19, %v1562_v0  ;;  %v2243_v46 = vpop.eup %2242  ;;  %v1479_v43 = vpop.xlane.xlu1 %1478 }
 0x336   :  { %v1333_v55 = vpop.xlane.xlu0 %1332  ;;  %v2245_v31 = vpop.eup %2244  ;;  %v1629_v41 = vadd.f32 1e-05, %v1597_v22  ;;  %v1531_v52 = vmul.f32 0.015625, %v1479_v43  ;;  %v1764_v49 = vsub.f32 %v3325_v10, %v1726_v1  ;;  %v1695_v0 = vmul.f32 %v2243_v46, %v3313_v32 }
 0x337   :  { %v1626_v45 = vadd.f32 1e-05, %v1594_v44  ;;  %v1692_v3 = vmul.f32 %v2245_v31, %v3313_v32  ;;  %v3334_v44 = vmul.f32 0.015625, %v1333_v55 }
 0x338   :  { %2250 = vrsqrt.f32 %v1629_v41  ;;  %v1595_v61 = vsub.f32 %v1531_v52, %v1563_v42  ;;  %v1828_v5 = vadd.f32 %v1796_v57, %v1764_v49  ;;  %v1727_v11 = vmul.f32 %v1695_v0, %v3290_v20 }
 0x339   :  { %v2247_v48 = vpop.eup %2246  ;;  %2252 = vrsqrt.f32 %v1626_v45  ;;  %v1336_v19 = vpop.xlane.xlu1 %1335  ;;  %v1724_v43 = vmul.f32 %v1692_v3, %v3292_v6  ;;  %v1797_v46 = vmul.f32 %v1695_v0, %v3059_v35  ;;  %v1794_v25 = vmul.f32 %v1692_v3, %v3054_v36 }
 0x33a   :  { %v1327_v37 = vpop.xlane.xlu0 %1326  ;;  %v1627_v22 = vadd.f32 1e-05, %v1595_v61  ;;  %v1860_v1 = vmax.f32 %v1828_v5, 0.0  ;;  %v1765_v33 = vsub.f32 %v3325_v10, %v1727_v11  ;;  %v1693_v31 = vmul.f32 %v2247_v48, %v3313_v32 }
 0x33b   :  { %v1762_v52 = vsub.f32 %v3325_v10, %v1724_v43  ;;  %v3342_v42 = vmul.f32 0.015625, %v1336_v19  ;;  %v3344_v20 = vmul.f32 0.015625, %v1327_v37  ;;  %v1568_v35 = vmul.f32 %v3334_v44, %v3334_v44 }
 0x33c   :  { %2254 = vrsqrt.f32 %v1627_v22  ;;  %1894 = vrot.lane.b32.xlu1 %v1860_v1, %s2326_s8  ;;  %v1829_v55 = vadd.f32 %v1797_v46, %v1765_v33  ;;  %v1725_v11 = vmul.f32 %v1693_v31, %v3298_v12  ;;  %v1795_v57 = vmul.f32 %v1693_v31, %v3062_v15 }
 0x33d   :  { %v1330_v6 = vpop.xlane.xlu1 %1329  ;;  %v1826_v45 = vadd.f32 %v1794_v25, %v1762_v52  ;;  %v1569_v61 = vmul.f32 %v3342_v42, %v3342_v42  ;;  %v1566_v48 = vmul.f32 %v3344_v20, %v3344_v20 }
 0x33e   :  { %v1494_v5 = vpop.xlane.xlu0 %1493  ;;  %v1861_v49 = vmax.f32 %v1829_v55, 0.0  ;;  %v1763_v36 = vsub.f32 %v3325_v10, %v1725_v11  ;;  %v3356_v12 = vmul.f32 0.015625, %v1330_v6 }
 0x33f   :  { %v1536_v41 = vmul.f32 0.015625, %v1494_v5  ;;  %v1858_v0 = vmax.f32 %v1826_v45, 0.0 }
 0x340   :  { %1896 = vrot.lane.b32.xlu1 %v1861_v49, %s2326_s8  ;;  %v1827_v43 = vadd.f32 %v1795_v57, %v1763_v36 }
 0x341   :  { %v1600_v37 = vsub.f32 %v1536_v41, %v1568_v35  ;;  %v2249_v3 = vpop.eup %2248  ;;  %v1497_v19 = vpop.xlane.xlu1 %1496  ;;  %1890 = vrot.lane.b32.xlu0 %v1858_v0, %s2326_s8  ;;  %v1567_v41 = vmul.f32 %v3356_v12, %v3356_v12 }
 0x342   :  { %v1488_v22 = vpop.xlane.xlu0 %1487  ;;  %v1537_v15 = vmul.f32 0.015625, %v1497_v19  ;;  %v1698_v46 = vmul.f32 %v2249_v3, %v3313_v32  ;;  %v1859_v31 = vmax.f32 %v1827_v43, 0.0 }
 0x343   :  { %v1632_v1 = vadd.f32 1e-05, %v1600_v37  ;;  %v1534_v33 = vmul.f32 0.015625, %v1488_v22 }
 0x344   :  { %v1601_v52 = vsub.f32 %v1537_v15, %v1569_v61  ;;  %v1730_v5 = vmul.f32 %v1698_v46, %v3302_v7  ;;  %1892 = vrot.lane.b32.xlu1 %v1859_v31, %s2326_s8  ;;  %v1800_v37 = vmul.f32 %v1698_v46, %v3082_v13 }
 0x345   :  { %2256 = vrsqrt.f32 %v1632_v1  ;;  %v1598_v25 = vsub.f32 %v1534_v33, %v1566_v48  ;;  %v2251_v6 = vpop.eup %2250  ;;  %v1491_v55 = vpop.xlane.xlu1 %1490 }
 0x346   :  { %v1345_v11 = vpop.xlane.xlu0 %1344  ;;  %v2253_v35 = vpop.eup %2252  ;;  %v1633_v45 = vadd.f32 1e-05, %v1601_v52  ;;  %v1535_v36 = vmul.f32 0.015625, %v1491_v55  ;;  %v1768_v57 = vsub.f32 %v3325_v10, %v1730_v5  ;;  %v1699_v0 = vmul.f32 %v2251_v6, %v3313_v32 }
 0x347   :  { %v1630_v49 = vadd.f32 1e-05, %v1598_v25  ;;  %v1696_v7 = vmul.f32 %v2253_v35, %v3313_v32  ;;  %v3372_v15 = vmul.f32 0.015625, %v1345_v11 }
 0x348   :  { %2258 = vrsqrt.f32 %v1633_v45  ;;  %v1599_v3 = vsub.f32 %v1535_v36, %v1567_v41  ;;  %v1832_v22 = vadd.f32 %v1800_v37, %v1768_v57  ;;  %v1731_v43 = vmul.f32 %v1699_v0, %v3304_v34 }
 0x349   :  { %v2255_v61 = vpop.eup %2254  ;;  %2260 = vrsqrt.f32 %v1630_v49  ;;  %v3369_v48 = vpop.xlane.xlu1 %1347  ;;  %v1728_v33 = vmul.f32 %v1696_v7, %v3306_v18  ;;  %v1801_v31 = vmul.f32 %v1699_v0, %v3091_v51  ;;  %v1798_v5 = vmul.f32 %v1696_v7, %v3085_v47 }
 0x34a   :  { %v1339_v19 = vpop.xlane.xlu0 %1338  ;;  %v1631_v1 = vadd.f32 1e-05, %v1599_v3  ;;  %v1864_v13 = vmax.f32 %v1832_v22, 0.0  ;;  %v1769_v46 = vsub.f32 %v3325_v10, %v1731_v43  ;;  %v1697_v52 = vmul.f32 %v2255_v61, %v3313_v32 }
 0x34b   :  { %v1766_v25 = vsub.f32 %v3325_v10, %v1728_v33  ;;  %v1572_v11 = vmul.f32 %v3372_v15, %v3372_v15  ;;  %v3386_v35 = vmul.f32 0.015625, %v1339_v19 }
 0x34c   :  { %2262 = vrsqrt.f32 %v1631_v1  ;;  %1902 = vrot.lane.b32.xlu0 %v1864_v13, %s2326_s8  ;;  %v1833_v55 = vadd.f32 %v1801_v31, %v1769_v46  ;;  %v1729_v18 = vmul.f32 %v1697_v52, %v3319_v39  ;;  %v1799_v47 = vmul.f32 %v1697_v52, %v3094_v59 }
 0x34d   :  { %v3381_v34 = vpop.xlane.xlu1 %1281  ;;  %v1830_v41 = vadd.f32 %v1798_v5, %v1766_v25  ;;  %v1570_v3 = vmul.f32 %v3386_v35, %v3386_v35 }
 0x34e   :  { %v1506_v6 = vpop.xlane.xlu0 %1505  ;;  %v1865_v45 = vmax.f32 %v1833_v55, 0.0  ;;  %v1767_v49 = vsub.f32 %v3325_v10, %v1729_v18 }
 0x34f   :  { %v1540_v51 = vmul.f32 0.015625, %v1506_v6  ;;  %v1862_v57 = vmax.f32 %v1830_v41, 0.0 }
 0x350   :  { %1904 = vrot.lane.b32.xlu1 %v1865_v45, %s2326_s8  ;;  %v1831_v7 = vadd.f32 %v1799_v47, %v1767_v49 }
 0x351   :  { %v1604_v36 = vsub.f32 %v1540_v51, %v1572_v11  ;;  %v3391_v0 = vpop.xlane.xlu1 %1287  ;;  %1898 = vrot.lane.b32.xlu0 %v1862_v57, %s2326_s8 }
 0x352   :  { %v2257_v37 = vpop.eup %2256  ;;  %v1500_v39 = vpop.xlane.xlu0 %1499  ;;  %v1863_v43 = vmax.f32 %v1831_v7, 0.0 }
 0x353   :  { %v1636_v61 = vadd.f32 1e-05, %v1604_v36  ;;  %v1538_v19 = vmul.f32 0.015625, %v1500_v39  ;;  %v1702_v22 = vmul.f32 %v2257_v37, %v3313_v32 }
 0x354   :  { %1900 = vrot.lane.b32.xlu1 %v1863_v43, %s2326_s8 }
 0x355   :  { %2264 = vrsqrt.f32 %v1636_v61  ;;  %v1602_v59 = vsub.f32 %v1538_v19, %v1570_v3  ;;  %v1734_v1 = vmul.f32 %v1702_v22, %v3334_v44  ;;  %v2259_v33 = vpop.eup %2258  ;;  %v3399_v13 = vpop.xlane.xlu1 %1293  ;;  %v1804_v25 = vmul.f32 %v1702_v22, %v3114_v24 }
 0x356   :  { %v2261_v46 = vpop.eup %2260  ;;  %v1703_v5 = vmul.f32 %v2259_v33, %v3313_v32  ;;  %v3419_v43 = vpop.xlane.xlu0 %1278 }
 0x357   :  { %v1634_v31 = vadd.f32 1e-05, %v1602_v59  ;;  %v1772_v52 = vsub.f32 %v3325_v10, %v1734_v1  ;;  %v1700_v6 = vmul.f32 %v2261_v46, %v3313_v32 }
 0x358   :  { %v1735_v44 = vmul.f32 %v1703_v5, %v3342_v42  ;;  %v1805_v24 = vmul.f32 %v1703_v5, %v3123_v38 }
 0x359   :  { %2266 = vrsqrt.f32 %v1634_v31  ;;  %v1836_v55 = vadd.f32 %v1804_v25, %v1772_v52  ;;  %v2263_v18 = vpop.eup %2262  ;;  %v3405_v11 = vpop.xlane.xlu1 %1299  ;;  %v1732_v51 = vmul.f32 %v1700_v6, %v3344_v20  ;;  %v1802_v36 = vmul.f32 %v1700_v6, %v3119_v28 }
 0x35a   :  { %v1701_v45 = vmul.f32 %v2263_v18, %v3313_v32  ;;  %v1773_v49 = vsub.f32 %v3325_v10, %v1735_v44  ;;  %v1381_v20 = vmul.f32 0.015625, %v3369_v48 }
 0x35b   :  { %v1868_v41 = vmax.f32 %v1836_v55, 0.0  ;;  %v1770_v47 = vsub.f32 %v3325_v10, %v1732_v51  ;;  %v3426_v55 = vpop.xlane.xlu0 %1284 }
 0x35c   :  { %v1733_v57 = vmul.f32 %v1701_v45, %v3356_v12  ;;  %v1837_v39 = vadd.f32 %v1805_v24, %v1773_v49  ;;  %v1803_v3 = vmul.f32 %v1701_v45, %v3128_v17  ;;  %v1573_v12 = vmul.f32 %v1381_v20, %v1381_v20 }
 0x35d   :  { %1910 = vrot.lane.b32.xlu0 %v1868_v41, %s2326_s8  ;;  %v1342_v37 = vpop.xlane.xlu1 %1341  ;;  %v1834_v42 = vadd.f32 %v1802_v36, %v1770_v47 }
 0x35e   :  { %v1771_v7 = vsub.f32 %v3325_v10, %v1733_v57  ;;  %v1869_v61 = vmax.f32 %v1837_v39, 0.0  ;;  %v1379_v59 = vmul.f32 0.015625, %v1342_v37 }
 0x35f   :  { %v1866_v19 = vmax.f32 %v1834_v42, 0.0  ;;  %v3433_v47 = vpop.xlane.xlu0 %1290 }
 0x360   :  { %v1835_v38 = vadd.f32 %v1803_v3, %v1771_v7  ;;  %1912 = vrot.lane.b32.xlu1 %v1869_v61, %s2326_s8  ;;  %v1571_v52 = vmul.f32 %v1379_v59, %v1379_v59 }
 0x361   :  { %1906 = vrot.lane.b32.xlu0 %v1866_v19, %s2326_s8  ;;  %v1509_v28 = vpop.xlane.xlu1 %1508 }
 0x362   :  { %v2265_v22 = vpop.eup %2264  ;;  %v1541_v1 = vmul.f32 0.015625, %v1509_v28  ;;  %v1867_v33 = vmax.f32 %v1835_v38, 0.0 }
 0x363   :  { %v1706_v48 = vmul.f32 %v2265_v22, %v3313_v32 }
 0x364   :  { %v1605_v46 = vsub.f32 %v1541_v1, %v1573_v12  ;;  %1908 = vrot.lane.b32.xlu1 %v1867_v33, %s2326_s8  ;;  %v3446_v33 = vmul.f32 0.015625, %v3274_v62 }
 0x365   :  { %v1503_v17 = vpop.xlane.xlu1 %1502  ;;  %v1738_v18 = vmul.f32 %v1706_v48, %v3372_v15  ;;  %v1808_v57 = vmul.f32 %v1706_v48, %v3142_v40  ;;  %v3437_v15 = vpop.xlane.xlu0 %1296 }
 0x366   :  { %v2267_v31 = vpop.eup %2266  ;;  %v1637_v25 = vadd.f32 1e-05, %v1605_v46  ;;  %v1539_v5 = vmul.f32 0.015625, %v1503_v17 }
 0x367   :  { %v1704_v6 = vmul.f32 %v2267_v31, %v3313_v32  ;;  %v1776_v24 = vsub.f32 %v3325_v10, %v1738_v18 }
 0x368   :  { %2268 = vrsqrt.f32 %v1637_v25  ;;  %v1603_v44 = vsub.f32 %v1539_v5, %v1571_v52 }
 0x369   :  { %v1736_v51 = vmul.f32 %v1704_v6, %v3386_v35  ;;  %v1806_v49 = vmul.f32 %v1704_v6, %v3151_v16  ;;  %v1840_v39 = vadd.f32 %v1808_v57, %v1776_v24  ;;  %v1416_v3 = vpop.xlane.xlu0 %1415  ;;  %v1419_v38 = vpop.xlane.xlu1 %1418 }
 0x36a   :  { %v1635_v41 = vadd.f32 1e-05, %v1603_v44  ;;  %v1510_v6 = vmul.f32 0.015625, %v1416_v3  ;;  %v3461_v44 = vmul.f32 0.015625, %v3280_v2 }
 0x36b   :  { %v1774_v45 = vsub.f32 %v3325_v10, %v1736_v51  ;;  %v1872_v35 = vmax.f32 %v1840_v39, 0.0 }
 0x36c   :  { %2270 = vrsqrt.f32 %v1635_v41  ;;  %v1543_v24 = vmul.f32 %v3461_v44, %v3461_v44 }
 0x36d   :  { %v1838_v36 = vadd.f32 %v1806_v49, %v1774_v45  ;;  %v1422_v40 = vpop.xlane.xlu0 %1421  ;;  %v1425_v17 = vpop.xlane.xlu1 %1424 }
 0x36e   :  { %v1512_v31 = vmul.f32 0.015625, %v1422_v40  ;;  %v1513_v5 = vmul.f32 0.015625, %v1425_v17 }
 0x36f   :  { %v1870_v37 = vmax.f32 %v1838_v36, 0.0 }
 0x371   :  { %1914 = vrot.lane.b32.xlu0 %v1870_v37, %s2326_s8  ;;  %v1431_v36 = vpop.xlane.xlu1 %1430 }
 0x375   :  { %v2269_v42 = vpop.eup %2268  ;;  %1918 = vrot.lane.b32.xlu0 %v1872_v35, %s2326_s8  ;;  %v3469_v35 = vmul.f32 0.015625, %v3282_v23 }
 0x376   :  { %v1707_v16 = vmul.f32 %v2269_v42, %v3313_v32 }
 0x377   :  { %v1548_v3 = vmul.f32 %v3469_v35, %v3469_v35 }
 0x378   :  { %v1739_v19 = vmul.f32 %v1707_v16, %v1381_v20  ;;  %v1809_v46 = vmul.f32 %v1707_v16, %v3154_v14  ;;  %v1544_v20 = vmul.f32 %v3446_v33, %v3446_v33 }
 0x379   :  { %v2271_v7 = vpop.eup %2270 }
 0x37a   :  { %v1705_v61 = vmul.f32 %v2271_v7, %v3313_v32  ;;  %v1777_v1 = vsub.f32 %v3325_v10, %v1739_v19  ;;  %v1576_v62 = vsub.f32 %v1512_v31, %v1544_v20  ;;  %v1437_v7 = vpop.xlane.xlu1 %1436  ;;  %v3477_v19 = vmul.f32 0.015625, %v3286_v54 }
 0x37c   :  { %v1737_v22 = vmul.f32 %v1705_v61, %v1379_v59  ;;  %v1807_v12 = vmul.f32 %v1705_v61, %v3204_v60  ;;  %v1841_v25 = vadd.f32 %v1809_v46, %v1777_v1  ;;  %v3452_v59 = vmul.f32 0.015625, %v3276_v4  ;;  %v1428_v4 = vpop.xlane.xlu0 %1427 }
 0x37d   :  { %v3455_v60 = vmul.f32 0.015625, %v3278_v8  ;;  %v1511_v8 = vmul.f32 0.015625, %v1419_v38  ;;  %v1608_v41 = vadd.f32 1e-05, %v1576_v62  ;;  %v3474_v61 = vmul.f32 0.015625, %v3284_v27 }
 0x37e   :  { %v1775_v28 = vsub.f32 %v3325_v10, %v1737_v22  ;;  %v1873_v18 = vmax.f32 %v1841_v25, 0.0  ;;  %v1545_v14 = vmul.f32 %v3452_v59, %v3452_v59  ;;  %v1517_v22 = vmul.f32 0.015625, %v1437_v7 }
 0x37f   :  { %v1542_v51 = vmul.f32 %v3455_v60, %v3455_v60  ;;  %v1575_v57 = vsub.f32 %v1511_v8, %v1543_v24  ;;  %2272 = vrsqrt.f32 %v1608_v41  ;;  %v1514_v40 = vmul.f32 0.015625, %v1428_v4 }
 0x380   :  { %v1839_v48 = vadd.f32 %v1807_v12, %v1775_v28  ;;  %v1577_v45 = vsub.f32 %v1513_v5, %v1545_v14  ;;  %v1434_v2 = vpop.xlane.xlu0 %1433  ;;  %v1549_v23 = vmul.f32 %v3474_v61, %v3474_v61  ;;  %v3482_v28 = vmul.f32 0.015625, %v3288_v21 }
 0x381   :  { %v1574_v49 = vsub.f32 %v1510_v6, %v1542_v51  ;;  %v1607_v42 = vadd.f32 1e-05, %v1575_v57  ;;  %v1516_v16 = vmul.f32 0.015625, %v1434_v2  ;;  %v1546_v1 = vmul.f32 %v3477_v19, %v3477_v19 }
 0x382   :  { %v1871_v52 = vmax.f32 %v1839_v48, 0.0  ;;  %v1609_v37 = vadd.f32 1e-05, %v1577_v45  ;;  %v1443_v48 = vpop.xlane.xlu1 %1442  ;;  %v1515_v27 = vmul.f32 0.015625, %v1431_v36  ;;  %v1581_v31 = vsub.f32 %v1517_v22, %v1549_v23 }
 0x383   :  { %v1606_v39 = vadd.f32 1e-05, %v1574_v49  ;;  %v1580_v38 = vsub.f32 %v1516_v16, %v1548_v3  ;;  %v1578_v17 = vsub.f32 %v1514_v40, %v1546_v1  ;;  %v3490_v6 = vmul.f32 0.015625, %v3426_v55 }
 0x384   :  { %1916 = vrot.lane.b32.xlu1 %v1871_v52, %s2326_s8  ;;  %2274 = vrsqrt.f32 %v1609_v37  ;;  %v1440_v12 = vpop.xlane.xlu0 %1439  ;;  %v1547_v52 = vmul.f32 %v3482_v28, %v3482_v28  ;;  %v1613_v20 = vadd.f32 1e-05, %v1581_v31  ;;  %v3493_v4 = vmul.f32 0.015625, %v3419_v43 }
 0x385   :  { %2276 = vrsqrt.f32 %v1606_v39  ;;  %v1612_v46 = vadd.f32 1e-05, %v1580_v38  ;;  %v3498_v36 = vmul.f32 0.015625, %v3391_v0  ;;  %v1552_v55 = vmul.f32 %v3490_v6, %v3490_v6 }
 0x386   :  { %2278 = vrsqrt.f32 %v1607_v42  ;;  %v1579_v25 = vsub.f32 %v1515_v27, %v1547_v52  ;;  %v1449_v14 = vpop.xlane.xlu1 %1448  ;;  %v1518_v37 = vmul.f32 0.015625, %v1440_v12  ;;  %v1550_v43 = vmul.f32 %v3493_v4, %v3493_v4 }
 0x387   :  { %2280 = vrsqrt.f32 %v1612_v46  ;;  %v1521_v2 = vmul.f32 0.015625, %v1449_v14  ;;  %v3511_v7 = vmul.f32 0.015625, %v3381_v34  ;;  %v1553_v3 = vmul.f32 %v3498_v36, %v3498_v36 }
 0x388   :  { %1920 = vrot.lane.b32.xlu1 %v1873_v18, %s2326_s8  ;;  %v1446_v62 = vpop.xlane.xlu0 %1445  ;;  %v1610_v18 = vadd.f32 1e-05, %v1578_v17  ;;  %v1611_v41 = vadd.f32 1e-05, %v1579_v25  ;;  %2282 = vrsqrt.f32 %v1613_v20  ;;  %v1582_v22 = vsub.f32 %v1518_v37, %v1550_v43 }
 0x389   :  { %v1520_v8 = vmul.f32 0.015625, %v1446_v62  ;;  %v1519_v23 = vmul.f32 0.015625, %v1443_v48  ;;  %v1585_v1 = vsub.f32 %v1521_v2, %v1553_v3  ;;  %v1551_v34 = vmul.f32 %v3511_v7, %v3511_v7 }
 0x38a   :  { %2284 = vrsqrt.f32 %v1610_v18  ;;  %v3505_v42 = vpop.xlane.xlu1 %1454  ;;  %v1614_v52 = vadd.f32 1e-05, %v1582_v22  ;;  %v3533_v43 = vmul.f32 0.015625, %v3433_v47 }
 0x38b   :  { %v1584_v39 = vsub.f32 %v1520_v8, %v1552_v55  ;;  %2286 = vrsqrt.f32 %v1611_v41  ;;  %v1583_v48 = vsub.f32 %v1519_v23, %v1551_v34  ;;  %v1617_v25 = vadd.f32 1e-05, %v1585_v1 }
 0x38c   :  { %v2273_v54 = vpop.eup %2272  ;;  %v1452_v27 = vpop.xlane.xlu0 %1451  ;;  %v3544_v23 = vmul.f32 0.015625, %v3437_v15 }
 0x38d   :  { %v1678_v21 = vmul.f32 %v2273_v54, %v3313_v32  ;;  %v1616_v12 = vadd.f32 1e-05, %v1584_v39 }
 0x38e   :  { %v3521_v17 = vpop.xlane.xlu1 %1460  ;;  %v1556_v15 = vmul.f32 %v3544_v23, %v3544_v23 }
 0x38f   :  { %v1710_v45 = vmul.f32 %v1678_v21, %v3446_v33  ;;  %v1780_v40 = vmul.f32 %v1678_v21, %v2995_v58  ;;  %2288 = vrsqrt.f32 %v1616_v12 }
 0x390   :  { %2290 = vrsqrt.f32 %v1614_v52  ;;  %v1458_v41 = vpop.xlane.xlu0 %1457 }
 0x391   :  { %v2275_v5 = vpop.eup %2274  ;;  %v1748_v33 = vsub.f32 %v3325_v10, %v1710_v45  ;;  %2292 = vrsqrt.f32 %v1617_v25 }
 0x392   :  { %v2277_v51 = vpop.eup %2276  ;;  %v1679_v49 = vmul.f32 %v2275_v5, %v3313_v32 }
 0x393   :  { %v2279_v24 = vpop.eup %2278  ;;  %v1676_v57 = vmul.f32 %v2277_v51, %v3313_v32  ;;  %v1812_v46 = vadd.f32 %v1780_v40, %v1748_v33  ;;  %v1554_v40 = vmul.f32 %v3533_v43, %v3533_v43 }
 0x394   :  { %v1711_v0 = vmul.f32 %v1679_v49, %v3452_v59  ;;  %v1677_v16 = vmul.f32 %v2279_v24, %v3313_v32  ;;  %v2281_v54 = vpop.eup %2280  ;;  %v1781_v58 = vmul.f32 %v1679_v49, %v3003_v30  ;;  %v1615_v49 = vadd.f32 1e-05, %v1583_v48 }
 0x395   :  { %v1708_v38 = vmul.f32 %v1676_v57, %v3455_v60  ;;  %v1778_v20 = vmul.f32 %v1676_v57, %v2998_v9  ;;  %v1844_v62 = vmax.f32 %v1812_v46, 0.0  ;;  %v1682_v5 = vmul.f32 %v2281_v54, %v3313_v32  ;;  %v2283_v18 = vpop.eup %2282 }
 0x396   :  { %v1749_v59 = vsub.f32 %v3325_v10, %v1711_v0  ;;  %v1709_v31 = vmul.f32 %v1677_v16, %v3461_v44  ;;  %v1779_v30 = vmul.f32 %v1677_v16, %v3006_v50  ;;  %v1683_v57 = vmul.f32 %v2283_v18, %v3313_v32 }
 0x397   :  { %v1746_v60 = vsub.f32 %v3325_v10, %v1708_v38  ;;  %v2285_v8 = vpop.eup %2284  ;;  %v1714_v55 = vmul.f32 %v1682_v5, %v3469_v35  ;;  %2294 = vrsqrt.f32 %v1615_v49  ;;  %v1522_v16 = vmul.f32 0.015625, %v1452_v27 }
 0x398   :  { %v1813_v21 = vadd.f32 %v1781_v58, %v1749_v59  ;;  %v1747_v44 = vsub.f32 %v3325_v10, %v1709_v31  ;;  %v2287_v37 = vpop.eup %2286  ;;  %v1680_v33 = vmul.f32 %v2285_v8, %v3313_v32  ;;  %v1715_v22 = vmul.f32 %v1683_v57, %v3474_v61 }
 0x399   :  { %v1810_v51 = vadd.f32 %v1778_v20, %v1746_v60  ;;  %v1752_v38 = vsub.f32 %v3325_v10, %v1714_v55  ;;  %v1681_v47 = vmul.f32 %v2287_v37, %v3313_v32  ;;  %v1784_v46 = vmul.f32 %v1682_v5, %v3015_v29 }
 0x39a   :  { %v1845_v9 = vmax.f32 %v1813_v21, 0.0  ;;  %v1811_v24 = vadd.f32 %v1779_v30, %v1747_v44  ;;  %v1712_v1 = vmul.f32 %v1680_v33, %v3477_v19  ;;  %v1586_v59 = vsub.f32 %v1522_v16, %v1554_v40  ;;  %v3639_v40 = vld [vmem:[#allocation6_spill] sm:$0xff] }
 0x39b   :  { %v1842_v2 = vmax.f32 %v1810_v51, 0.0  ;;  %v1524_v31 = vmul.f32 0.015625, %v1458_v41  ;;  %v1816_v61 = vadd.f32 %v1784_v46, %v1752_v38  ;;  %v1753_v34 = vsub.f32 %v3325_v10, %v1715_v22 }
 0x39c   :  { %v1843_v35 = vmax.f32 %v1811_v24, 0.0  ;;  %v2289_v54 = vpop.eup %2288  ;;  %v1713_v60 = vmul.f32 %v1681_v47, %v3482_v28  ;;  %v1750_v52 = vsub.f32 %v3325_v10, %v1712_v1  ;;  %v1785_v19 = vmul.f32 %v1683_v57, %v3023_v63 }
 0x39d   :  { %v2291_v58 = vpop.eup %2290  ;;  %v1618_v48 = vadd.f32 1e-05, %v1586_v59  ;;  %v1588_v25 = vsub.f32 %v1524_v31, %v1556_v15  ;;  %v1782_v29 = vmul.f32 %v1680_v33, %v3018_v56  ;;  %v1686_v20 = vmul.f32 %v2289_v54, %v3313_v32  ;;  %v3641_v15 = vld [vmem:[#allocation5_spill] sm:$0xff] }
 0x39e   :  { %v1848_v21 = vmax.f32 %v1816_v61, 0.0  ;;  %v1817_v44 = vadd.f32 %v1785_v19, %v1753_v34  ;;  %v1751_v5 = vsub.f32 %v3325_v10, %v1713_v60  ;;  %v1783_v51 = vmul.f32 %v1681_v47, %v3026_v53 }
 0x39f   :  { %v1814_v18 = vadd.f32 %v1782_v29, %v1750_v52  ;;  %2296 = vrsqrt.f32 %v1618_v48  ;;  %v1620_v63 = vadd.f32 1e-05, %v1588_v25  ;;  %v1718_v8 = vmul.f32 %v1686_v20, %v3490_v6 }
 0x3a0   :  { %v1849_v56 = vmax.f32 %v1817_v44, 0.0  ;;  %v1684_v49 = vmul.f32 %v2291_v58, %v3313_v32  ;;  %v1788_v16 = vmul.f32 %v1686_v20, %v3189_v26  ;;  %v3640_v26 = vld [vmem:[#allocation7_spill] sm:$0xff] }
 0x3a1   :  { %v1846_v24 = vmax.f32 %v1814_v18, 0.0  ;;  %2298 = vrsqrt.f32 %v1620_v63  ;;  %v1756_v37 = vsub.f32 %v3325_v10, %v1718_v8 }
 0x3a2   :  { %v1786_v1 = vmul.f32 %v1684_v49, %v3640_v26 }
 0x3a3   :  { %v1820_v38 = vadd.f32 %v1788_v16, %v1756_v37 }
 0x3a5   :  { %v1852_v46 = vmax.f32 %v1820_v38, 0.0  ;;  %v3644_v38 = vld [vmem:[#allocation8_spill] sm:$0xff] }
 0x3ae   :  { %v1895_v14 = vpop.permute.xlu1 %1894 }
 0x3af   :  { %v1940_v45 = vsel %vm1252_vm1, %v1844_v62, %v1895_v14  ;;  %v2293_v62 = vpop.eup %2292 }
 0x3b0   :  { %1956 = vst [vmem:[#allocation2 + $0x10] sm:$0xff] %v1940_v45  ;;  %v2295_v41 = vpop.eup %2294  ;;  %v1815_v45 = vadd.f32 %v1783_v51, %v1751_v5  ;;  %v1687_v30 = vmul.f32 %v2293_v62, %v3313_v32 }
 0x3b1   :  { %v1685_v33 = vmul.f32 %v2295_v41, %v3313_v32  ;;  %v2297_v59 = vpop.eup %2296 }
 0x3b2   :  { %v1897_v39 = vpop.permute.xlu1 %1896  ;;  %v1847_v6 = vmax.f32 %v1815_v45, 0.0  ;;  %v2299_v58 = vpop.eup %2298 }
 0x3b3   :  { %v1941_v0 = vsel %vm1252_vm1, %v1845_v9, %v1897_v39  ;;  %v1891_v50 = vpop.permute.xlu0 %1890  ;;  %v1719_v39 = vmul.f32 %v1687_v30, %v3498_v36 }
 0x3b4   :  { %1957 = vst [vmem:[#allocation2 + $0x18] sm:$0xff] %v1941_v0  ;;  %v1938_v3 = vsel %vm1252_vm1, %v1842_v2, %v1891_v50  ;;  %v1716_v2 = vmul.f32 %v1684_v49, %v3493_v4  ;;  %v3570_v0 = vmul.f32 0.015625, %v3399_v13  ;;  %v1717_v4 = vmul.f32 %v1685_v33, %v3511_v7 }
 0x3b5   :  { %1954 = vst [vmem:[#allocation2] sm:$0xff] %v1938_v3  ;;  %v1757_v22 = vsub.f32 %v3325_v10, %v1719_v39  ;;  %v1365_v13 = vmul.f32 0.015625, %v3405_v11  ;;  %v1787_v11 = vmul.f32 %v1685_v33, %v3641_v15 }
 0x3b6   :  { %v1893_v12 = vpop.permute.xlu1 %1892  ;;  %v1754_v36 = vsub.f32 %v3325_v10, %v1716_v2  ;;  %v1555_v47 = vmul.f32 %v3570_v0, %v3570_v0  ;;  %v1755_v34 = vsub.f32 %v3325_v10, %v1717_v4 }
 0x3b7   :  { %v1939_v27 = vsel %vm1252_vm1, %v1843_v35, %v1893_v12  ;;  %v1523_v35 = vmul.f32 0.015625, %v3505_v42  ;;  %v1789_v12 = vmul.f32 %v1687_v30, %v3639_v40  ;;  %v1525_v42 = vmul.f32 0.015625, %v3521_v17 }
 0x3b8   :  { %1955 = vst [vmem:[#allocation2 + $0x8] sm:$0xff] %v1939_v27  ;;  %v1818_v61 = vadd.f32 %v1786_v1, %v1754_v36  ;;  %v1557_v7 = vmul.f32 %v1365_v13, %v1365_v13  ;;  %v1819_v29 = vadd.f32 %v1787_v11, %v1755_v34  ;;  %v1688_v17 = vmul.f32 %v2297_v59, %v3313_v32 }
 0x3b9   :  { %v1587_v27 = vsub.f32 %v1523_v35, %v1555_v47  ;;  %v1821_v54 = vadd.f32 %v1789_v12, %v1757_v22  ;;  %v3645_v47 = vld [vmem:[#allocation9_spill] sm:$0xff] }
 0x3ba   :  { %v1589_v19 = vsub.f32 %v1525_v42, %v1557_v7  ;;  %v1850_v25 = vmax.f32 %v1818_v61, 0.0  ;;  %v1720_v18 = vmul.f32 %v1688_v17, %v3533_v43 }
 0x3bb   :  { %v1619_v52 = vadd.f32 1e-05, %v1587_v27  ;;  %v1853_v48 = vmax.f32 %v1821_v54, 0.0 }
 0x3bc   :  { %v1621_v5 = vadd.f32 1e-05, %v1589_v19  ;;  %v1758_v8 = vsub.f32 %v3325_v10, %v1720_v18 }
 0x3bd   :  { %2300 = vrsqrt.f32 %v1619_v52 }
 0x3be   :  { %v1903_v28 = vpop.permute.xlu0 %1902  ;;  %2302 = vrsqrt.f32 %v1621_v5 }
 0x3bf   :  { %v1944_v14 = vsel %vm1252_vm1, %v1848_v21, %v1903_v28  ;;  %v1851_v28 = vmax.f32 %v1819_v29, 0.0 }
 0x3c0   :  { %1960 = vst [vmem:[#allocation2 + $0x30] sm:$0xff] %v1944_v14  ;;  %v1690_v14 = vmul.f32 %v2299_v58, %v3313_v32 }
 0x3c2   :  { %v1905_v9 = vpop.permute.xlu1 %1904  ;;  %v1722_v41 = vmul.f32 %v1690_v14, %v3544_v23 }
 0x3c3   :  { %v1945_v55 = vsel %vm1252_vm1, %v1849_v56, %v1905_v9  ;;  %v1899_v57 = vpop.permute.xlu0 %1898  ;;  %v3642_v56 = vld [vmem:[#allocation10_spill] sm:$0xff]  ;;  %v3643_v9 = vld [vmem:[#allocation11_spill] sm:$0xff] }
 0x3c4   :  { %1961 = vst [vmem:[#allocation2 + $0x38] sm:$0xff] %v1945_v55  ;;  %v1942_v53 = vsel %vm1252_vm1, %v1846_v24, %v1899_v57  ;;  %v1790_v45 = vmul.f32 %v1688_v17, %v3642_v56  ;;  %v1760_v49 = vsub.f32 %v3325_v10, %v1722_v41  ;;  %v1792_v24 = vmul.f32 %v1690_v14, %v3643_v9 }
 0x3c5   :  { %1958 = vst [vmem:[#allocation2 + $0x20] sm:$0xff] %v1942_v53 }
 0x3c6   :  { %v1901_v50 = vpop.permute.xlu1 %1900  ;;  %v1822_v30 = vadd.f32 %v1790_v45, %v1758_v8  ;;  %v1824_v57 = vadd.f32 %v1792_v24, %v1760_v49 }
 0x3c7   :  { %v1943_v3 = vsel %vm1252_vm1, %v1847_v6, %v1901_v50 }
 0x3c8   :  { %1959 = vst [vmem:[#allocation2 + $0x28] sm:$0xff] %v1943_v3  ;;  %v1854_v43 = vmax.f32 %v1822_v30, 0.0  ;;  %v1856_v6 = vmax.f32 %v1824_v57, 0.0 }
 0x3ca   :  { %v2301_v55 = vpop.eup %2300 }
 0x3cb   :  { %v1689_v39 = vmul.f32 %v2301_v55, %v3313_v32  ;;  %v2303_v2 = vpop.eup %2302 }
 0x3cc   :  { %v1691_v16 = vmul.f32 %v2303_v2, %v3313_v32 }
 0x3cd   :  { %v1721_v50 = vmul.f32 %v1689_v39, %v3570_v0  ;;  %v1791_v22 = vmul.f32 %v1689_v39, %v3644_v38 }
 0x3ce   :  { %v1723_v35 = vmul.f32 %v1691_v16, %v1365_v13  ;;  %v1793_v40 = vmul.f32 %v1691_v16, %v3645_v47 }
 0x3cf   :  { %v1911_v31 = vpop.permute.xlu0 %1910  ;;  %v1759_v3 = vsub.f32 %v3325_v10, %v1721_v50 }
 0x3d0   :  { %v1948_v60 = vsel %vm1252_vm1, %v1852_v46, %v1911_v31  ;;  %v1761_v4 = vsub.f32 %v3325_v10, %v1723_v35 }
 0x3d1   :  { %1964 = vst [vmem:[#allocation2 + $0x50] sm:$0xff] %v1948_v60  ;;  %v1823_v36 = vadd.f32 %v1791_v22, %v1759_v3 }
 0x3d2   :  { %v1913_v20 = vpop.permute.xlu1 %1912  ;;  %v1825_v26 = vadd.f32 %v1793_v40, %v1761_v4 }
 0x3d3   :  { %v1907_v62 = vpop.permute.xlu0 %1906  ;;  %v1949_v21 = vsel %vm1252_vm1, %v1853_v48, %v1913_v20  ;;  %v1855_v12 = vmax.f32 %v1823_v36, 0.0 }
 0x3d4   :  { %v1946_v44 = vsel %vm1252_vm1, %v1850_v25, %v1907_v62  ;;  %1965 = vst [vmem:[#allocation2 + $0x58] sm:$0xff] %v1949_v21  ;;  %v1857_v0 = vmax.f32 %v1825_v26, 0.0 }
 0x3d5   :  { %1962 = vst [vmem:[#allocation2 + $0x40] sm:$0xff] %v1946_v44 }
 0x3d6   :  { %v1909_v51 = vpop.permute.xlu1 %1908 }
 0x3d7   :  { %v1947_v63 = vsel %vm1252_vm1, %v1851_v28, %v1909_v51 }
 0x3d8   :  { %1963 = vst [vmem:[#allocation2 + $0x48] sm:$0xff] %v1947_v63 }
 0x3e3   :  { %v1915_v53 = vpop.permute.xlu0 %1914 }
 0x3e4   :  { %v1950_v37 = vsel %vm1252_vm1, %v1854_v43, %v1915_v53 }
 0x3e5   :  { %1966 = vst [vmem:[#allocation2 + $0x60] sm:$0xff] %v1950_v37 }
 0x3e7   :  { %v1919_v33 = vpop.permute.xlu0 %1918 }
 0x3e8   :  { %v1952_v23 = vsel %vm1252_vm1, %v1856_v6, %v1919_v33 }
 0x3e9   :  { %1968 = vst [vmem:[#allocation2 + $0x70] sm:$0xff] %v1952_v23 }
 0x3f6   :  { %v1917_v1 = vpop.permute.xlu1 %1916 }
 0x3f7   :  { %v1951_v27 = vsel %vm1252_vm1, %v1855_v12, %v1917_v1 }
 0x3f8   :  { %1967 = vst [vmem:[#allocation2 + $0x68] sm:$0xff] %v1951_v27 }
 0x3fa   :  { %v1921_v32 = vpop.permute.xlu1 %1920 }
 0x3fb   :  { %v1953_v13 = vsel %vm1252_vm1, %v1857_v0, %v1921_v32 }
 0x3fc   :  { %1969 = vst [vmem:[#allocation2 + $0x78] sm:$0xff] %v1953_v13 }
 0x3fd   :  { %2315 = shalt.err (!%p2312_p4)
}
 0x3fe   :  { %s2328_s13 = smov 128   ;;  %s2329_s14 = smov 8  }
 0x3ff   :  { %1981 = dma.vmem_to_hbm [thread:$0]  %s1976_s11, 2048, %s3621_s9, [#allocation3], %s2328_s13, %s2328_s13, %s2329_s14  }
 0x400   :  { %2324 = dma.done.wait [#allocation3], 2048  }
 0x401   :  { %2325 = vsyncadd [#allocation3], 4294965248 }
 0x402   :  { %1985 = vsyncpa [#allocation3], 1 }

// kernel: tpu_custom_call.1
= control target key start
LH: loop header
LB: loop body
LE: loop exit
PB: predicated region body
PF: predicated region fallthrough
CT: control target
= control target key end

     0   :  { %vm169_vm0 = vcmask 261120   ;;  %s3612_s0 = inlined_call_operand.vmem [shape: bf16[256,32], index: 0, kind: input, shape index: {}]   ;;  %s3613_s1 = inlined_call_operand.vmem [shape: bf16[32,32], index: 1, kind: input, shape index: {}]   ;;  %s3614_s2 = inlined_call_operand.vmem [shape: f32[1,32], index: 2, kind: input, shape index: {}]   ;;  %s3615_s3 = inlined_call_operand.vmem [shape: f32[1,32], index: 3, kind: input, shape index: {}]   ;;  %s3616_s4 = inlined_call_operand.vmem [shape: f32[1,32], index: 4, kind: input, shape index: {}]   ;;  %s3617_s5 = inlined_call_operand.vmem [shape: bf16[32,64], index: 5, kind: input, shape index: {}]   ;;  %s3618_s6 = inlined_call_operand.vmem [shape: f32[1,64], index: 6, kind: input, shape index: {}]   ;;  %s3619_s7 = inlined_call_operand.vmem [shape: f32[1,64], index: 7, kind: input, shape index: {}]   ;;  %s3620_s8 = inlined_call_operand.vmem [shape: f32[1,64], index: 8, kind: input, shape index: {}]   ;;  %s3621_s9 = inlined_call_operand.hbm [shape: f32[128,128], index: 9, kind: output, shape index: {}]  }
   0x1   :  { %v2156_v0 = vld [vmem:[%s3613_s1 + $0x8] sm:$0xff]   ;;  %v2157_v1 = vld [vmem:[%s3613_s1] sm:$0xff]   ;;  %v2160_v4 = vld [vmem:[%s3612_s0 + $0x10] sm:$0xff]  }
   0x2   :  { %2080 = vmatprep.subr.bf16.mxu0 %v2156_v0  ;;  %v2158_v2 = vld [vmem:[%s3612_s0] sm:$0xff]   ;;  %v2159_v3 = vld [vmem:[%s3612_s0 + $0x8] sm:$0xff]   ;;  %v2161_v5 = vld [vmem:[%s3612_s0 + $0x18] sm:$0xff]  }
   0x3   :  { %2081 = vmatpush3.bf16.msra.mxu0 %v2156_v0  ;;  %2084 = vmatprep.mubr.msk.bf16.mxu0 %vm169_vm0, %v2158_v2  ;;  %v2162_v6 = vld [vmem:[%s3612_s0 + $0x20] sm:$0xff]  }
   0x4   :  { %2082 = vmatprep.subr.bf16.mxu0 %v2157_v1 }
   0x7   :  { %2083 = vmatpush3.bf16.msra.mxu0 %v2157_v1 }
   0xa   :  { %2085 = vmatmul.mubr.msk.bf16.vlgmr.msra.gmra.mxu0 %vm169_vm0, %v2159_v3 }
   0xb   :  { %2088 = vmatprep.mubr.msk.bf16.mxu0 %vm169_vm0, %v2160_v4 }
  0x12   :  { %2089 = vmatmul.mubr.msk.bf16.gmra.mxu0 %vm169_vm0, %v2161_v5 }
  0x13   :  { %2092 = vmatprep.mubr.msk.bf16.mxu0 %vm169_vm0, %v2162_v6 }
  0x14   :  { %14 = vsyncpa [#allocation3], 0  ;;  %v2163_v7 = vld [vmem:[%s3612_s0 + $0x28] sm:$0xff]   ;;  %v2164_v8 = vld [vmem:[%s3612_s0 + $0x30] sm:$0xff]   ;;  %vm1252_vm1 = vcmask 523264   ;;  %s2327_s10 = smov [#allocation2]  }
  0x15   :  { %v2165_v9 = vld [vmem:[%s3612_s0 + $0x38] sm:$0xff]   ;;  %v2166_v10 = vld [vmem:[%s3612_s0 + $0x40] sm:$0xff]   ;;  %v2167_v11 = vld [vmem:[%s3612_s0 + $0x48] sm:$0xff]   ;;  %s1975_s11 = sshll.u32 %s2327_s10, 4  ;;  %s1976_s11 = int_to_ptr.vmem [resolvable:$true] %s1975_s11 }
  0x16   :  { %v2168_v12 = vld [vmem:[%s3612_s0 + $0x50] sm:$0xff]   ;;  %v2169_v13 = vld [vmem:[%s3612_s0 + $0x58] sm:$0xff]   ;;  %v2170_v14 = vld [vmem:[%s3612_s0 + $0x60] sm:$0xff]   ;;  %s2304_s12 = scalar_lea.vmem %s1976_s11, 2048  ;;  %p2309_p1 = scmp.lt.s32.totalorder %s1976_s11, %s1976_s11 }
  0x17   :  { %v2171_v15 = vld [vmem:[%s3612_s0 + $0x68] sm:$0xff]   ;;  %v2172_v16 = vld [vmem:[%s3612_s0 + $0x70] sm:$0xff]   ;;  %v2173_v17 = vld [vmem:[%s3612_s0 + $0x78] sm:$0xff]   ;;  %p2305_p0 = scmp.ne.s32.totalorder %s1976_s11, %s2304_s12  ;;  %p2310_p2 = scmp.lt.s32.totalorder %s2304_s12, %s2304_s12 }
  0x18   :  { %v2453_v18 = vld [vmem:[%s3614_s2] ss:$0 sm:$0xff] }
  0x19   :  { %p2311_p3 = por %p2310_p2, %p2309_p1 }
  0x1a   :  { %2093 = vmatmul.mubr.msk.bf16.gmra.mxu0 %vm169_vm0, %v2163_v7 }
  0x1b   :  { %2096 = vmatprep.mubr.msk.bf16.mxu0 %vm169_vm0, %v2164_v8  ;;  %p2312_p4 = pnand %p2311_p3, %p2305_p0 }
  0x22   :  { %2097 = vmatmul.mubr.msk.bf16.gmra.mxu0 %vm169_vm0, %v2165_v9 }
  0x23   :  { %2100 = vmatprep.mubr.msk.bf16.mxu0 %vm169_vm0, %v2166_v10 }
  0x2a   :  { %2101 = vmatmul.mubr.msk.bf16.gmra.mxu0 %vm169_vm0, %v2167_v11 }
  0x2b   :  { %2104 = vmatprep.mubr.msk.bf16.mxu0 %vm169_vm0, %v2168_v12 }
  0x32   :  { %2105 = vmatmul.mubr.msk.bf16.gmra.mxu0 %vm169_vm0, %v2169_v13 }
  0x33   :  { %2108 = vmatprep.mubr.msk.bf16.mxu0 %vm169_vm0, %v2170_v14 }
  0x3a   :  { %2109 = vmatmul.mubr.msk.bf16.gmra.mxu0 %vm169_vm0, %v2171_v15 }
  0x3b   :  { %2112 = vmatprep.mubr.msk.bf16.mxu0 %vm169_vm0, %v2172_v16 }
  0x42   :  { %2113 = vmatmul.mubr.msk.bf16.gmra.mxu0 %vm169_vm0, %v2173_v17 }
  0xca   :  { %v2086_v19 = vpop.f32.mrf.mxu0 }
  0xcb   :  { %v2456_v20 = vadd.f32 %v2086_v19, %v2453_v18 }
  0xcc   :  { %v252_v21 = vpop.f32.mrf.mxu0 }
  0xcd   :  { %v2459_v22 = vadd.f32 %v2453_v18, %v252_v21  ;;  %v387_v23 = vsel %vm169_vm0, %v2456_v20, 0.0  ;;  %v512_v27 = vmul.f32 %v2456_v20, %v2456_v20 }
  0xce   :  { %388 = vadd.xlane.f32.xlu1 %v387_v23  ;;  %v2087_v24 = vpop.f32.mrf.mxu0 }
  0xcf   :  { %v2464_v25 = vadd.f32 %v2087_v24, %v2453_v18  ;;  %v381_v26 = vsel %vm169_vm0, %v2459_v22, 0.0  ;;  %v548_v33 = vsel %vm169_vm0, %v512_v27, 0.0  ;;  %v510_v34 = vmul.f32 %v2459_v22, %v2459_v22 }
  0xd0   :  { %v255_v28 = vpop.f32.mrf.mxu0  ;;  %382 = vadd.xlane.f32.xlu0 %v381_v26 }
  0xd1   :  { %v2471_v29 = vadd.f32 %v2453_v18, %v255_v28  ;;  %v390_v30 = vsel %vm169_vm0, %v2464_v25, 0.0  ;;  %v513_v31 = vmul.f32 %v2464_v25, %v2464_v25  ;;  %v542_v39 = vsel %vm169_vm0, %v510_v34, 0.0 }
  0xd2   :  { %391 = vadd.xlane.f32.xlu1 %v390_v30  ;;  %v2090_v32 = vpop.f32.mrf.mxu0 }
  0xd3   :  { %v551_v36 = vsel %vm169_vm0, %v513_v31, 0.0  ;;  %v511_v37 = vmul.f32 %v2471_v29, %v2471_v29  ;;  %v2489_v43 = vadd.f32 %v2090_v32, %v2453_v18  ;;  %v384_v44 = vsel %vm169_vm0, %v2471_v29, 0.0  ;;  %v2174_v31 = vld [vmem:[%s3617_s5 + $0x8] sm:$0xff]  }
  0xd4   :  { %v268_v35 = vpop.f32.mrf.mxu0  ;;  %549 = vadd.xlane.f32.xlu0 %v548_v33  ;;  %2116 = vmatprep.subr.bf16.mxu1 %v2174_v31 }
  0xd5   :  { %v545_v41 = vsel %vm169_vm0, %v511_v37, 0.0  ;;  %v2499_v48 = vadd.f32 %v2453_v18, %v268_v35  ;;  %v399_v49 = vsel %vm169_vm0, %v2489_v43, 0.0  ;;  %v516_v54 = vmul.f32 %v2489_v43, %v2489_v43  ;;  %2117 = vmatpush3.bf16.msra.mxu1 %v2174_v31  ;;  %v2175_v37 = vld [vmem:[%s3617_s5] sm:$0xff]  }
  0xd6   :  { %552 = vadd.xlane.f32.xlu1 %v551_v36  ;;  %v2091_v38 = vpop.f32.mrf.mxu0  ;;  %2118 = vmatprep.subr.bf16.mxu1 %v2175_v37 }
  0xd7   :  { %v2485_v40 = vadd.f32 %v2091_v38, %v2453_v18  ;;  %v393_v53 = vsel %vm169_vm0, %v2499_v48, 0.0  ;;  %v560_v58 = vsel %vm169_vm0, %v516_v54, 0.0  ;;  %v514_v59 = vmul.f32 %v2499_v48, %v2499_v48 }
  0xd8   :  { %543 = vadd.xlane.f32.xlu0 %v542_v39  ;;  %v271_v42 = vpop.f32.mrf.mxu0 }
  0xd9   :  { %v2494_v45 = vadd.f32 %v2453_v18, %v271_v42  ;;  %v402_v46 = vsel %vm169_vm0, %v2485_v40, 0.0  ;;  %v517_v51 = vmul.f32 %v2485_v40, %v2485_v40  ;;  %v554_v0 = vsel %vm169_vm0, %v514_v59, 0.0  ;;  %2119 = vmatpush3.bf16.msra.mxu1 %v2175_v37 }
  0xda   :  { %546 = vadd.xlane.f32.xlu1 %v545_v41  ;;  %v2094_v47 = vpop.f32.mrf.mxu0 }
  0xdb   :  { %v396_v50 = vsel %vm169_vm0, %v2494_v45, 0.0  ;;  %v563_v55 = vsel %vm169_vm0, %v517_v51, 0.0  ;;  %v515_v56 = vmul.f32 %v2494_v45, %v2494_v45  ;;  %v2522_v63 = vadd.f32 %v2094_v47, %v2453_v18 }
  0xdc   :  { %385 = vadd.xlane.f32.xlu0 %v384_v44  ;;  %v284_v52 = vpop.f32.mrf.mxu0 }
  0xdd   :  { %v557_v61 = vsel %vm169_vm0, %v515_v56, 0.0  ;;  %v2531_v4 = vadd.f32 %v2453_v18, %v284_v52  ;;  %v411_v5 = vsel %vm169_vm0, %v2522_v63, 0.0  ;;  %v520_v10 = vmul.f32 %v2522_v63, %v2522_v63 }
  0xde   :  { %403 = vadd.xlane.f32.xlu1 %v402_v46  ;;  %v2095_v57 = vpop.f32.mrf.mxu0 }
  0xdf   :  { %v2518_v60 = vadd.f32 %v2095_v57, %v2453_v18  ;;  %v405_v9 = vsel %vm169_vm0, %v2531_v4, 0.0  ;;  %v572_v14 = vsel %vm169_vm0, %v520_v10, 0.0  ;;  %v518_v15 = vmul.f32 %v2531_v4, %v2531_v4 }
  0xe0   :  { %400 = vadd.xlane.f32.xlu0 %v399_v49  ;;  %v287_v62 = vpop.f32.mrf.mxu0 }
  0xe1   :  { %v2526_v1 = vadd.f32 %v2453_v18, %v287_v62  ;;  %v414_v2 = vsel %vm169_vm0, %v2518_v60, 0.0  ;;  %v521_v7 = vmul.f32 %v2518_v60, %v2518_v60  ;;  %v566_v23 = vsel %vm169_vm0, %v518_v15, 0.0 }
  0xe2   :  { %397 = vadd.xlane.f32.xlu1 %v396_v50  ;;  %v2098_v3 = vpop.f32.mrf.mxu0 }
  0xe3   :  { %v408_v6 = vsel %vm169_vm0, %v2526_v1, 0.0  ;;  %v575_v11 = vsel %vm169_vm0, %v521_v7, 0.0  ;;  %v519_v12 = vmul.f32 %v2526_v1, %v2526_v1  ;;  %v2554_v21 = vadd.f32 %v2098_v3, %v2453_v18 }
  0xe4   :  { %394 = vadd.xlane.f32.xlu0 %v393_v53  ;;  %v300_v8 = vpop.f32.mrf.mxu0 }
  0xe5   :  { %v569_v17 = vsel %vm169_vm0, %v519_v12, 0.0  ;;  %v2563_v28 = vadd.f32 %v2453_v18, %v300_v8  ;;  %v423_v30 = vsel %vm169_vm0, %v2554_v21, 0.0  ;;  %v524_v36 = vmul.f32 %v2554_v21, %v2554_v21 }
  0xe6   :  { %564 = vadd.xlane.f32.xlu1 %v563_v55  ;;  %v2099_v13 = vpop.f32.mrf.mxu0 }
  0xe7   :  { %v2550_v16 = vadd.f32 %v2099_v13, %v2453_v18  ;;  %v417_v35 = vsel %vm169_vm0, %v2563_v28, 0.0  ;;  %v584_v42 = vsel %vm169_vm0, %v524_v36, 0.0  ;;  %v522_v44 = vmul.f32 %v2563_v28, %v2563_v28 }
  0xe8   :  { %561 = vadd.xlane.f32.xlu0 %v560_v58  ;;  %v303_v19 = vpop.f32.mrf.mxu0 }
  0xe9   :  { %v2558_v24 = vadd.f32 %v2453_v18, %v303_v19  ;;  %v426_v26 = vsel %vm169_vm0, %v2550_v16, 0.0  ;;  %v525_v33 = vmul.f32 %v2550_v16, %v2550_v16  ;;  %v578_v51 = vsel %vm169_vm0, %v522_v44, 0.0 }
  0xea   :  { %558 = vadd.xlane.f32.xlu1 %v557_v61  ;;  %v2102_v27 = vpop.f32.mrf.mxu0 }
  0xeb   :  { %v420_v32 = vsel %vm169_vm0, %v2558_v24, 0.0  ;;  %v587_v38 = vsel %vm169_vm0, %v525_v33, 0.0  ;;  %v523_v39 = vmul.f32 %v2558_v24, %v2558_v24  ;;  %v2592_v50 = vadd.f32 %v2102_v27, %v2453_v18 }
  0xec   :  { %555 = vadd.xlane.f32.xlu0 %v554_v0  ;;  %v316_v34 = vpop.f32.mrf.mxu0 }
  0xed   :  { %v581_v47 = vsel %vm169_vm0, %v523_v39, 0.0  ;;  %v2601_v55 = vadd.f32 %v2453_v18, %v316_v34  ;;  %v435_v56 = vsel %vm169_vm0, %v2592_v50, 0.0  ;;  %v528_v62 = vmul.f32 %v2592_v50, %v2592_v50 }
  0xee   :  { %415 = vadd.xlane.f32.xlu1 %v414_v2  ;;  %v2103_v41 = vpop.f32.mrf.mxu0 }
  0xef   :  { %v2588_v46 = vadd.f32 %v2103_v41, %v2453_v18  ;;  %v429_v61 = vsel %vm169_vm0, %v2601_v55, 0.0 }
  0xf0   :  { %412 = vadd.xlane.f32.xlu0 %v411_v5  ;;  %v319_v49 = vpop.f32.mrf.mxu0  ;;  %v596_v5 = vsel %vm169_vm0, %v528_v62, 0.0 }
  0xf1   :  { %v2596_v52 = vadd.f32 %v2453_v18, %v319_v49  ;;  %v438_v53 = vsel %vm169_vm0, %v2588_v46, 0.0  ;;  %v529_v58 = vmul.f32 %v2588_v46, %v2588_v46 }
  0xf2   :  { %409 = vadd.xlane.f32.xlu1 %v408_v6  ;;  %v2106_v54 = vpop.f32.mrf.mxu0  ;;  %v526_v6 = vmul.f32 %v2601_v55, %v2601_v55 }
  0xf3   :  { %v432_v57 = vsel %vm169_vm0, %v2596_v52, 0.0  ;;  %v599_v0 = vsel %vm169_vm0, %v529_v58, 0.0  ;;  %v527_v2 = vmul.f32 %v2596_v52, %v2596_v52  ;;  %v2624_v10 = vadd.f32 %v2106_v54, %v2453_v18 }
  0xf4   :  { %406 = vadd.xlane.f32.xlu0 %v405_v9  ;;  %v332_v59 = vpop.f32.mrf.mxu0 }
  0xf5   :  { %v593_v8 = vsel %vm169_vm0, %v527_v2, 0.0  ;;  %v2633_v15 = vadd.f32 %v2453_v18, %v332_v59 }
  0xf6   :  { %576 = vadd.xlane.f32.xlu1 %v575_v11  ;;  %v2107_v3 = vpop.f32.mrf.mxu0  ;;  %v590_v11 = vsel %vm169_vm0, %v526_v6, 0.0 }
  0xf7   :  { %v2620_v7 = vadd.f32 %v2107_v3, %v2453_v18  ;;  %v441_v27 = vsel %vm169_vm0, %v2633_v15, 0.0 }
  0xf8   :  { %573 = vadd.xlane.f32.xlu0 %v572_v14  ;;  %v335_v9 = vpop.f32.mrf.mxu0 }
  0xf9   :  { %v2628_v12 = vadd.f32 %v2453_v18, %v335_v9  ;;  %v450_v13 = vsel %vm169_vm0, %v2620_v7, 0.0 }
  0xfa   :  { %570 = vadd.xlane.f32.xlu1 %v569_v17  ;;  %v2110_v14 = vpop.f32.mrf.mxu0  ;;  %v447_v17 = vsel %vm169_vm0, %v2624_v10, 0.0 }
  0xfb   :  { %v444_v19 = vsel %vm169_vm0, %v2628_v12, 0.0  ;;  %v2656_v39 = vadd.f32 %v2110_v14, %v2453_v18 }
  0xfc   :  { %567 = vadd.xlane.f32.xlu0 %v566_v23  ;;  %v533_v23 = vmul.f32 %v2620_v7, %v2620_v7 }
  0xfd   :  { %v536_v58 = vmul.f32 %v2656_v39, %v2656_v39 }
  0xfe   :  { %427 = vadd.xlane.f32.xlu1 %v426_v26  ;;  %v348_v26 = vpop.f32.mrf.mxu0  ;;  %v611_v31 = vsel %vm169_vm0, %v533_v23, 0.0 }
  0xff   :  { %v2665_v49 = vadd.f32 %v2453_v18, %v348_v26  ;;  %v620_v2 = vsel %vm169_vm0, %v536_v58, 0.0 }
 0x100   :  { %424 = vadd.xlane.f32.xlu0 %v423_v30  ;;  %v532_v30 = vmul.f32 %v2624_v10, %v2624_v10  ;;  %v2111_v33 = vpop.f32.mrf.mxu0 }
 0x101   :  { %v2652_v36 = vadd.f32 %v2111_v33, %v2453_v18  ;;  %v534_v3 = vmul.f32 %v2665_v49, %v2665_v49 }
 0x102   :  { %421 = vadd.xlane.f32.xlu1 %v420_v32  ;;  %v531_v32 = vmul.f32 %v2628_v12, %v2628_v12  ;;  %v608_v34 = vsel %vm169_vm0, %v532_v30, 0.0 }
 0x103   :  { %v462_v44 = vsel %vm169_vm0, %v2652_v36, 0.0  ;;  %v537_v54 = vmul.f32 %v2652_v36, %v2652_v36  ;;  %v614_v9 = vsel %vm169_vm0, %v534_v3, 0.0 }
 0x104   :  { %418 = vadd.xlane.f32.xlu0 %v417_v35  ;;  %v530_v35 = vmul.f32 %v2633_v15, %v2633_v15  ;;  %v605_v37 = vsel %vm169_vm0, %v531_v32, 0.0 }
 0x105   :  { %v623_v59 = vsel %vm169_vm0, %v537_v54, 0.0 }
 0x106   :  { %588 = vadd.xlane.f32.xlu1 %v587_v38  ;;  %v351_v38 = vpop.f32.mrf.mxu0  ;;  %v602_v41 = vsel %vm169_vm0, %v530_v35, 0.0 }
 0x108   :  { %585 = vadd.xlane.f32.xlu0 %v584_v42  ;;  %v2660_v42 = vadd.f32 %v2453_v18, %v351_v38 }
 0x10a   :  { %582 = vadd.xlane.f32.xlu1 %v581_v47  ;;  %v2114_v47 = vpop.f32.mrf.mxu0 }
 0x10c   :  { %579 = vadd.xlane.f32.xlu0 %v578_v51  ;;  %v459_v51 = vsel %vm169_vm0, %v2656_v39, 0.0 }
 0x10e   :  { %439 = vadd.xlane.f32.xlu1 %v438_v53  ;;  %v456_v53 = vsel %vm169_vm0, %v2660_v42, 0.0 }
 0x110   :  { %436 = vadd.xlane.f32.xlu0 %v435_v56  ;;  %v364_v56 = vpop.f32.mrf.mxu0 }
 0x111   :  { %v2697_v14 = vadd.f32 %v2453_v18, %v364_v56 }
 0x112   :  { %433 = vadd.xlane.f32.xlu1 %v432_v57  ;;  %v453_v57 = vsel %vm169_vm0, %v2665_v49, 0.0  ;;  %v2115_v62 = vpop.f32.mrf.mxu0 }
 0x113   :  { %v465_v26 = vsel %vm169_vm0, %v2697_v14, 0.0 }
 0x114   :  { %430 = vadd.xlane.f32.xlu0 %v429_v61  ;;  %v535_v61 = vmul.f32 %v2660_v42, %v2660_v42  ;;  %v367_v6 = vpop.f32.mrf.mxu0 }
 0x116   :  { %600 = vadd.xlane.f32.xlu1 %v599_v0  ;;  %v2681_v0 = vadd.f32 %v2115_v62, %v2453_v18 }
 0x118   :  { %597 = vadd.xlane.f32.xlu0 %v596_v5  ;;  %v617_v5 = vsel %vm169_vm0, %v535_v61, 0.0  ;;  %v541_v30 = vmul.f32 %v2681_v0, %v2681_v0 }
 0x11a   :  { %594 = vadd.xlane.f32.xlu1 %v593_v8  ;;  %v2688_v8 = vadd.f32 %v2114_v47, %v2453_v18  ;;  %v635_v33 = vsel %vm169_vm0, %v541_v30, 0.0 }
 0x11c   :  { %591 = vadd.xlane.f32.xlu0 %v590_v11  ;;  %3630 = vst [vmem:[#allocation5_spill] sm:$0xff] %v2688_v8  ;;  %v474_v11 = vsel %vm169_vm0, %v2681_v0, 0.0  ;;  %v540_v32 = vmul.f32 %v2688_v8, %v2688_v8 }
 0x11e   :  { %451 = vadd.xlane.f32.xlu1 %v450_v13  ;;  %v2694_v13 = vadd.f32 %v2453_v18, %v367_v6 }
 0x120   :  { %448 = vadd.xlane.f32.xlu0 %v447_v17  ;;  %v471_v17 = vsel %vm169_vm0, %v2688_v8, 0.0  ;;  %v539_v23 = vmul.f32 %v2694_v13, %v2694_v13 }
 0x122   :  { %445 = vadd.xlane.f32.xlu1 %v444_v19  ;;  %v468_v19 = vsel %vm169_vm0, %v2694_v13, 0.0  ;;  %v629_v18 = vsel %vm169_vm0, %v539_v23, 0.0 }
 0x124   :  { %442 = vadd.xlane.f32.xlu0 %v441_v27  ;;  %v538_v27 = vmul.f32 %v2697_v14, %v2697_v14 }
 0x126   :  { %612 = vadd.xlane.f32.xlu1 %v611_v31  ;;  %v626_v31 = vsel %vm169_vm0, %v538_v27, 0.0 }
 0x128   :  { %609 = vadd.xlane.f32.xlu0 %v608_v34  ;;  %v632_v34 = vsel %vm169_vm0, %v540_v32, 0.0 }
 0x12a   :  { %606 = vadd.xlane.f32.xlu1 %v605_v37 }
 0x12c   :  { %603 = vadd.xlane.f32.xlu0 %v602_v41 }
 0x12e   :  { %463 = vadd.xlane.f32.xlu1 %v462_v44 }
 0x130   :  { %460 = vadd.xlane.f32.xlu0 %v459_v51 }
 0x132   :  { %457 = vadd.xlane.f32.xlu1 %v456_v53 }
 0x134   :  { %454 = vadd.xlane.f32.xlu0 %v453_v57 }
 0x136   :  { %624 = vadd.xlane.f32.xlu1 %v623_v59 }
 0x138   :  { %621 = vadd.xlane.f32.xlu0 %v620_v2 }
 0x13a   :  { %618 = vadd.xlane.f32.xlu1 %v617_v5 }
 0x13c   :  { %615 = vadd.xlane.f32.xlu0 %v614_v9 }
 0x13e   :  { %475 = vadd.xlane.f32.xlu1 %v474_v11 }
 0x140   :  { %472 = vadd.xlane.f32.xlu0 %v471_v17 }
 0x142   :  { %469 = vadd.xlane.f32.xlu1 %v468_v19 }
 0x144   :  { %466 = vadd.xlane.f32.xlu0 %v465_v26 }
 0x146   :  { %630 = vadd.xlane.f32.xlu1 %v629_v18 }
 0x148   :  { %627 = vadd.xlane.f32.xlu0 %v626_v31 }
 0x14a   :  { %636 = vadd.xlane.f32.xlu1 %v635_v33 }
 0x14c   :  { %633 = vadd.xlane.f32.xlu0 %v632_v34 }
 0x157   :  { %v389_v35 = vpop.xlane.xlu1 %388 }
 0x158   :  { %v2717_v38 = vmul.f32 0.03125, %v389_v35 }
 0x159   :  { %v383_v37 = vpop.xlane.xlu0 %382 }
 0x15a   :  { %v672_v51 = vmul.f32 %v2717_v38, %v2717_v38  ;;  %v2721_v53 = vmul.f32 0.03125, %v383_v37 }
 0x15b   :  { %v392_v41 = vpop.xlane.xlu1 %391 }
 0x15c   :  { %v481_v44 = vmul.f32 0.03125, %v392_v41  ;;  %v670_v62 = vmul.f32 %v2721_v53, %v2721_v53 }
 0x15d   :  { %v550_v47 = vpop.xlane.xlu0 %549 }
 0x15e   :  { %v640_v54 = vmul.f32 0.03125, %v550_v47  ;;  %v673_v57 = vmul.f32 %v481_v44, %v481_v44 }
 0x15f   :  { %v553_v56 = vpop.xlane.xlu1 %552 }
 0x160   :  { %v704_v58 = vsub.f32 %v640_v54, %v672_v51  ;;  %v641_v59 = vmul.f32 0.03125, %v553_v56 }
 0x161   :  { %v544_v61 = vpop.xlane.xlu0 %543 }
 0x162   :  { %v736_v2 = vadd.f32 1e-05, %v704_v58  ;;  %v705_v3 = vsub.f32 %v641_v59, %v673_v57  ;;  %v638_v5 = vmul.f32 0.03125, %v544_v61  ;;  %v2738_v59 = vld [vmem:[%s3615_s3] ss:$0 sm:$0xff] }
 0x163   :  { %v547_v6 = vpop.xlane.xlu1 %546 }
 0x164   :  { %v737_v9 = vadd.f32 1e-05, %v705_v3  ;;  %v702_v11 = vsub.f32 %v638_v5, %v670_v62  ;;  %2176 = vrsqrt.f32 %v736_v2  ;;  %v639_v27 = vmul.f32 0.03125, %v547_v6 }
 0x165   :  { %v386_v17 = vpop.xlane.xlu0 %385 }
 0x166   :  { %2178 = vrsqrt.f32 %v737_v9  ;;  %v734_v19 = vadd.f32 1e-05, %v702_v11  ;;  %v479_v23 = vmul.f32 0.03125, %v386_v17 }
 0x167   :  { %v404_v26 = vpop.xlane.xlu1 %403 }
 0x168   :  { %2180 = vrsqrt.f32 %v734_v19  ;;  %v671_v18 = vmul.f32 %v479_v23, %v479_v23  ;;  %v2725_v34 = vmul.f32 0.03125, %v404_v26 }
 0x169   :  { %v401_v30 = vpop.xlane.xlu0 %400 }
 0x16a   :  { %v703_v31 = vsub.f32 %v639_v27, %v671_v18  ;;  %v2727_v37 = vmul.f32 0.03125, %v401_v30  ;;  %v677_v51 = vmul.f32 %v2725_v34, %v2725_v34 }
 0x16b   :  { %v398_v32 = vpop.xlane.xlu1 %397 }
 0x16c   :  { %v735_v33 = vadd.f32 1e-05, %v703_v31  ;;  %v2729_v41 = vmul.f32 0.03125, %v398_v32  ;;  %v676_v61 = vmul.f32 %v2727_v37, %v2727_v37 }
 0x16d   :  { %v395_v35 = vpop.xlane.xlu0 %394 }
 0x16e   :  { %2182 = vrsqrt.f32 %v735_v33  ;;  %v2733_v56 = vmul.f32 0.03125, %v395_v35  ;;  %v675_v5 = vmul.f32 %v2729_v41, %v2729_v41 }
 0x16f   :  { %v565_v47 = vpop.xlane.xlu1 %564 }
 0x170   :  { %v645_v54 = vmul.f32 0.03125, %v565_v47  ;;  %v674_v27 = vmul.f32 %v2733_v56, %v2733_v56 }
 0x171   :  { %v562_v57 = vpop.xlane.xlu0 %561  ;;  %v2177_v58 = vpop.eup %2176 }
 0x172   :  { %v709_v62 = vsub.f32 %v645_v54, %v677_v51  ;;  %v644_v2 = vmul.f32 0.03125, %v562_v57  ;;  %v806_v30 = vmul.f32 %v2177_v58, %v2738_v59  ;;  %v2754_v58 = vld [vmem:[%s3616_s4] ss:$0 sm:$0xff] }
 0x173   :  { %v2179_v3 = vpop.eup %2178  ;;  %v559_v6 = vpop.xlane.xlu1 %558 }
 0x174   :  { %v741_v9 = vadd.f32 1e-05, %v709_v62  ;;  %v708_v11 = vsub.f32 %v644_v2, %v676_v61  ;;  %v643_v17 = vmul.f32 0.03125, %v559_v6  ;;  %v807_v19 = vmul.f32 %v2179_v3, %v2738_v59 }
 0x175   :  { %v2181_v26 = vpop.eup %2180  ;;  %v556_v18 = vpop.xlane.xlu0 %555  ;;  %v838_v2 = vmul.f32 %v806_v30, %v2717_v38 }
 0x176   :  { %2184 = vrsqrt.f32 %v741_v9  ;;  %v740_v31 = vadd.f32 1e-05, %v708_v11  ;;  %v707_v32 = vsub.f32 %v643_v17, %v675_v5  ;;  %v642_v33 = vmul.f32 0.03125, %v556_v18 }
 0x177   :  { %v416_v35 = vpop.xlane.xlu1 %415  ;;  %v804_v47 = vmul.f32 %v2181_v26, %v2738_v59  ;;  %v839_v51 = vmul.f32 %v807_v19, %v481_v44  ;;  %v876_v38 = vsub.f32 %v2754_v58, %v838_v2  ;;  %v909_v26 = vmul.f32 %v807_v19, %v2464_v25 }
 0x178   :  { %2186 = vrsqrt.f32 %v740_v31  ;;  %v739_v54 = vadd.f32 1e-05, %v707_v32  ;;  %v706_v57 = vsub.f32 %v642_v33, %v674_v27  ;;  %v2758_v11 = vmul.f32 0.03125, %v416_v35 }
 0x179   :  { %v413_v61 = vpop.xlane.xlu0 %412  ;;  %v836_v62 = vmul.f32 %v804_v47, %v2721_v53  ;;  %v877_v9 = vsub.f32 %v2754_v58, %v839_v51  ;;  %v906_v33 = vmul.f32 %v804_v47, %v2459_v22  ;;  %v908_v51 = vmul.f32 %v806_v30, %v2456_v20 }
 0x17a   :  { %2188 = vrsqrt.f32 %v739_v54  ;;  %v738_v3 = vadd.f32 1e-05, %v706_v57  ;;  %v2763_v18 = vmul.f32 0.03125, %v413_v61  ;;  %v681_v57 = vmul.f32 %v2758_v11, %v2758_v11 }
 0x17b   :  { %v2183_v5 = vpop.eup %2182  ;;  %v410_v6 = vpop.xlane.xlu1 %409  ;;  %v874_v53 = vsub.f32 %v2754_v58, %v836_v62  ;;  %v941_v54 = vadd.f32 %v909_v26, %v877_v9  ;;  %v940_v61 = vadd.f32 %v908_v51, %v876_v38 }
 0x17c   :  { %v805_v44 = vmul.f32 %v2183_v5, %v2738_v59  ;;  %2190 = vrsqrt.f32 %v738_v3  ;;  %v2765_v31 = vmul.f32 0.03125, %v410_v6  ;;  %v680_v3 = vmul.f32 %v2763_v18, %v2763_v18 }
 0x17d   :  { %v407_v17 = vpop.xlane.xlu0 %406  ;;  %v938_v19 = vadd.f32 %v906_v33, %v874_v53  ;;  %v973_v9 = vmax.f32 %v941_v54, 0.0  ;;  %v972_v33 = vmax.f32 %v940_v61, 0.0 }
 0x17e   :  { %v837_v27 = vmul.f32 %v805_v44, %v479_v23  ;;  %v907_v2 = vmul.f32 %v805_v44, %v2471_v29  ;;  %v2773_v25 = vmul.f32 0.03125, %v407_v17  ;;  %v679_v5 = vmul.f32 %v2765_v31, %v2765_v31 }
 0x17f   :  { %v577_v32 = vpop.xlane.xlu1 %576 }
 0x180   :  { %v875_v35 = vsub.f32 %v2754_v58, %v837_v27  ;;  %v649_v62 = vmul.f32 0.03125, %v577_v32  ;;  %v678_v53 = vmul.f32 %v2773_v25, %v2773_v25  ;;  %v970_v32 = vmax.f32 %v938_v19, 0.0 }
 0x181   :  { %v574_v23 = vpop.xlane.xlu0 %573 }
 0x182   :  { %v713_v22 = vsub.f32 %v649_v62, %v681_v57  ;;  %v648_v47 = vmul.f32 0.03125, %v574_v23  ;;  %v939_v20 = vadd.f32 %v907_v2, %v875_v35 }
 0x183   :  { %v2185_v30 = vpop.eup %2184  ;;  %v571_v6 = vpop.xlane.xlu1 %570 }
 0x184   :  { %v745_v26 = vadd.f32 1e-05, %v713_v22  ;;  %v712_v27 = vsub.f32 %v648_v47, %v680_v3  ;;  %v647_v29 = vmul.f32 0.03125, %v571_v6  ;;  %v971_v44 = vmax.f32 %v939_v20, 0.0 }
 0x185   :  { %v2187_v17 = vpop.eup %2186  ;;  %v568_v38 = vpop.xlane.xlu0 %567  ;;  %v811_v51 = vmul.f32 %v2185_v30, %v2738_v59  ;;  %v1003_v6 = vpack.c.bf16 %v973_v9, %v972_v33 }
 0x186   :  { %2192 = vrsqrt.f32 %v745_v26  ;;  %v744_v35 = vadd.f32 1e-05, %v712_v27  ;;  %v711_v57 = vsub.f32 %v647_v29, %v679_v5  ;;  %v646_v62 = vmul.f32 0.03125, %v568_v38 }
 0x187   :  { %v2189_v2 = vpop.eup %2188  ;;  %v428_v23 = vpop.xlane.xlu1 %427  ;;  %v1002_v54 = vpack.c.bf16 %v971_v44, %v970_v32  ;;  %v810_v3 = vmul.f32 %v2187_v17, %v2738_v59  ;;  %v843_v22 = vmul.f32 %v811_v51, %v2725_v34 }
 0x188   :  { %2194 = vrsqrt.f32 %v744_v35  ;;  %v743_v47 = vadd.f32 1e-05, %v711_v57  ;;  %v710_v20 = vsub.f32 %v646_v62, %v678_v53  ;;  %v809_v61 = vmul.f32 %v2189_v2, %v2738_v59 }
 0x189   :  { %v2191_v8 = vpop.eup %2190  ;;  %2120 = vmatprep.mubr.msk.bf16.mxu1 %vm169_vm0, %v1002_v54  ;;  %v425_v19 = vpop.xlane.xlu0 %424  ;;  %v842_v30 = vmul.f32 %v810_v3, %v2727_v37  ;;  %v881_v26 = vsub.f32 %v2754_v58, %v843_v22  ;;  %v912_v44 = vmul.f32 %v810_v3, %v2489_v43  ;;  %v2793_v17 = vmul.f32 0.03125, %v428_v23 }
 0x18a   :  { %2196 = vrsqrt.f32 %v743_v47  ;;  %v742_v5 = vadd.f32 1e-05, %v710_v20  ;;  %2121 = vmatmul.mubr.msk.bf16.vlgmr.msra.gmra.mxu1 %vm169_vm0, %v1003_v6  ;;  %v808_v34 = vmul.f32 %v2191_v8, %v2738_v59  ;;  %v841_v29 = vmul.f32 %v809_v61, %v2729_v41 }
 0x18b   :  { %v422_v27 = vpop.xlane.xlu1 %421  ;;  %v880_v9 = vsub.f32 %v2754_v58, %v842_v30  ;;  %v913_v37 = vmul.f32 %v811_v51, %v2485_v40  ;;  %v911_v33 = vmul.f32 %v809_v61, %v2494_v45  ;;  %v2799_v8 = vmul.f32 0.03125, %v425_v19 }
 0x18c   :  { %2198 = vrsqrt.f32 %v742_v5  ;;  %v840_v38 = vmul.f32 %v808_v34, %v2733_v56  ;;  %v879_v32 = vsub.f32 %v2754_v58, %v841_v29  ;;  %v2801_v41 = vmul.f32 0.03125, %v422_v27 }
 0x18d   :  { %v419_v53 = vpop.xlane.xlu0 %418  ;;  %v944_v35 = vadd.f32 %v912_v44, %v880_v9  ;;  %v910_v62 = vmul.f32 %v808_v34, %v2499_v48  ;;  %v945_v23 = vadd.f32 %v913_v37, %v881_v26  ;;  %v685_v40 = vmul.f32 %v2793_v17, %v2793_v17 }
 0x18e   :  { %v878_v43 = vsub.f32 %v2754_v58, %v840_v38  ;;  %v943_v2 = vadd.f32 %v911_v33, %v879_v32  ;;  %v2807_v51 = vmul.f32 0.03125, %v419_v53  ;;  %v684_v22 = vmul.f32 %v2799_v8, %v2799_v8 }
 0x18f   :  { %v589_v57 = vpop.xlane.xlu1 %588  ;;  %v976_v3 = vmax.f32 %v944_v35, 0.0  ;;  %v683_v48 = vmul.f32 %v2801_v41, %v2801_v41  ;;  %v977_v5 = vmax.f32 %v945_v23, 0.0 }
 0x190   :  { %v653_v56 = vmul.f32 0.03125, %v589_v57  ;;  %v942_v45 = vadd.f32 %v910_v62, %v878_v43  ;;  %v975_v30 = vmax.f32 %v943_v2, 0.0  ;;  %v682_v44 = vmul.f32 %v2807_v51, %v2807_v51 }
 0x191   :  { %v586_v54 = vpop.xlane.xlu0 %585  ;;  %v1005_v38 = vpack.c.bf16 %v977_v5, %v976_v3 }
 0x192   :  { %v717_v47 = vsub.f32 %v653_v56, %v685_v40  ;;  %v652_v20 = vmul.f32 0.03125, %v586_v54  ;;  %v974_v61 = vmax.f32 %v942_v45, 0.0 }
 0x193   :  { %v2193_v6 = vpop.eup %2192  ;;  %v583_v19 = vpop.xlane.xlu1 %582 }
 0x194   :  { %v749_v26 = vadd.f32 1e-05, %v717_v47  ;;  %v716_v27 = vsub.f32 %v652_v20, %v684_v22  ;;  %v651_v34 = vmul.f32 0.03125, %v583_v19  ;;  %v815_v29 = vmul.f32 %v2193_v6, %v2738_v59 }
 0x195   :  { %v2195_v9 = vpop.eup %2194  ;;  %v580_v37 = vpop.xlane.xlu0 %579  ;;  %v1004_v53 = vpack.c.bf16 %v975_v30, %v974_v61 }
 0x196   :  { %2200 = vrsqrt.f32 %v749_v26  ;;  %v748_v32 = vadd.f32 1e-05, %v716_v27  ;;  %v715_v33 = vsub.f32 %v651_v34, %v683_v48  ;;  %v650_v35 = vmul.f32 0.03125, %v580_v37 }
 0x197   :  { %v2197_v57 = vpop.eup %2196  ;;  %2124 = vmatprep.mubr.msk.bf16.mxu1 %vm169_vm0, %v1004_v53  ;;  %v440_v43 = vpop.xlane.xlu1 %439  ;;  %v814_v62 = vmul.f32 %v2195_v9, %v2738_v59  ;;  %v847_v2 = vmul.f32 %v815_v29, %v2758_v11  ;;  %v917_v30 = vmul.f32 %v815_v29, %v2518_v60 }
 0x198   :  { %2202 = vrsqrt.f32 %v748_v32  ;;  %v747_v23 = vadd.f32 1e-05, %v715_v33  ;;  %v714_v40 = vsub.f32 %v650_v35, %v682_v44  ;;  %2125 = vmatmul.mubr.msk.bf16.gmra.mxu1 %vm169_vm0, %v1005_v38  ;;  %v813_v45 = vmul.f32 %v2197_v57, %v2738_v59 }
 0x199   :  { %v2199_v56 = vpop.eup %2198  ;;  %v437_v54 = vpop.xlane.xlu0 %436  ;;  %v846_v3 = vmul.f32 %v814_v62, %v2763_v18  ;;  %v885_v47 = vsub.f32 %v2754_v58, %v847_v2  ;;  %v916_v19 = vmul.f32 %v814_v62, %v2522_v63  ;;  %v2827_v61 = vmul.f32 0.03125, %v440_v43 }
 0x19a   :  { %2204 = vrsqrt.f32 %v747_v23  ;;  %v746_v22 = vadd.f32 1e-05, %v714_v40  ;;  %v812_v6 = vmul.f32 %v2199_v56, %v2738_v59  ;;  %v845_v11 = vmul.f32 %v813_v45, %v2765_v31 }
 0x19b   :  { %v434_v20 = vpop.xlane.xlu1 %433  ;;  %v884_v48 = vsub.f32 %v2754_v58, %v846_v3  ;;  %v915_v27 = vmul.f32 %v813_v45, %v2526_v1  ;;  %v2833_v9 = vmul.f32 0.03125, %v437_v54  ;;  %v949_v38 = vadd.f32 %v917_v30, %v885_v47 }
 0x19c   :  { %2206 = vrsqrt.f32 %v746_v22  ;;  %v844_v18 = vmul.f32 %v812_v6, %v2773_v25  ;;  %v883_v26 = vsub.f32 %v2754_v58, %v845_v11  ;;  %v2835_v31 = vmul.f32 0.03125, %v434_v20 }
 0x19d   :  { %v431_v5 = vpop.xlane.xlu0 %430  ;;  %v948_v34 = vadd.f32 %v916_v19, %v884_v48  ;;  %v914_v37 = vmul.f32 %v812_v6, %v2531_v4  ;;  %v689_v60 = vmul.f32 %v2827_v61, %v2827_v61  ;;  %v688_v35 = vmul.f32 %v2833_v9, %v2833_v9 }
 0x19e   :  { %v882_v63 = vsub.f32 %v2754_v58, %v844_v18  ;;  %v947_v53 = vadd.f32 %v915_v27, %v883_v26  ;;  %v2841_v29 = vmul.f32 0.03125, %v431_v5  ;;  %v687_v4 = vmul.f32 %v2835_v31, %v2835_v31 }
 0x19f   :  { %v601_v44 = vpop.xlane.xlu1 %600  ;;  %v980_v33 = vmax.f32 %v948_v34, 0.0  ;;  %v981_v56 = vmax.f32 %v949_v38, 0.0 }
 0x1a0   :  { %v657_v25 = vmul.f32 0.03125, %v601_v44  ;;  %v946_v1 = vadd.f32 %v914_v37, %v882_v63  ;;  %v979_v40 = vmax.f32 %v947_v53, 0.0  ;;  %v686_v20 = vmul.f32 %v2841_v29, %v2841_v29 }
 0x1a1   :  { %v598_v32 = vpop.xlane.xlu0 %597  ;;  %v1007_v48 = vpack.c.bf16 %v981_v56, %v980_v33 }
 0x1a2   :  { %v721_v57 = vsub.f32 %v657_v25, %v689_v60  ;;  %v656_v43 = vmul.f32 0.03125, %v598_v32  ;;  %v978_v23 = vmax.f32 %v946_v1, 0.0 }
 0x1a3   :  { %v2201_v62 = vpop.eup %2200  ;;  %v595_v2 = vpop.xlane.xlu1 %594 }
 0x1a4   :  { %v753_v54 = vadd.f32 1e-05, %v721_v57  ;;  %v720_v45 = vsub.f32 %v656_v43, %v688_v35  ;;  %v655_v3 = vmul.f32 0.03125, %v595_v2  ;;  %v819_v22 = vmul.f32 %v2201_v62, %v2738_v59 }
 0x1a5   :  { %v2203_v47 = vpop.eup %2202  ;;  %v592_v6 = vpop.xlane.xlu0 %591  ;;  %v1006_v11 = vpack.c.bf16 %v979_v40, %v978_v23 }
 0x1a6   :  { %2208 = vrsqrt.f32 %v753_v54  ;;  %v752_v19 = vadd.f32 1e-05, %v720_v45  ;;  %v719_v30 = vsub.f32 %v655_v3, %v687_v4  ;;  %v654_v5 = vmul.f32 0.03125, %v592_v6 }
 0x1a7   :  { %v2205_v18 = vpop.eup %2204  ;;  %2128 = vmatprep.mubr.msk.bf16.mxu1 %vm169_vm0, %v1006_v11  ;;  %v452_v26 = vpop.xlane.xlu1 %451  ;;  %v818_v27 = vmul.f32 %v2203_v47, %v2738_v59  ;;  %v851_v34 = vmul.f32 %v819_v22, %v2793_v17  ;;  %v921_v62 = vmul.f32 %v819_v22, %v2550_v16 }
 0x1a8   :  { %2210 = vrsqrt.f32 %v752_v19  ;;  %v751_v44 = vadd.f32 1e-05, %v719_v30  ;;  %v718_v63 = vsub.f32 %v654_v5, %v686_v20  ;;  %2129 = vmatmul.mubr.msk.bf16.gmra.mxu1 %vm169_vm0, %v1007_v48  ;;  %v817_v38 = vmul.f32 %v2205_v18, %v2738_v59 }
 0x1a9   :  { %v2207_v37 = vpop.eup %2206  ;;  %v449_v53 = vpop.xlane.xlu0 %448  ;;  %v850_v60 = vmul.f32 %v818_v27, %v2799_v8  ;;  %v889_v32 = vsub.f32 %v2754_v58, %v851_v34  ;;  %v920_v57 = vmul.f32 %v818_v27, %v2554_v21  ;;  %v2861_v43 = vmul.f32 0.03125, %v452_v26 }
 0x1aa   :  { %2212 = vrsqrt.f32 %v751_v44  ;;  %v750_v25 = vadd.f32 1e-05, %v718_v63  ;;  %v816_v33 = vmul.f32 %v2207_v37, %v2738_v59  ;;  %v849_v17 = vmul.f32 %v817_v38, %v2801_v41 }
 0x1ab   :  { %v446_v1 = vpop.xlane.xlu1 %445  ;;  %v888_v35 = vsub.f32 %v2754_v58, %v850_v60  ;;  %v919_v23 = vmul.f32 %v817_v38, %v2558_v24  ;;  %v2867_v56 = vmul.f32 0.03125, %v449_v53  ;;  %v953_v47 = vadd.f32 %v921_v62, %v889_v32 }
 0x1ac   :  { %2214 = vrsqrt.f32 %v750_v25  ;;  %v848_v8 = vmul.f32 %v816_v33, %v2807_v51  ;;  %v887_v2 = vsub.f32 %v2754_v58, %v849_v17  ;;  %v2869_v41 = vmul.f32 0.03125, %v446_v1 }
 0x1ad   :  { %v443_v4 = vpop.xlane.xlu0 %442  ;;  %v952_v40 = vadd.f32 %v920_v57, %v888_v35  ;;  %v918_v45 = vmul.f32 %v816_v33, %v2563_v28  ;;  %v693_v16 = vmul.f32 %v2861_v43, %v2861_v43  ;;  %v692_v11 = vmul.f32 %v2867_v56, %v2867_v56 }
 0x1ae   :  { %v886_v21 = vsub.f32 %v2754_v58, %v848_v8  ;;  %v951_v3 = vadd.f32 %v919_v23, %v887_v2  ;;  %v2875_v22 = vmul.f32 0.03125, %v443_v4  ;;  %v691_v28 = vmul.f32 %v2869_v41, %v2869_v41 }
 0x1af   :  { %v613_v54 = vpop.xlane.xlu1 %612  ;;  %v984_v6 = vmax.f32 %v952_v40, 0.0  ;;  %v985_v27 = vmax.f32 %v953_v47, 0.0 }
 0x1b0   :  { %v661_v51 = vmul.f32 0.03125, %v613_v54  ;;  %v950_v24 = vadd.f32 %v918_v45, %v886_v21  ;;  %v983_v26 = vmax.f32 %v951_v3, 0.0  ;;  %v690_v38 = vmul.f32 %v2875_v22, %v2875_v22 }
 0x1b1   :  { %v610_v20 = vpop.xlane.xlu0 %609  ;;  %v1009_v32 = vpack.c.bf16 %v985_v27, %v984_v6 }
 0x1b2   :  { %v725_v48 = vsub.f32 %v661_v51, %v693_v16  ;;  %v660_v19 = vmul.f32 0.03125, %v610_v20  ;;  %v982_v18 = vmax.f32 %v950_v24, 0.0 }
 0x1b3   :  { %v2209_v30 = vpop.eup %2208  ;;  %v607_v5 = vpop.xlane.xlu1 %606 }
 0x1b4   :  { %v757_v34 = vadd.f32 1e-05, %v725_v48  ;;  %v724_v44 = vsub.f32 %v660_v19, %v692_v11  ;;  %v659_v63 = vmul.f32 0.03125, %v607_v5  ;;  %v823_v37 = vmul.f32 %v2209_v30, %v2738_v59 }
 0x1b5   :  { %v2211_v53 = vpop.eup %2210  ;;  %v604_v60 = vpop.xlane.xlu0 %603  ;;  %v1008_v25 = vpack.c.bf16 %v983_v26, %v982_v18 }
 0x1b6   :  { %2216 = vrsqrt.f32 %v757_v34  ;;  %v756_v1 = vadd.f32 1e-05, %v724_v44  ;;  %v723_v33 = vsub.f32 %v659_v63, %v691_v28  ;;  %v658_v17 = vmul.f32 0.03125, %v604_v60 }
 0x1b7   :  { %v2213_v35 = vpop.eup %2212  ;;  %2132 = vmatprep.mubr.msk.bf16.mxu1 %vm169_vm0, %v1008_v25  ;;  %v464_v57 = vpop.xlane.xlu1 %463  ;;  %v822_v62 = vmul.f32 %v2211_v53, %v2738_v59  ;;  %v855_v4 = vmul.f32 %v823_v37, %v2827_v61  ;;  %v925_v6 = vmul.f32 %v823_v37, %v2588_v46 }
 0x1b8   :  { %2218 = vrsqrt.f32 %v756_v1  ;;  %v755_v8 = vadd.f32 1e-05, %v723_v33  ;;  %v722_v2 = vsub.f32 %v658_v17, %v690_v38  ;;  %2133 = vmatmul.mubr.msk.bf16.gmra.mxu1 %vm169_vm0, %v1009_v32  ;;  %v821_v54 = vmul.f32 %v2213_v35, %v2738_v59 }
 0x1b9   :  { %v2215_v23 = vpop.eup %2214  ;;  %v461_v40 = vpop.xlane.xlu0 %460  ;;  %v854_v21 = vmul.f32 %v822_v62, %v2833_v9  ;;  %v893_v3 = vsub.f32 %v2754_v58, %v855_v4  ;;  %v924_v20 = vmul.f32 %v822_v62, %v2592_v50  ;;  %v2895_v24 = vmul.f32 0.03125, %v464_v57 }
 0x1ba   :  { %2220 = vrsqrt.f32 %v755_v8  ;;  %v754_v45 = vadd.f32 1e-05, %v722_v2  ;;  %v820_v16 = vmul.f32 %v2215_v23, %v2738_v59  ;;  %v853_v61 = vmul.f32 %v821_v54, %v2835_v31 }
 0x1bb   :  { %v458_v47 = vpop.xlane.xlu1 %457  ;;  %v892_v51 = vsub.f32 %v2754_v58, %v854_v21  ;;  %v923_v19 = vmul.f32 %v821_v54, %v2596_v52  ;;  %v2901_v28 = vmul.f32 0.03125, %v461_v40  ;;  %v957_v27 = vadd.f32 %v925_v6, %v893_v3 }
 0x1bc   :  { %2222 = vrsqrt.f32 %v754_v45  ;;  %v852_v9 = vmul.f32 %v820_v16, %v2841_v29  ;;  %v891_v48 = vsub.f32 %v2754_v58, %v853_v61  ;;  %v2903_v31 = vmul.f32 0.03125, %v458_v47 }
 0x1bd   :  { %v455_v11 = vpop.xlane.xlu0 %454  ;;  %v956_v30 = vadd.f32 %v924_v20, %v892_v51  ;;  %v922_v18 = vmul.f32 %v820_v16, %v2601_v55  ;;  %v697_v46 = vmul.f32 %v2895_v24, %v2895_v24  ;;  %v696_v37 = vmul.f32 %v2901_v28, %v2901_v28 }
 0x1be   :  { %v890_v50 = vsub.f32 %v2754_v58, %v852_v9  ;;  %v955_v26 = vadd.f32 %v923_v19, %v891_v48  ;;  %v2909_v34 = vmul.f32 0.03125, %v455_v11  ;;  %v695_v55 = vmul.f32 %v2903_v31, %v2903_v31 }
 0x1bf   :  { %v625_v5 = vpop.xlane.xlu1 %624  ;;  %v988_v63 = vmax.f32 %v956_v30, 0.0  ;;  %v989_v33 = vmax.f32 %v957_v27, 0.0 }
 0x1c0   :  { %v665_v29 = vmul.f32 0.03125, %v625_v5  ;;  %v954_v52 = vadd.f32 %v922_v18, %v890_v50  ;;  %v987_v1 = vmax.f32 %v955_v26, 0.0  ;;  %v694_v8 = vmul.f32 %v2909_v34, %v2909_v34 }
 0x1c1   :  { %v622_v44 = vpop.xlane.xlu0 %621  ;;  %v1011_v40 = vpack.c.bf16 %v989_v33, %v988_v63 }
 0x1c2   :  { %v729_v53 = vsub.f32 %v665_v29, %v697_v46  ;;  %v664_v38 = vmul.f32 0.03125, %v622_v44  ;;  %v986_v32 = vmax.f32 %v954_v52, 0.0 }
 0x1c3   :  { %v2217_v60 = vpop.eup %2216  ;;  %v619_v25 = vpop.xlane.xlu1 %618 }
 0x1c4   :  { %v761_v17 = vadd.f32 1e-05, %v729_v53  ;;  %v728_v35 = vsub.f32 %v664_v38, %v696_v37  ;;  %v663_v57 = vmul.f32 0.03125, %v619_v25  ;;  %v827_v62 = vmul.f32 %v2217_v60, %v2738_v59 }
 0x1c5   :  { %v2219_v4 = vpop.eup %2218  ;;  %v616_v2 = vpop.xlane.xlu0 %615  ;;  %v1010_v23 = vpack.c.bf16 %v987_v1, %v986_v32 }
 0x1c6   :  { %2224 = vrsqrt.f32 %v761_v17  ;;  %v760_v54 = vadd.f32 1e-05, %v728_v35  ;;  %v727_v21 = vsub.f32 %v663_v57, %v695_v55  ;;  %v662_v45 = vmul.f32 0.03125, %v616_v2 }
 0x1c7   :  { %v2221_v3 = vpop.eup %2220  ;;  %2136 = vmatprep.mubr.msk.bf16.mxu1 %vm169_vm0, %v1010_v23  ;;  %v476_v47 = vpop.xlane.xlu1 %475  ;;  %v826_v16 = vmul.f32 %v2219_v4, %v2738_v59  ;;  %v859_v61 = vmul.f32 %v827_v62, %v2861_v43  ;;  %v929_v46 = vmul.f32 %v827_v62, %v2620_v7 }
 0x1c8   :  { %2226 = vrsqrt.f32 %v760_v54  ;;  %v759_v51 = vadd.f32 1e-05, %v727_v21  ;;  %v726_v20 = vsub.f32 %v662_v45, %v694_v8  ;;  %2137 = vmatmul.mubr.msk.bf16.gmra.mxu1 %vm169_vm0, %v1011_v40  ;;  %v825_v9 = vmul.f32 %v2221_v3, %v2738_v59 }
 0x1c9   :  { %v2223_v6 = vpop.eup %2222  ;;  %v473_v11 = vpop.xlane.xlu0 %472  ;;  %v858_v48 = vmul.f32 %v826_v16, %v2867_v56  ;;  %v897_v30 = vsub.f32 %v2754_v58, %v859_v61  ;;  %v928_v26 = vmul.f32 %v826_v16, %v2624_v10  ;;  %v2935_v37 = vmul.f32 0.03125, %v476_v47 }
 0x1ca   :  { %2228 = vrsqrt.f32 %v759_v51  ;;  %v758_v19 = vadd.f32 1e-05, %v726_v20  ;;  %v824_v50 = vmul.f32 %v2223_v6, %v2738_v59  ;;  %v857_v43 = vmul.f32 %v825_v9, %v2869_v41 }
 0x1cb   :  { %v470_v5 = vpop.xlane.xlu1 %469  ;;  %v896_v18 = vsub.f32 %v2754_v58, %v858_v48  ;;  %v927_v52 = vmul.f32 %v825_v9, %v2628_v12  ;;  %v961_v55 = vadd.f32 %v929_v46, %v897_v30  ;;  %v2943_v25 = vmul.f32 0.03125, %v473_v11 }
 0x1cc   :  { %2230 = vrsqrt.f32 %v758_v19  ;;  %v2929_v27 = vmul.f32 0.03125, %v470_v5  ;;  %v856_v56 = vmul.f32 %v824_v50, %v2875_v22  ;;  %v895_v44 = vsub.f32 %v2754_v58, %v857_v43 }
 0x1cd   :  { %v467_v29 = vpop.xlane.xlu0 %466  ;;  %v960_v63 = vadd.f32 %v928_v26, %v896_v18  ;;  %v926_v38 = vmul.f32 %v824_v50, %v2633_v15  ;;  %v701_v15 = vmul.f32 %v2935_v37, %v2935_v37  ;;  %v993_v2 = vmax.f32 %v961_v55, 0.0 }
 0x1ce   :  { %v2937_v41 = vmul.f32 0.03125, %v467_v29  ;;  %v894_v10 = vsub.f32 %v2754_v58, %v856_v56  ;;  %v959_v60 = vadd.f32 %v927_v52, %v895_v44  ;;  %v699_v7 = vmul.f32 %v2929_v27, %v2929_v27 }
 0x1cf   :  { %v631_v53 = vpop.xlane.xlu1 %630  ;;  %v992_v1 = vmax.f32 %v960_v63, 0.0  ;;  %v700_v3 = vmul.f32 %v2943_v25, %v2943_v25 }
 0x1d0   :  { %v667_v22 = vmul.f32 0.03125, %v631_v53  ;;  %v958_v12 = vadd.f32 %v926_v38, %v894_v10  ;;  %v698_v33 = vmul.f32 %v2937_v41, %v2937_v41  ;;  %v991_v8 = vmax.f32 %v959_v60, 0.0 }
 0x1d1   :  { %v628_v32 = vpop.xlane.xlu0 %627  ;;  %v1013_v61 = vpack.c.bf16 %v993_v2, %v992_v1 }
 0x1d2   :  { %v731_v17 = vsub.f32 %v667_v22, %v699_v7  ;;  %v666_v35 = vmul.f32 0.03125, %v628_v32  ;;  %v990_v4 = vmax.f32 %v958_v12, 0.0 }
 0x1d3   :  { %v2225_v57 = vpop.eup %2224  ;;  %v637_v62 = vpop.xlane.xlu1 %636 }
 0x1d4   :  { %v763_v23 = vadd.f32 1e-05, %v731_v17  ;;  %v730_v40 = vsub.f32 %v666_v35, %v698_v33  ;;  %v669_v54 = vmul.f32 0.03125, %v637_v62  ;;  %v831_v21 = vmul.f32 %v2225_v57, %v2738_v59 }
 0x1d5   :  { %v2227_v45 = vpop.eup %2226  ;;  %v634_v47 = vpop.xlane.xlu0 %633  ;;  %v1012_v16 = vpack.c.bf16 %v991_v8, %v990_v4 }
 0x1d6   :  { %2232 = vrsqrt.f32 %v763_v23  ;;  %v762_v51 = vadd.f32 1e-05, %v730_v40  ;;  %v733_v20 = vsub.f32 %v669_v54, %v701_v15  ;;  %v668_v6 = vmul.f32 0.03125, %v634_v47 }
 0x1d7   :  { %v2229_v11 = vpop.eup %2228  ;;  %2140 = vmatprep.mubr.msk.bf16.mxu1 %vm169_vm0, %v1012_v16  ;;  %v830_v9 = vmul.f32 %v2227_v45, %v2738_v59  ;;  %v863_v48 = vmul.f32 %v831_v21, %v2895_v24  ;;  %v3631_v16 = vld [vmem:[#allocation5_spill] sm:$0xff] }
 0x1d8   :  { %2234 = vrsqrt.f32 %v762_v51  ;;  %v765_v19 = vadd.f32 1e-05, %v733_v20  ;;  %v732_v30 = vsub.f32 %v668_v6, %v700_v3  ;;  %2141 = vmatmul.mubr.msk.bf16.gmra.mxu1 %vm169_vm0, %v1013_v61  ;;  %v829_v5 = vmul.f32 %v2229_v11, %v2738_v59 }
 0x1d9   :  { %v2231_v50 = vpop.eup %2230  ;;  %v862_v43 = vmul.f32 %v830_v9, %v2901_v28  ;;  %v901_v24 = vsub.f32 %v2754_v58, %v863_v48  ;;  %v932_v56 = vmul.f32 %v830_v9, %v2656_v39  ;;  %v933_v28 = vmul.f32 %v831_v21, %v2652_v36 }
 0x1da   :  { %2236 = vrsqrt.f32 %v765_v19  ;;  %v764_v18 = vadd.f32 1e-05, %v732_v30  ;;  %v828_v26 = vmul.f32 %v2231_v50, %v2738_v59  ;;  %v861_v46 = vmul.f32 %v829_v5, %v2903_v31 }
 0x1db   :  { %v900_v29 = vsub.f32 %v2754_v58, %v862_v43  ;;  %v931_v63 = vmul.f32 %v829_v5, %v2660_v42  ;;  %v965_v60 = vadd.f32 %v933_v28, %v901_v24 }
 0x1dc   :  { %2238 = vrsqrt.f32 %v764_v18  ;;  %v860_v44 = vmul.f32 %v828_v26, %v2909_v34  ;;  %v899_v52 = vsub.f32 %v2754_v58, %v861_v46  ;;  %v930_v31 = vmul.f32 %v828_v26, %v2665_v49 }
 0x1dd   :  { %v964_v53 = vadd.f32 %v932_v56, %v900_v29  ;;  %v997_v12 = vmax.f32 %v965_v60, 0.0 }
 0x1de   :  { %v898_v10 = vsub.f32 %v2754_v58, %v860_v44  ;;  %v963_v38 = vadd.f32 %v931_v63, %v899_v52 }
 0x1df   :  { %v996_v7 = vmax.f32 %v964_v53, 0.0 }
 0x1e0   :  { %v962_v55 = vadd.f32 %v930_v31, %v898_v10  ;;  %v995_v39 = vmax.f32 %v963_v38, 0.0 }
 0x1e1   :  { %v1015_v42 = vpack.c.bf16 %v997_v12, %v996_v7 }
 0x1e2   :  { %v994_v22 = vmax.f32 %v962_v55, 0.0 }
 0x1e3   :  { %v2233_v32 = vpop.eup %2232 }
 0x1e4   :  { %v1014_v34 = vpack.c.bf16 %v995_v39, %v994_v22  ;;  %v833_v1 = vmul.f32 %v2233_v32, %v2738_v59 }
 0x1e5   :  { %v2235_v33 = vpop.eup %2234 }
 0x1e6   :  { %2144 = vmatprep.mubr.msk.bf16.mxu1 %vm169_vm0, %v1014_v34  ;;  %v832_v36 = vmul.f32 %v2235_v33, %v2738_v59  ;;  %v865_v17 = vmul.f32 %v833_v1, %v2929_v27  ;;  %v935_v15 = vmul.f32 %v833_v1, %v2694_v13 }
 0x1e7   :  { %v2237_v49 = vpop.eup %2236  ;;  %2145 = vmatmul.mubr.msk.bf16.gmra.mxu1 %vm169_vm0, %v1015_v42 }
 0x1e8   :  { %v864_v35 = vmul.f32 %v832_v36, %v2937_v41  ;;  %v903_v57 = vsub.f32 %v2754_v58, %v865_v17  ;;  %v835_v62 = vmul.f32 %v2237_v49, %v2738_v59  ;;  %v934_v8 = vmul.f32 %v832_v36, %v2697_v14 }
 0x1e9   :  { %v2239_v4 = vpop.eup %2238 }
 0x1ea   :  { %v902_v2 = vsub.f32 %v2754_v58, %v864_v35  ;;  %v967_v23 = vadd.f32 %v935_v15, %v903_v57  ;;  %v834_v40 = vmul.f32 %v2239_v4, %v2738_v59  ;;  %v867_v27 = vmul.f32 %v835_v62, %v2935_v37 }
 0x1eb   :  { %v937_v45 = vmul.f32 %v835_v62, %v2681_v0  ;;  %v2992_v0 = vld [vmem:[%s3618_s6] ss:$0 sm:$0xff] }
 0x1ec   :  { %v966_v54 = vadd.f32 %v934_v8, %v902_v2  ;;  %v866_v21 = vmul.f32 %v834_v40, %v2943_v25  ;;  %v905_v41 = vsub.f32 %v2754_v58, %v867_v27  ;;  %v999_v13 = vmax.f32 %v967_v23, 0.0 }
 0x1ed   :  { %v936_v14 = vmul.f32 %v834_v40, %v3631_v16 }
 0x1ee   :  { %v998_v3 = vmax.f32 %v966_v54, 0.0  ;;  %v904_v47 = vsub.f32 %v2754_v58, %v866_v21  ;;  %v969_v61 = vadd.f32 %v937_v45, %v905_v41 }
 0x1f0   :  { %v1016_v51 = vpack.c.bf16 %v999_v13, %v998_v3  ;;  %v968_v20 = vadd.f32 %v936_v14, %v904_v47  ;;  %v1001_v37 = vmax.f32 %v969_v61, 0.0 }
 0x1f2   :  { %2148 = vmatprep.mubr.msk.bf16.mxu1 %vm169_vm0, %v1016_v51  ;;  %v1000_v59 = vmax.f32 %v968_v20, 0.0 }
 0x1f4   :  { %v1017_v6 = vpack.c.bf16 %v1001_v37, %v1000_v59 }
 0x1f6   :  { %2149 = vmatmul.mubr.msk.bf16.gmra.mxu1 %vm169_vm0, %v1017_v6 }
 0x24a   :  { %v2122_v25 = vpop.f32.mrf.mxu1 }
 0x24b   :  { %v2995_v58 = vadd.f32 %v2122_v25, %v2992_v0 }
 0x24c   :  { %v1123_v11 = vpop.f32.mrf.mxu1 }
 0x24d   :  { %v2998_v9 = vadd.f32 %v2992_v0, %v1123_v11  ;;  %v1259_v48 = vsel %vm1252_vm1, %v2995_v58, 0.0 }
 0x24e   :  { %1260 = vadd.xlane.f32.xlu0 %v1259_v48  ;;  %v2123_v19 = vpop.f32.mrf.mxu1 }
 0x24f   :  { %v3003_v30 = vadd.f32 %v2123_v19, %v2992_v0  ;;  %v1253_v18 = vsel %vm1252_vm1, %v2998_v9, 0.0 }
 0x250   :  { %v1126_v5 = vpop.f32.mrf.mxu1 }
 0x251   :  { %v3006_v50 = vadd.f32 %v2992_v0, %v1126_v5  ;;  %v1262_v43 = vsel %vm1252_vm1, %v3003_v30, 0.0 }
 0x252   :  { %1263 = vadd.xlane.f32.xlu1 %v1262_v43  ;;  %1254 = vadd.xlane.f32.xlu0 %v1253_v18 }
 0x253   :  { %v1256_v26 = vsel %vm1252_vm1, %v3006_v50, 0.0 }
 0x256   :  { %1257 = vadd.xlane.f32.xlu1 %v1256_v26 }
 0x258   :  { %v2126_v46 = vpop.f32.mrf.mxu1 }
 0x259   :  { %v3015_v29 = vadd.f32 %v2126_v46, %v2992_v0 }
 0x25a   :  { %v1139_v24 = vpop.f32.mrf.mxu1 }
 0x25b   :  { %v3018_v56 = vadd.f32 %v2992_v0, %v1139_v24  ;;  %v1271_v44 = vsel %vm1252_vm1, %v3015_v29, 0.0 }
 0x25c   :  { %1272 = vadd.xlane.f32.xlu0 %v1271_v44  ;;  %v2127_v52 = vpop.f32.mrf.mxu1 }
 0x25d   :  { %v3023_v63 = vadd.f32 %v2127_v52, %v2992_v0  ;;  %v1265_v31 = vsel %vm1252_vm1, %v3018_v56, 0.0 }
 0x25e   :  { %v1142_v28 = vpop.f32.mrf.mxu1 }
 0x25f   :  { %v3026_v53 = vadd.f32 %v2992_v0, %v1142_v28  ;;  %v1274_v10 = vsel %vm1252_vm1, %v3023_v63, 0.0 }
 0x260   :  { %1275 = vadd.xlane.f32.xlu1 %v1274_v10  ;;  %1266 = vadd.xlane.f32.xlu0 %v1265_v31 }
 0x261   :  { %v1268_v38 = vsel %vm1252_vm1, %v3026_v53, 0.0 }
 0x264   :  { %1269 = vadd.xlane.f32.xlu1 %v1268_v38 }
 0x268   :  { %v3034_v60 = vpop.f32.mrf.mxu1 }
 0x26a   :  { %v3036_v55 = vpop.f32.mrf.mxu1 }
 0x26c   :  { %v3038_v7 = vpop.f32.mrf.mxu1 }
 0x26e   :  { %v3040_v22 = vpop.f32.mrf.mxu1 }
 0x278   :  { %v3042_v39 = vpop.f32.mrf.mxu1 }
 0x27a   :  { %v3044_v32 = vpop.f32.mrf.mxu1 }
 0x27c   :  { %v3046_v12 = vpop.f32.mrf.mxu1 }
 0x27e   :  { %v3048_v34 = vpop.f32.mrf.mxu1 }
 0x288   :  { %v2138_v1 = vpop.f32.mrf.mxu1 }
 0x289   :  { %v3051_v33 = vadd.f32 %v2138_v1, %v2992_v0 }
 0x28a   :  { %v1187_v42 = vpop.f32.mrf.mxu1 }
 0x28b   :  { %v3054_v36 = vadd.f32 %v2992_v0, %v1187_v42  ;;  %v1307_v17 = vsel %vm1252_vm1, %v3051_v33, 0.0  ;;  %v1400_v8 = vmul.f32 %v3051_v33, %v3051_v33 }
 0x28c   :  { %1308 = vadd.xlane.f32.xlu0 %v1307_v17  ;;  %v2139_v49 = vpop.f32.mrf.mxu1 }
 0x28d   :  { %v3059_v35 = vadd.f32 %v2139_v49, %v2992_v0  ;;  %v1301_v4 = vsel %vm1252_vm1, %v3054_v36, 0.0  ;;  %v1468_v23 = vsel %vm1252_vm1, %v1400_v8, 0.0  ;;  %v1398_v27 = vmul.f32 %v3054_v36, %v3054_v36 }
 0x28e   :  { %v1190_v57 = vpop.f32.mrf.mxu1 }
 0x28f   :  { %v3062_v15 = vadd.f32 %v2992_v0, %v1190_v57  ;;  %v1310_v62 = vsel %vm1252_vm1, %v3059_v35, 0.0  ;;  %v1401_v40 = vmul.f32 %v3059_v35, %v3059_v35  ;;  %v1462_v21 = vsel %vm1252_vm1, %v1398_v27, 0.0 }
 0x290   :  { %1311 = vadd.xlane.f32.xlu1 %v1310_v62  ;;  %1302 = vadd.xlane.f32.xlu0 %v1301_v4 }
 0x291   :  { %v1304_v2 = vsel %vm1252_vm1, %v3062_v15, 0.0  ;;  %v1471_v54 = vsel %vm1252_vm1, %v1401_v40, 0.0  ;;  %v1399_v41 = vmul.f32 %v3062_v15, %v3062_v15 }
 0x293   :  { %v1465_v16 = vsel %vm1252_vm1, %v1399_v41, 0.0 }
 0x294   :  { %1305 = vadd.xlane.f32.xlu1 %v1304_v2  ;;  %1469 = vadd.xlane.f32.xlu0 %v1468_v23 }
 0x298   :  { %1472 = vadd.xlane.f32.xlu1 %v1471_v54  ;;  %1463 = vadd.xlane.f32.xlu0 %v1462_v21  ;;  %v2142_v45 = vpop.f32.mrf.mxu1 }
 0x299   :  { %v3082_v13 = vadd.f32 %v2142_v45, %v2992_v0 }
 0x29a   :  { %v1203_v3 = vpop.f32.mrf.mxu1 }
 0x29b   :  { %v3085_v47 = vadd.f32 %v2992_v0, %v1203_v3  ;;  %v1319_v14 = vsel %vm1252_vm1, %v3082_v13, 0.0  ;;  %v1404_v25 = vmul.f32 %v3082_v13, %v3082_v13 }
 0x29c   :  { %1466 = vadd.xlane.f32.xlu1 %v1465_v16  ;;  %1320 = vadd.xlane.f32.xlu0 %v1319_v14  ;;  %v2143_v61 = vpop.f32.mrf.mxu1 }
 0x29d   :  { %v3091_v51 = vadd.f32 %v2143_v61, %v2992_v0  ;;  %v1313_v6 = vsel %vm1252_vm1, %v3085_v47, 0.0  ;;  %v1480_v48 = vsel %vm1252_vm1, %v1404_v25, 0.0  ;;  %v1402_v5 = vmul.f32 %v3085_v47, %v3085_v47 }
 0x29e   :  { %v1206_v20 = vpop.f32.mrf.mxu1 }
 0x29f   :  { %v3094_v59 = vadd.f32 %v2992_v0, %v1206_v20  ;;  %v1322_v37 = vsel %vm1252_vm1, %v3091_v51, 0.0  ;;  %v1405_v19 = vmul.f32 %v3091_v51, %v3091_v51  ;;  %v1474_v18 = vsel %vm1252_vm1, %v1402_v5, 0.0 }
 0x2a0   :  { %1323 = vadd.xlane.f32.xlu1 %v1322_v37  ;;  %1314 = vadd.xlane.f32.xlu0 %v1313_v6  ;;  %v3161_v37 = vadd.f32 %v2992_v0, %v3040_v22  ;;  %v3178_v5 = vadd.f32 %v2992_v0, %v3036_v55 }
 0x2a1   :  { %v1316_v11 = vsel %vm1252_vm1, %v3094_v59, 0.0  ;;  %v1483_v43 = vsel %vm1252_vm1, %v1405_v19, 0.0  ;;  %v1403_v46 = vmul.f32 %v3094_v59, %v3094_v59 }
 0x2a2   :  { %3632 = vst [vmem:[#allocation5_spill] sm:$0xff] %v3161_v37  ;;  %3634 = vst [vmem:[#allocation7_spill] sm:$0xff] %v3178_v5 }
 0x2a3   :  { %v1477_v10 = vsel %vm1252_vm1, %v1403_v46, 0.0  ;;  %v3193_v46 = vadd.f32 %v3046_v12, %v2992_v0 }
 0x2a4   :  { %1317 = vadd.xlane.f32.xlu1 %v1316_v11  ;;  %1481 = vadd.xlane.f32.xlu0 %v1480_v48  ;;  %v3169_v11 = vadd.f32 %v3038_v7, %v2992_v0  ;;  %v1280_v48 = vsel %vm1252_vm1, %v3161_v37, 0.0 }
 0x2a5   :  { %3636 = vst [vmem:[#allocation9_spill] sm:$0xff] %v3193_v46  ;;  %v1298_v12 = vsel %vm1252_vm1, %v3193_v46, 0.0 }
 0x2a6   :  { %3633 = vst [vmem:[#allocation6_spill] sm:$0xff] %v3169_v11  ;;  %v1286_v7 = vsel %vm1252_vm1, %v3169_v11, 0.0 }
 0x2a7   :  { %v2146_v26 = vpop.f32.mrf.mxu1 }
 0x2a8   :  { %1484 = vadd.xlane.f32.xlu1 %v1483_v43  ;;  %1475 = vadd.xlane.f32.xlu0 %v1474_v18  ;;  %v3114_v24 = vadd.f32 %v2146_v26, %v2992_v0  ;;  %v3182_v43 = vadd.f32 %v2992_v0, %v3048_v34  ;;  %v3189_v26 = vadd.f32 %v3034_v60, %v2992_v0  ;;  %v1277_v34 = vsel %vm1252_vm1, %v3178_v5, 0.0 }
 0x2a9   :  { %v1219_v44 = vpop.f32.mrf.mxu1 }
 0x2aa   :  { %v1331_v52 = vsel %vm1252_vm1, %v3114_v24, 0.0  ;;  %v3119_v28 = vadd.f32 %v2992_v0, %v1219_v44  ;;  %v1408_v57 = vmul.f32 %v3114_v24, %v3114_v24  ;;  %3635 = vst [vmem:[#allocation8_spill] sm:$0xff] %v3182_v43  ;;  %v1292_v55 = vsel %vm1252_vm1, %v3182_v43, 0.0 }
 0x2ab   :  { %v2147_v31 = vpop.f32.mrf.mxu1 }
 0x2ac   :  { %1478 = vadd.xlane.f32.xlu1 %v1477_v10  ;;  %1332 = vadd.xlane.f32.xlu0 %v1331_v52  ;;  %v3123_v38 = vadd.f32 %v2147_v31, %v2992_v0  ;;  %v1325_v49 = vsel %vm1252_vm1, %v3119_v28, 0.0  ;;  %v1492_v4 = vsel %vm1252_vm1, %v1408_v57, 0.0  ;;  %v1406_v2 = vmul.f32 %v3119_v28, %v3119_v28 }
 0x2ad   :  { %v1222_v1 = vpop.f32.mrf.mxu1  ;;  %v3201_v52 = vadd.f32 %v2992_v0, %v3044_v32  ;;  %v1283_v10 = vsel %vm1252_vm1, %v3189_v26, 0.0  ;;  %v3212_v31 = vadd.f32 %v3042_v39, %v2992_v0  ;;  %v1382_v39 = vmul.f32 %v2998_v9, %v2998_v9 }
 0x2ae   :  { %v1334_v42 = vsel %vm1252_vm1, %v3123_v38, 0.0  ;;  %v3128_v17 = vadd.f32 %v2992_v0, %v1222_v1  ;;  %v1409_v8 = vmul.f32 %v3123_v38, %v3123_v38  ;;  %v1486_v54 = vsel %vm1252_vm1, %v1406_v2, 0.0 }
 0x2af   :  { %3637 = vst [vmem:[#allocation10_spill] sm:$0xff] %v3201_v52  ;;  %3638 = vst [vmem:[#allocation11_spill] sm:$0xff] %v3212_v31  ;;  %v1289_v32 = vsel %vm1252_vm1, %v3201_v52, 0.0  ;;  %v1295_v57 = vsel %vm1252_vm1, %v3212_v31, 0.0  ;;  %v1384_v2 = vmul.f32 %v2995_v58, %v2995_v58 }
 0x2b0   :  { %1335 = vadd.xlane.f32.xlu1 %v1334_v42  ;;  %1326 = vadd.xlane.f32.xlu0 %v1325_v49  ;;  %v1328_v62 = vsel %vm1252_vm1, %v3128_v17, 0.0  ;;  %v1495_v27 = vsel %vm1252_vm1, %v1409_v8, 0.0  ;;  %v1407_v21 = vmul.f32 %v3128_v17, %v3128_v17  ;;  %v1383_v8 = vmul.f32 %v3006_v50, %v3006_v50 }
 0x2b2   :  { %v1489_v61 = vsel %vm1252_vm1, %v1407_v21, 0.0  ;;  %v1386_v21 = vmul.f32 %v3018_v56, %v3018_v56 }
 0x2b4   :  { %1329 = vadd.xlane.f32.xlu1 %v1328_v62  ;;  %1493 = vadd.xlane.f32.xlu0 %v1492_v4  ;;  %v1414_v4 = vsel %vm1252_vm1, %v1382_v39, 0.0 }
 0x2b6   :  { %v2150_v23 = vpop.f32.mrf.mxu1 }
 0x2b7   :  { %v3142_v40 = vadd.f32 %v2150_v23, %v2992_v0  ;;  %v1417_v23 = vsel %vm1252_vm1, %v1383_v8, 0.0 }
 0x2b8   :  { %1496 = vadd.xlane.f32.xlu1 %v1495_v27  ;;  %1487 = vadd.xlane.f32.xlu0 %v1486_v54  ;;  %v1235_v41 = vpop.f32.mrf.mxu1  ;;  %v1420_v27 = vsel %vm1252_vm1, %v1384_v2, 0.0  ;;  %v1385_v54 = vmul.f32 %v3003_v30, %v3003_v30 }
 0x2b9   :  { %v1343_v45 = vsel %vm1252_vm1, %v3142_v40, 0.0  ;;  %v3151_v16 = vadd.f32 %v2992_v0, %v1235_v41  ;;  %v1412_v25 = vmul.f32 %v3142_v40, %v3142_v40 }
 0x2ba   :  { %v2151_v3 = vpop.f32.mrf.mxu1  ;;  %v1423_v41 = vsel %vm1252_vm1, %v1385_v54, 0.0 }
 0x2bb   :  { %v3154_v14 = vadd.f32 %v2151_v3, %v2992_v0  ;;  %v1337_v6 = vsel %vm1252_vm1, %v3151_v16, 0.0  ;;  %v1504_v19 = vsel %vm1252_vm1, %v1412_v25, 0.0  ;;  %v1410_v22 = vmul.f32 %v3151_v16, %v3151_v16 }
 0x2bc   :  { %1490 = vadd.xlane.f32.xlu1 %v1489_v61  ;;  %1344 = vadd.xlane.f32.xlu0 %v1343_v45  ;;  %v1238_v44 = vpop.f32.mrf.mxu1  ;;  %v1426_v45 = vsel %vm1252_vm1, %v1386_v21, 0.0  ;;  %v1387_v3 = vmul.f32 %v3026_v53, %v3026_v53  ;;  %v1388_v61 = vmul.f32 %v3015_v29, %v3015_v29  ;;  %v1389_v25 = vmul.f32 %v3023_v63, %v3023_v63 }
 0x2bd   :  { %v1346_v20 = vsel %vm1252_vm1, %v3154_v14, 0.0  ;;  %v1498_v18 = vsel %vm1252_vm1, %v1410_v22, 0.0  ;;  %v3204_v60 = vadd.f32 %v2992_v0, %v1238_v44  ;;  %v1413_v42 = vmul.f32 %v3154_v14, %v3154_v14 }
 0x2be   :  { %v1393_v44 = vmul.f32 %v3169_v11, %v3169_v11 }
 0x2bf   :  { %v1340_v1 = vsel %vm1252_vm1, %v3204_v60, 0.0  ;;  %v1507_v49 = vsel %vm1252_vm1, %v1413_v42, 0.0  ;;  %v1411_v0 = vmul.f32 %v3204_v60, %v3204_v60  ;;  %v1396_v42 = vmul.f32 %v3212_v31, %v3212_v31 }
 0x2c0   :  { %1347 = vadd.xlane.f32.xlu1 %v1346_v20  ;;  %1338 = vadd.xlane.f32.xlu0 %v1337_v6  ;;  %v1429_v20 = vsel %vm1252_vm1, %v1387_v3, 0.0  ;;  %v1432_v6 = vsel %vm1252_vm1, %v1388_v61, 0.0 }
 0x2c1   :  { %v1501_v62 = vsel %vm1252_vm1, %v1411_v0, 0.0  ;;  %v1397_v0 = vmul.f32 %v3193_v46, %v3193_v46 }
 0x2c3   :  { %v1459_v39 = vsel %vm1252_vm1, %v1397_v0, 0.0 }
 0x2c4   :  { %1281 = vadd.xlane.f32.xlu1 %v1280_v48  ;;  %1505 = vadd.xlane.f32.xlu0 %v1504_v19  ;;  %v1390_v48 = vmul.f32 %v3178_v5, %v3178_v5  ;;  %v1435_v19 = vsel %vm1252_vm1, %v1389_v25, 0.0 }
 0x2c6   :  { %v1438_v22 = vsel %vm1252_vm1, %v1390_v48, 0.0 }
 0x2c8   :  { %1287 = vadd.xlane.f32.xlu1 %v1286_v7  ;;  %1499 = vadd.xlane.f32.xlu0 %v1498_v18  ;;  %v1391_v7 = vmul.f32 %v3161_v37, %v3161_v37  ;;  %v1392_v18 = vmul.f32 %v3189_v26, %v3189_v26 }
 0x2cc   :  { %1293 = vadd.xlane.f32.xlu1 %v1292_v55  ;;  %1278 = vadd.xlane.f32.xlu0 %v1277_v34  ;;  %v1441_v55 = vsel %vm1252_vm1, %v1391_v7, 0.0  ;;  %v1444_v34 = vsel %vm1252_vm1, %v1392_v18, 0.0 }
 0x2d0   :  { %1299 = vadd.xlane.f32.xlu1 %v1298_v12  ;;  %1284 = vadd.xlane.f32.xlu0 %v1283_v10  ;;  %v1394_v12 = vmul.f32 %v3201_v52, %v3201_v52  ;;  %v1447_v10 = vsel %vm1252_vm1, %v1393_v44, 0.0 }
 0x2d4   :  { %1341 = vadd.xlane.f32.xlu1 %v1340_v1  ;;  %1290 = vadd.xlane.f32.xlu0 %v1289_v32  ;;  %v1450_v1 = vsel %vm1252_vm1, %v1394_v12, 0.0  ;;  %v1395_v32 = vmul.f32 %v3182_v43, %v3182_v43 }
 0x2d8   :  { %1508 = vadd.xlane.f32.xlu1 %v1507_v49  ;;  %1296 = vadd.xlane.f32.xlu0 %v1295_v57  ;;  %v1453_v49 = vsel %vm1252_vm1, %v1395_v32, 0.0  ;;  %v1456_v57 = vsel %vm1252_vm1, %v1396_v42, 0.0 }
 0x2dc   :  { %1502 = vadd.xlane.f32.xlu1 %v1501_v62  ;;  %1415 = vadd.xlane.f32.xlu0 %v1414_v4  ;;  %v3274_v62 = vpop.xlane.xlu0 %1260  ;;  %v3276_v4 = vpop.xlane.xlu1 %1263 }
 0x2e0   :  { %1418 = vadd.xlane.f32.xlu1 %v1417_v23  ;;  %1421 = vadd.xlane.f32.xlu0 %v1420_v27  ;;  %v3278_v8 = vpop.xlane.xlu0 %1254  ;;  %v3280_v2 = vpop.xlane.xlu1 %1257 }
 0x2e4   :  { %1424 = vadd.xlane.f32.xlu1 %v1423_v41  ;;  %1427 = vadd.xlane.f32.xlu0 %v1426_v45 }
 0x2e5   :  { %v3282_v23 = vpop.xlane.xlu0 %1272 }
 0x2e8   :  { %1430 = vadd.xlane.f32.xlu1 %v1429_v20  ;;  %1433 = vadd.xlane.f32.xlu0 %v1432_v6 }
 0x2e9   :  { %v3284_v27 = vpop.xlane.xlu1 %1275  ;;  %v3286_v54 = vpop.xlane.xlu0 %1266 }
 0x2ec   :  { %1436 = vadd.xlane.f32.xlu1 %v1435_v19  ;;  %1439 = vadd.xlane.f32.xlu0 %v1438_v22 }
 0x2ed   :  { %v3288_v21 = vpop.xlane.xlu1 %1269 }
 0x2f0   :  { %1442 = vadd.xlane.f32.xlu1 %v1441_v55  ;;  %1445 = vadd.xlane.f32.xlu0 %v1444_v34 }
 0x2f4   :  { %1448 = vadd.xlane.f32.xlu1 %v1447_v10  ;;  %1451 = vadd.xlane.f32.xlu0 %v1450_v1 }
 0x2f8   :  { %1454 = vadd.xlane.f32.xlu1 %v1453_v49  ;;  %1457 = vadd.xlane.f32.xlu0 %v1456_v57 }
 0x2fc   :  { %1460 = vadd.xlane.f32.xlu1 %v1459_v39 }
 0x315   :  { %v1309_v41 = vpop.xlane.xlu0 %1308 }
 0x316   :  { %v1368_v61 = vmul.f32 0.015625, %v1309_v41 }
 0x318   :  { %v1560_v19 = vmul.f32 %v1368_v61, %v1368_v61 }
 0x319   :  { %v1312_v45 = vpop.xlane.xlu1 %1311  ;;  %v1303_v3 = vpop.xlane.xlu0 %1302 }
 0x31a   :  { %v3290_v20 = vmul.f32 0.015625, %v1312_v45  ;;  %v3292_v6 = vmul.f32 0.015625, %v1303_v3 }
 0x31c   :  { %v1561_v18 = vmul.f32 %v3290_v20, %v3290_v20  ;;  %v1558_v55 = vmul.f32 %v3292_v6, %v3292_v6 }
 0x31d   :  { %v1306_v25 = vpop.xlane.xlu1 %1305  ;;  %v1470_v48 = vpop.xlane.xlu0 %1469 }
 0x31e   :  { %v1528_v22 = vmul.f32 0.015625, %v1470_v48  ;;  %v3298_v12 = vmul.f32 0.015625, %v1306_v25 }
 0x320   :  { %v1592_v7 = vsub.f32 %v1528_v22, %v1560_v19  ;;  %v1559_v39 = vmul.f32 %v3298_v12, %v3298_v12 }
 0x321   :  { %v1473_v34 = vpop.xlane.xlu1 %1472  ;;  %v1464_v44 = vpop.xlane.xlu0 %1463 }
 0x322   :  { %v1624_v10 = vadd.f32 1e-05, %v1592_v7  ;;  %v1529_v1 = vmul.f32 0.015625, %v1473_v34  ;;  %v1526_v32 = vmul.f32 0.015625, %v1464_v44 }
 0x324   :  { %2240 = vrsqrt.f32 %v1624_v10  ;;  %v1593_v42 = vsub.f32 %v1529_v1, %v1561_v18  ;;  %v1590_v49 = vsub.f32 %v1526_v32, %v1558_v55  ;;  %v3313_v32 = vld [vmem:[%s3619_s7] ss:$0 sm:$0xff] }
 0x325   :  { %v1467_v57 = vpop.xlane.xlu1 %1466  ;;  %v1321_v0 = vpop.xlane.xlu0 %1320 }
 0x326   :  { %v1625_v41 = vadd.f32 1e-05, %v1593_v42  ;;  %v1622_v45 = vadd.f32 1e-05, %v1590_v49  ;;  %v1527_v3 = vmul.f32 0.015625, %v1467_v57  ;;  %v3302_v7 = vmul.f32 0.015625, %v1321_v0 }
 0x328   :  { %2242 = vrsqrt.f32 %v1625_v41  ;;  %v1591_v48 = vsub.f32 %v1527_v3, %v1559_v39  ;;  %v1564_v10 = vmul.f32 %v3302_v7, %v3302_v7 }
 0x329   :  { %2244 = vrsqrt.f32 %v1622_v45  ;;  %v1324_v19 = vpop.xlane.xlu1 %1323  ;;  %v1315_v25 = vpop.xlane.xlu0 %1314 }
 0x32a   :  { %v1623_v22 = vadd.f32 1e-05, %v1591_v48  ;;  %v3304_v34 = vmul.f32 0.015625, %v1324_v19  ;;  %v3306_v18 = vmul.f32 0.015625, %v1315_v25 }
 0x32c   :  { %2246 = vrsqrt.f32 %v1623_v22  ;;  %v1565_v57 = vmul.f32 %v3304_v34, %v3304_v34  ;;  %v1562_v0 = vmul.f32 %v3306_v18, %v3306_v18 }
 0x32d   :  { %v1318_v55 = vpop.xlane.xlu1 %1317  ;;  %v1482_v44 = vpop.xlane.xlu0 %1481 }
 0x32e   :  { %v1532_v1 = vmul.f32 0.015625, %v1482_v44  ;;  %v3319_v39 = vmul.f32 0.015625, %v1318_v55 }
 0x330   :  { %v1596_v42 = vsub.f32 %v1532_v1, %v1564_v10  ;;  %v3325_v10 = vld [vmem:[%s3620_s8] ss:$0 sm:$0xff]  ;;  %s2326_s8 = smov 64  }
 0x331   :  { %v2241_v49 = vpop.eup %2240  ;;  %v1485_v41 = vpop.xlane.xlu1 %1484 }
 0x332   :  { %v1476_v45 = vpop.xlane.xlu0 %1475  ;;  %v1628_v3 = vadd.f32 1e-05, %v1596_v42  ;;  %v1533_v48 = vmul.f32 0.015625, %v1485_v41  ;;  %v1694_v25 = vmul.f32 %v2241_v49, %v3313_v32  ;;  %v1563_v42 = vmul.f32 %v3319_v39, %v3319_v39 }
 0x333   :  { %v1530_v19 = vmul.f32 0.015625, %v1476_v45 }
 0x334   :  { %2248 = vrsqrt.f32 %v1628_v3  ;;  %v1597_v22 = vsub.f32 %v1533_v48, %v1565_v57  ;;  %v1726_v1 = vmul.f32 %v1694_v25, %v1368_v61  ;;  %v1796_v57 = vmul.f32 %v1694_v25, %v3051_v33 }
 0x335   :  { %v1594_v44 = vsub.f32 %v1530_v19, %v1562_v0  ;;  %v2243_v46 = vpop.eup %2242  ;;  %v1479_v43 = vpop.xlane.xlu1 %1478 }
 0x336   :  { %v1333_v55 = vpop.xlane.xlu0 %1332  ;;  %v2245_v31 = vpop.eup %2244  ;;  %v1629_v41 = vadd.f32 1e-05, %v1597_v22  ;;  %v1531_v52 = vmul.f32 0.015625, %v1479_v43  ;;  %v1764_v49 = vsub.f32 %v3325_v10, %v1726_v1  ;;  %v1695_v0 = vmul.f32 %v2243_v46, %v3313_v32 }
 0x337   :  { %v1626_v45 = vadd.f32 1e-05, %v1594_v44  ;;  %v1692_v3 = vmul.f32 %v2245_v31, %v3313_v32  ;;  %v3334_v44 = vmul.f32 0.015625, %v1333_v55 }
 0x338   :  { %2250 = vrsqrt.f32 %v1629_v41  ;;  %v1595_v61 = vsub.f32 %v1531_v52, %v1563_v42  ;;  %v1828_v5 = vadd.f32 %v1796_v57, %v1764_v49  ;;  %v1727_v11 = vmul.f32 %v1695_v0, %v3290_v20 }
 0x339   :  { %v2247_v48 = vpop.eup %2246  ;;  %2252 = vrsqrt.f32 %v1626_v45  ;;  %v1336_v19 = vpop.xlane.xlu1 %1335  ;;  %v1724_v43 = vmul.f32 %v1692_v3, %v3292_v6  ;;  %v1797_v46 = vmul.f32 %v1695_v0, %v3059_v35  ;;  %v1794_v25 = vmul.f32 %v1692_v3, %v3054_v36 }
 0x33a   :  { %v1327_v37 = vpop.xlane.xlu0 %1326  ;;  %v1627_v22 = vadd.f32 1e-05, %v1595_v61  ;;  %v1860_v1 = vmax.f32 %v1828_v5, 0.0  ;;  %v1765_v33 = vsub.f32 %v3325_v10, %v1727_v11  ;;  %v1693_v31 = vmul.f32 %v2247_v48, %v3313_v32 }
 0x33b   :  { %v1762_v52 = vsub.f32 %v3325_v10, %v1724_v43  ;;  %v3342_v42 = vmul.f32 0.015625, %v1336_v19  ;;  %v3344_v20 = vmul.f32 0.015625, %v1327_v37  ;;  %v1568_v35 = vmul.f32 %v3334_v44, %v3334_v44 }
 0x33c   :  { %2254 = vrsqrt.f32 %v1627_v22  ;;  %1894 = vrot.lane.b32.xlu1 %v1860_v1, %s2326_s8  ;;  %v1829_v55 = vadd.f32 %v1797_v46, %v1765_v33  ;;  %v1725_v11 = vmul.f32 %v1693_v31, %v3298_v12  ;;  %v1795_v57 = vmul.f32 %v1693_v31, %v3062_v15 }
 0x33d   :  { %v1330_v6 = vpop.xlane.xlu1 %1329  ;;  %v1826_v45 = vadd.f32 %v1794_v25, %v1762_v52  ;;  %v1569_v61 = vmul.f32 %v3342_v42, %v3342_v42  ;;  %v1566_v48 = vmul.f32 %v3344_v20, %v3344_v20 }
 0x33e   :  { %v1494_v5 = vpop.xlane.xlu0 %1493  ;;  %v1861_v49 = vmax.f32 %v1829_v55, 0.0  ;;  %v1763_v36 = vsub.f32 %v3325_v10, %v1725_v11  ;;  %v3356_v12 = vmul.f32 0.015625, %v1330_v6 }
 0x33f   :  { %v1536_v41 = vmul.f32 0.015625, %v1494_v5  ;;  %v1858_v0 = vmax.f32 %v1826_v45, 0.0 }
 0x340   :  { %1896 = vrot.lane.b32.xlu1 %v1861_v49, %s2326_s8  ;;  %v1827_v43 = vadd.f32 %v1795_v57, %v1763_v36 }
 0x341   :  { %v1600_v37 = vsub.f32 %v1536_v41, %v1568_v35  ;;  %v2249_v3 = vpop.eup %2248  ;;  %v1497_v19 = vpop.xlane.xlu1 %1496  ;;  %1890 = vrot.lane.b32.xlu0 %v1858_v0, %s2326_s8  ;;  %v1567_v41 = vmul.f32 %v3356_v12, %v3356_v12 }
 0x342   :  { %v1488_v22 = vpop.xlane.xlu0 %1487  ;;  %v1537_v15 = vmul.f32 0.015625, %v1497_v19  ;;  %v1698_v46 = vmul.f32 %v2249_v3, %v3313_v32  ;;  %v1859_v31 = vmax.f32 %v1827_v43, 0.0 }
 0x343   :  { %v1632_v1 = vadd.f32 1e-05, %v1600_v37  ;;  %v1534_v33 = vmul.f32 0.015625, %v1488_v22 }
 0x344   :  { %v1601_v52 = vsub.f32 %v1537_v15, %v1569_v61  ;;  %v1730_v5 = vmul.f32 %v1698_v46, %v3302_v7  ;;  %1892 = vrot.lane.b32.xlu1 %v1859_v31, %s2326_s8  ;;  %v1800_v37 = vmul.f32 %v1698_v46, %v3082_v13 }
 0x345   :  { %2256 = vrsqrt.f32 %v1632_v1  ;;  %v1598_v25 = vsub.f32 %v1534_v33, %v1566_v48  ;;  %v2251_v6 = vpop.eup %2250  ;;  %v1491_v55 = vpop.xlane.xlu1 %1490 }
 0x346   :  { %v1345_v11 = vpop.xlane.xlu0 %1344  ;;  %v2253_v35 = vpop.eup %2252  ;;  %v1633_v45 = vadd.f32 1e-05, %v1601_v52  ;;  %v1535_v36 = vmul.f32 0.015625, %v1491_v55  ;;  %v1768_v57 = vsub.f32 %v3325_v10, %v1730_v5  ;;  %v1699_v0 = vmul.f32 %v2251_v6, %v3313_v32 }
 0x347   :  { %v1630_v49 = vadd.f32 1e-05, %v1598_v25  ;;  %v1696_v7 = vmul.f32 %v2253_v35, %v3313_v32  ;;  %v3372_v15 = vmul.f32 0.015625, %v1345_v11 }
 0x348   :  { %2258 = vrsqrt.f32 %v1633_v45  ;;  %v1599_v3 = vsub.f32 %v1535_v36, %v1567_v41  ;;  %v1832_v22 = vadd.f32 %v1800_v37, %v1768_v57  ;;  %v1731_v43 = vmul.f32 %v1699_v0, %v3304_v34 }
 0x349   :  { %v2255_v61 = vpop.eup %2254  ;;  %2260 = vrsqrt.f32 %v1630_v49  ;;  %v3369_v48 = vpop.xlane.xlu1 %1347  ;;  %v1728_v33 = vmul.f32 %v1696_v7, %v3306_v18  ;;  %v1801_v31 = vmul.f32 %v1699_v0, %v3091_v51  ;;  %v1798_v5 = vmul.f32 %v1696_v7, %v3085_v47 }
 0x34a   :  { %v1339_v19 = vpop.xlane.xlu0 %1338  ;;  %v1631_v1 = vadd.f32 1e-05, %v1599_v3  ;;  %v1864_v13 = vmax.f32 %v1832_v22, 0.0  ;;  %v1769_v46 = vsub.f32 %v3325_v10, %v1731_v43  ;;  %v1697_v52 = vmul.f32 %v2255_v61, %v3313_v32 }
 0x34b   :  { %v1766_v25 = vsub.f32 %v3325_v10, %v1728_v33  ;;  %v1572_v11 = vmul.f32 %v3372_v15, %v3372_v15  ;;  %v3386_v35 = vmul.f32 0.015625, %v1339_v19 }
 0x34c   :  { %2262 = vrsqrt.f32 %v1631_v1  ;;  %1902 = vrot.lane.b32.xlu0 %v1864_v13, %s2326_s8  ;;  %v1833_v55 = vadd.f32 %v1801_v31, %v1769_v46  ;;  %v1729_v18 = vmul.f32 %v1697_v52, %v3319_v39  ;;  %v1799_v47 = vmul.f32 %v1697_v52, %v3094_v59 }
 0x34d   :  { %v3381_v34 = vpop.xlane.xlu1 %1281  ;;  %v1830_v41 = vadd.f32 %v1798_v5, %v1766_v25  ;;  %v1570_v3 = vmul.f32 %v3386_v35, %v3386_v35 }
 0x34e   :  { %v1506_v6 = vpop.xlane.xlu0 %1505  ;;  %v1865_v45 = vmax.f32 %v1833_v55, 0.0  ;;  %v1767_v49 = vsub.f32 %v3325_v10, %v1729_v18 }
 0x34f   :  { %v1540_v51 = vmul.f32 0.015625, %v1506_v6  ;;  %v1862_v57 = vmax.f32 %v1830_v41, 0.0 }
 0x350   :  { %1904 = vrot.lane.b32.xlu1 %v1865_v45, %s2326_s8  ;;  %v1831_v7 = vadd.f32 %v1799_v47, %v1767_v49 }
 0x351   :  { %v1604_v36 = vsub.f32 %v1540_v51, %v1572_v11  ;;  %v3391_v0 = vpop.xlane.xlu1 %1287  ;;  %1898 = vrot.lane.b32.xlu0 %v1862_v57, %s2326_s8 }
 0x352   :  { %v2257_v37 = vpop.eup %2256  ;;  %v1500_v39 = vpop.xlane.xlu0 %1499  ;;  %v1863_v43 = vmax.f32 %v1831_v7, 0.0 }
 0x353   :  { %v1636_v61 = vadd.f32 1e-05, %v1604_v36  ;;  %v1538_v19 = vmul.f32 0.015625, %v1500_v39  ;;  %v1702_v22 = vmul.f32 %v2257_v37, %v3313_v32 }
 0x354   :  { %1900 = vrot.lane.b32.xlu1 %v1863_v43, %s2326_s8 }
 0x355   :  { %2264 = vrsqrt.f32 %v1636_v61  ;;  %v1602_v59 = vsub.f32 %v1538_v19, %v1570_v3  ;;  %v1734_v1 = vmul.f32 %v1702_v22, %v3334_v44  ;;  %v2259_v33 = vpop.eup %2258  ;;  %v3399_v13 = vpop.xlane.xlu1 %1293  ;;  %v1804_v25 = vmul.f32 %v1702_v22, %v3114_v24 }
 0x356   :  { %v2261_v46 = vpop.eup %2260  ;;  %v1703_v5 = vmul.f32 %v2259_v33, %v3313_v32  ;;  %v3419_v43 = vpop.xlane.xlu0 %1278 }
 0x357   :  { %v1634_v31 = vadd.f32 1e-05, %v1602_v59  ;;  %v1772_v52 = vsub.f32 %v3325_v10, %v1734_v1  ;;  %v1700_v6 = vmul.f32 %v2261_v46, %v3313_v32 }
 0x358   :  { %v1735_v44 = vmul.f32 %v1703_v5, %v3342_v42  ;;  %v1805_v24 = vmul.f32 %v1703_v5, %v3123_v38 }
 0x359   :  { %2266 = vrsqrt.f32 %v1634_v31  ;;  %v1836_v55 = vadd.f32 %v1804_v25, %v1772_v52  ;;  %v2263_v18 = vpop.eup %2262  ;;  %v3405_v11 = vpop.xlane.xlu1 %1299  ;;  %v1732_v51 = vmul.f32 %v1700_v6, %v3344_v20  ;;  %v1802_v36 = vmul.f32 %v1700_v6, %v3119_v28 }
 0x35a   :  { %v1701_v45 = vmul.f32 %v2263_v18, %v3313_v32  ;;  %v1773_v49 = vsub.f32 %v3325_v10, %v1735_v44  ;;  %v1381_v20 = vmul.f32 0.015625, %v3369_v48 }
 0x35b   :  { %v1868_v41 = vmax.f32 %v1836_v55, 0.0  ;;  %v1770_v47 = vsub.f32 %v3325_v10, %v1732_v51  ;;  %v3426_v55 = vpop.xlane.xlu0 %1284 }
 0x35c   :  { %v1733_v57 = vmul.f32 %v1701_v45, %v3356_v12  ;;  %v1837_v39 = vadd.f32 %v1805_v24, %v1773_v49  ;;  %v1803_v3 = vmul.f32 %v1701_v45, %v3128_v17  ;;  %v1573_v12 = vmul.f32 %v1381_v20, %v1381_v20 }
 0x35d   :  { %1910 = vrot.lane.b32.xlu0 %v1868_v41, %s2326_s8  ;;  %v1342_v37 = vpop.xlane.xlu1 %1341  ;;  %v1834_v42 = vadd.f32 %v1802_v36, %v1770_v47 }
 0x35e   :  { %v1771_v7 = vsub.f32 %v3325_v10, %v1733_v57  ;;  %v1869_v61 = vmax.f32 %v1837_v39, 0.0  ;;  %v1379_v59 = vmul.f32 0.015625, %v1342_v37 }
 0x35f   :  { %v1866_v19 = vmax.f32 %v1834_v42, 0.0  ;;  %v3433_v47 = vpop.xlane.xlu0 %1290 }
 0x360   :  { %v1835_v38 = vadd.f32 %v1803_v3, %v1771_v7  ;;  %1912 = vrot.lane.b32.xlu1 %v1869_v61, %s2326_s8  ;;  %v1571_v52 = vmul.f32 %v1379_v59, %v1379_v59 }
 0x361   :  { %1906 = vrot.lane.b32.xlu0 %v1866_v19, %s2326_s8  ;;  %v1509_v28 = vpop.xlane.xlu1 %1508 }
 0x362   :  { %v2265_v22 = vpop.eup %2264  ;;  %v1541_v1 = vmul.f32 0.015625, %v1509_v28  ;;  %v1867_v33 = vmax.f32 %v1835_v38, 0.0 }
 0x363   :  { %v1706_v48 = vmul.f32 %v2265_v22, %v3313_v32 }
 0x364   :  { %v1605_v46 = vsub.f32 %v1541_v1, %v1573_v12  ;;  %1908 = vrot.lane.b32.xlu1 %v1867_v33, %s2326_s8  ;;  %v3446_v33 = vmul.f32 0.015625, %v3274_v62 }
 0x365   :  { %v1503_v17 = vpop.xlane.xlu1 %1502  ;;  %v1738_v18 = vmul.f32 %v1706_v48, %v3372_v15  ;;  %v1808_v57 = vmul.f32 %v1706_v48, %v3142_v40  ;;  %v3437_v15 = vpop.xlane.xlu0 %1296 }
 0x366   :  { %v2267_v31 = vpop.eup %2266  ;;  %v1637_v25 = vadd.f32 1e-05, %v1605_v46  ;;  %v1539_v5 = vmul.f32 0.015625, %v1503_v17 }
 0x367   :  { %v1704_v6 = vmul.f32 %v2267_v31, %v3313_v32  ;;  %v1776_v24 = vsub.f32 %v3325_v10, %v1738_v18 }
 0x368   :  { %2268 = vrsqrt.f32 %v1637_v25  ;;  %v1603_v44 = vsub.f32 %v1539_v5, %v1571_v52 }
 0x369   :  { %v1736_v51 = vmul.f32 %v1704_v6, %v3386_v35  ;;  %v1806_v49 = vmul.f32 %v1704_v6, %v3151_v16  ;;  %v1840_v39 = vadd.f32 %v1808_v57, %v1776_v24  ;;  %v1416_v3 = vpop.xlane.xlu0 %1415  ;;  %v1419_v38 = vpop.xlane.xlu1 %1418 }
 0x36a   :  { %v1635_v41 = vadd.f32 1e-05, %v1603_v44  ;;  %v1510_v6 = vmul.f32 0.015625, %v1416_v3  ;;  %v3461_v44 = vmul.f32 0.015625, %v3280_v2 }
 0x36b   :  { %v1774_v45 = vsub.f32 %v3325_v10, %v1736_v51  ;;  %v1872_v35 = vmax.f32 %v1840_v39, 0.0 }
 0x36c   :  { %2270 = vrsqrt.f32 %v1635_v41  ;;  %v1543_v24 = vmul.f32 %v3461_v44, %v3461_v44 }
 0x36d   :  { %v1838_v36 = vadd.f32 %v1806_v49, %v1774_v45  ;;  %v1422_v40 = vpop.xlane.xlu0 %1421  ;;  %v1425_v17 = vpop.xlane.xlu1 %1424 }
 0x36e   :  { %v1512_v31 = vmul.f32 0.015625, %v1422_v40  ;;  %v1513_v5 = vmul.f32 0.015625, %v1425_v17 }
 0x36f   :  { %v1870_v37 = vmax.f32 %v1838_v36, 0.0 }
 0x371   :  { %1914 = vrot.lane.b32.xlu0 %v1870_v37, %s2326_s8  ;;  %v1431_v36 = vpop.xlane.xlu1 %1430 }
 0x375   :  { %v2269_v42 = vpop.eup %2268  ;;  %1918 = vrot.lane.b32.xlu0 %v1872_v35, %s2326_s8  ;;  %v3469_v35 = vmul.f32 0.015625, %v3282_v23 }
 0x376   :  { %v1707_v16 = vmul.f32 %v2269_v42, %v3313_v32 }
 0x377   :  { %v1548_v3 = vmul.f32 %v3469_v35, %v3469_v35 }
 0x378   :  { %v1739_v19 = vmul.f32 %v1707_v16, %v1381_v20  ;;  %v1809_v46 = vmul.f32 %v1707_v16, %v3154_v14  ;;  %v1544_v20 = vmul.f32 %v3446_v33, %v3446_v33 }
 0x379   :  { %v2271_v7 = vpop.eup %2270 }
 0x37a   :  { %v1705_v61 = vmul.f32 %v2271_v7, %v3313_v32  ;;  %v1777_v1 = vsub.f32 %v3325_v10, %v1739_v19  ;;  %v1576_v62 = vsub.f32 %v1512_v31, %v1544_v20  ;;  %v1437_v7 = vpop.xlane.xlu1 %1436  ;;  %v3477_v19 = vmul.f32 0.015625, %v3286_v54 }
 0x37c   :  { %v1737_v22 = vmul.f32 %v1705_v61, %v1379_v59  ;;  %v1807_v12 = vmul.f32 %v1705_v61, %v3204_v60  ;;  %v1841_v25 = vadd.f32 %v1809_v46, %v1777_v1  ;;  %v3452_v59 = vmul.f32 0.015625, %v3276_v4  ;;  %v1428_v4 = vpop.xlane.xlu0 %1427 }
 0x37d   :  { %v3455_v60 = vmul.f32 0.015625, %v3278_v8  ;;  %v1511_v8 = vmul.f32 0.015625, %v1419_v38  ;;  %v1608_v41 = vadd.f32 1e-05, %v1576_v62  ;;  %v3474_v61 = vmul.f32 0.015625, %v3284_v27 }
 0x37e   :  { %v1775_v28 = vsub.f32 %v3325_v10, %v1737_v22  ;;  %v1873_v18 = vmax.f32 %v1841_v25, 0.0  ;;  %v1545_v14 = vmul.f32 %v3452_v59, %v3452_v59  ;;  %v1517_v22 = vmul.f32 0.015625, %v1437_v7 }
 0x37f   :  { %v1542_v51 = vmul.f32 %v3455_v60, %v3455_v60  ;;  %v1575_v57 = vsub.f32 %v1511_v8, %v1543_v24  ;;  %2272 = vrsqrt.f32 %v1608_v41  ;;  %v1514_v40 = vmul.f32 0.015625, %v1428_v4 }
 0x380   :  { %v1839_v48 = vadd.f32 %v1807_v12, %v1775_v28  ;;  %v1577_v45 = vsub.f32 %v1513_v5, %v1545_v14  ;;  %v1434_v2 = vpop.xlane.xlu0 %1433  ;;  %v1549_v23 = vmul.f32 %v3474_v61, %v3474_v61  ;;  %v3482_v28 = vmul.f32 0.015625, %v3288_v21 }
 0x381   :  { %v1574_v49 = vsub.f32 %v1510_v6, %v1542_v51  ;;  %v1607_v42 = vadd.f32 1e-05, %v1575_v57  ;;  %v1516_v16 = vmul.f32 0.015625, %v1434_v2  ;;  %v1546_v1 = vmul.f32 %v3477_v19, %v3477_v19 }
 0x382   :  { %v1871_v52 = vmax.f32 %v1839_v48, 0.0  ;;  %v1609_v37 = vadd.f32 1e-05, %v1577_v45  ;;  %v1443_v48 = vpop.xlane.xlu1 %1442  ;;  %v1515_v27 = vmul.f32 0.015625, %v1431_v36  ;;  %v1581_v31 = vsub.f32 %v1517_v22, %v1549_v23 }
 0x383   :  { %v1606_v39 = vadd.f32 1e-05, %v1574_v49  ;;  %v1580_v38 = vsub.f32 %v1516_v16, %v1548_v3  ;;  %v1578_v17 = vsub.f32 %v1514_v40, %v1546_v1  ;;  %v3490_v6 = vmul.f32 0.015625, %v3426_v55 }
 0x384   :  { %1916 = vrot.lane.b32.xlu1 %v1871_v52, %s2326_s8  ;;  %2274 = vrsqrt.f32 %v1609_v37  ;;  %v1440_v12 = vpop.xlane.xlu0 %1439  ;;  %v1547_v52 = vmul.f32 %v3482_v28, %v3482_v28  ;;  %v1613_v20 = vadd.f32 1e-05, %v1581_v31  ;;  %v3493_v4 = vmul.f32 0.015625, %v3419_v43 }
 0x385   :  { %2276 = vrsqrt.f32 %v1606_v39  ;;  %v1612_v46 = vadd.f32 1e-05, %v1580_v38  ;;  %v3498_v36 = vmul.f32 0.015625, %v3391_v0  ;;  %v1552_v55 = vmul.f32 %v3490_v6, %v3490_v6 }
 0x386   :  { %2278 = vrsqrt.f32 %v1607_v42  ;;  %v1579_v25 = vsub.f32 %v1515_v27, %v1547_v52  ;;  %v1449_v14 = vpop.xlane.xlu1 %1448  ;;  %v1518_v37 = vmul.f32 0.015625, %v1440_v12  ;;  %v1550_v43 = vmul.f32 %v3493_v4, %v3493_v4 }
 0x387   :  { %2280 = vrsqrt.f32 %v1612_v46  ;;  %v1521_v2 = vmul.f32 0.015625, %v1449_v14  ;;  %v3511_v7 = vmul.f32 0.015625, %v3381_v34  ;;  %v1553_v3 = vmul.f32 %v3498_v36, %v3498_v36 }
 0x388   :  { %1920 = vrot.lane.b32.xlu1 %v1873_v18, %s2326_s8  ;;  %v1446_v62 = vpop.xlane.xlu0 %1445  ;;  %v1610_v18 = vadd.f32 1e-05, %v1578_v17  ;;  %v1611_v41 = vadd.f32 1e-05, %v1579_v25  ;;  %2282 = vrsqrt.f32 %v1613_v20  ;;  %v1582_v22 = vsub.f32 %v1518_v37, %v1550_v43 }
 0x389   :  { %v1520_v8 = vmul.f32 0.015625, %v1446_v62  ;;  %v1519_v23 = vmul.f32 0.015625, %v1443_v48  ;;  %v1585_v1 = vsub.f32 %v1521_v2, %v1553_v3  ;;  %v1551_v34 = vmul.f32 %v3511_v7, %v3511_v7 }
 0x38a   :  { %2284 = vrsqrt.f32 %v1610_v18  ;;  %v3505_v42 = vpop.xlane.xlu1 %1454  ;;  %v1614_v52 = vadd.f32 1e-05, %v1582_v22  ;;  %v3533_v43 = vmul.f32 0.015625, %v3433_v47 }
 0x38b   :  { %v1584_v39 = vsub.f32 %v1520_v8, %v1552_v55  ;;  %2286 = vrsqrt.f32 %v1611_v41  ;;  %v1583_v48 = vsub.f32 %v1519_v23, %v1551_v34  ;;  %v1617_v25 = vadd.f32 1e-05, %v1585_v1 }
 0x38c   :  { %v2273_v54 = vpop.eup %2272  ;;  %v1452_v27 = vpop.xlane.xlu0 %1451  ;;  %v3544_v23 = vmul.f32 0.015625, %v3437_v15 }
 0x38d   :  { %v1678_v21 = vmul.f32 %v2273_v54, %v3313_v32  ;;  %v1616_v12 = vadd.f32 1e-05, %v1584_v39 }
 0x38e   :  { %v3521_v17 = vpop.xlane.xlu1 %1460  ;;  %v1556_v15 = vmul.f32 %v3544_v23, %v3544_v23 }
 0x38f   :  { %v1710_v45 = vmul.f32 %v1678_v21, %v3446_v33  ;;  %v1780_v40 = vmul.f32 %v1678_v21, %v2995_v58  ;;  %2288 = vrsqrt.f32 %v1616_v12 }
 0x390   :  { %2290 = vrsqrt.f32 %v1614_v52  ;;  %v1458_v41 = vpop.xlane.xlu0 %1457 }
 0x391   :  { %v2275_v5 = vpop.eup %2274  ;;  %v1748_v33 = vsub.f32 %v3325_v10, %v1710_v45  ;;  %2292 = vrsqrt.f32 %v1617_v25 }
 0x392   :  { %v2277_v51 = vpop.eup %2276  ;;  %v1679_v49 = vmul.f32 %v2275_v5, %v3313_v32 }
 0x393   :  { %v2279_v24 = vpop.eup %2278  ;;  %v1676_v57 = vmul.f32 %v2277_v51, %v3313_v32  ;;  %v1812_v46 = vadd.f32 %v1780_v40, %v1748_v33  ;;  %v1554_v40 = vmul.f32 %v3533_v43, %v3533_v43 }
 0x394   :  { %v1711_v0 = vmul.f32 %v1679_v49, %v3452_v59  ;;  %v1677_v16 = vmul.f32 %v2279_v24, %v3313_v32  ;;  %v2281_v54 = vpop.eup %2280  ;;  %v1781_v58 = vmul.f32 %v1679_v49, %v3003_v30  ;;  %v1615_v49 = vadd.f32 1e-05, %v1583_v48 }
 0x395   :  { %v1708_v38 = vmul.f32 %v1676_v57, %v3455_v60  ;;  %v1778_v20 = vmul.f32 %v1676_v57, %v2998_v9  ;;  %v1844_v62 = vmax.f32 %v1812_v46, 0.0  ;;  %v1682_v5 = vmul.f32 %v2281_v54, %v3313_v32  ;;  %v2283_v18 = vpop.eup %2282 }
 0x396   :  { %v1749_v59 = vsub.f32 %v3325_v10, %v1711_v0  ;;  %v1709_v31 = vmul.f32 %v1677_v16, %v3461_v44  ;;  %v1779_v30 = vmul.f32 %v1677_v16, %v3006_v50  ;;  %v1683_v57 = vmul.f32 %v2283_v18, %v3313_v32 }
 0x397   :  { %v1746_v60 = vsub.f32 %v3325_v10, %v1708_v38  ;;  %v2285_v8 = vpop.eup %2284  ;;  %v1714_v55 = vmul.f32 %v1682_v5, %v3469_v35  ;;  %2294 = vrsqrt.f32 %v1615_v49  ;;  %v1522_v16 = vmul.f32 0.015625, %v1452_v27 }
 0x398   :  { %v1813_v21 = vadd.f32 %v1781_v58, %v1749_v59  ;;  %v1747_v44 = vsub.f32 %v3325_v10, %v1709_v31  ;;  %v2287_v37 = vpop.eup %2286  ;;  %v1680_v33 = vmul.f32 %v2285_v8, %v3313_v32  ;;  %v1715_v22 = vmul.f32 %v1683_v57, %v3474_v61 }
 0x399   :  { %v1810_v51 = vadd.f32 %v1778_v20, %v1746_v60  ;;  %v1752_v38 = vsub.f32 %v3325_v10, %v1714_v55  ;;  %v1681_v47 = vmul.f32 %v2287_v37, %v3313_v32  ;;  %v1784_v46 = vmul.f32 %v1682_v5, %v3015_v29 }
 0x39a   :  { %v1845_v9 = vmax.f32 %v1813_v21, 0.0  ;;  %v1811_v24 = vadd.f32 %v1779_v30, %v1747_v44  ;;  %v1712_v1 = vmul.f32 %v1680_v33, %v3477_v19  ;;  %v1586_v59 = vsub.f32 %v1522_v16, %v1554_v40  ;;  %v3639_v40 = vld [vmem:[#allocation6_spill] sm:$0xff] }
 0x39b   :  { %v1842_v2 = vmax.f32 %v1810_v51, 0.0  ;;  %v1524_v31 = vmul.f32 0.015625, %v1458_v41  ;;  %v1816_v61 = vadd.f32 %v1784_v46, %v1752_v38  ;;  %v1753_v34 = vsub.f32 %v3325_v10, %v1715_v22 }
 0x39c   :  { %v1843_v35 = vmax.f32 %v1811_v24, 0.0  ;;  %v2289_v54 = vpop.eup %2288  ;;  %v1713_v60 = vmul.f32 %v1681_v47, %v3482_v28  ;;  %v1750_v52 = vsub.f32 %v3325_v10, %v1712_v1  ;;  %v1785_v19 = vmul.f32 %v1683_v57, %v3023_v63 }
 0x39d   :  { %v2291_v58 = vpop.eup %2290  ;;  %v1618_v48 = vadd.f32 1e-05, %v1586_v59  ;;  %v1588_v25 = vsub.f32 %v1524_v31, %v1556_v15  ;;  %v1782_v29 = vmul.f32 %v1680_v33, %v3018_v56  ;;  %v1686_v20 = vmul.f32 %v2289_v54, %v3313_v32  ;;  %v3641_v15 = vld [vmem:[#allocation5_spill] sm:$0xff] }
 0x39e   :  { %v1848_v21 = vmax.f32 %v1816_v61, 0.0  ;;  %v1817_v44 = vadd.f32 %v1785_v19, %v1753_v34  ;;  %v1751_v5 = vsub.f32 %v3325_v10, %v1713_v60  ;;  %v1783_v51 = vmul.f32 %v1681_v47, %v3026_v53 }
 0x39f   :  { %v1814_v18 = vadd.f32 %v1782_v29, %v1750_v52  ;;  %2296 = vrsqrt.f32 %v1618_v48  ;;  %v1620_v63 = vadd.f32 1e-05, %v1588_v25  ;;  %v1718_v8 = vmul.f32 %v1686_v20, %v3490_v6 }
 0x3a0   :  { %v1849_v56 = vmax.f32 %v1817_v44, 0.0  ;;  %v1684_v49 = vmul.f32 %v2291_v58, %v3313_v32  ;;  %v1788_v16 = vmul.f32 %v1686_v20, %v3189_v26  ;;  %v3640_v26 = vld [vmem:[#allocation7_spill] sm:$0xff] }
 0x3a1   :  { %v1846_v24 = vmax.f32 %v1814_v18, 0.0  ;;  %2298 = vrsqrt.f32 %v1620_v63  ;;  %v1756_v37 = vsub.f32 %v3325_v10, %v1718_v8 }
 0x3a2   :  { %v1786_v1 = vmul.f32 %v1684_v49, %v3640_v26 }
 0x3a3   :  { %v1820_v38 = vadd.f32 %v1788_v16, %v1756_v37 }
 0x3a5   :  { %v1852_v46 = vmax.f32 %v1820_v38, 0.0  ;;  %v3644_v38 = vld [vmem:[#allocation8_spill] sm:$0xff] }
 0x3ae   :  { %v1895_v14 = vpop.permute.xlu1 %1894 }
 0x3af   :  { %v1940_v45 = vsel %vm1252_vm1, %v1844_v62, %v1895_v14  ;;  %v2293_v62 = vpop.eup %2292 }
 0x3b0   :  { %1956 = vst [vmem:[#allocation2 + $0x10] sm:$0xff] %v1940_v45  ;;  %v2295_v41 = vpop.eup %2294  ;;  %v1815_v45 = vadd.f32 %v1783_v51, %v1751_v5  ;;  %v1687_v30 = vmul.f32 %v2293_v62, %v3313_v32 }
 0x3b1   :  { %v1685_v33 = vmul.f32 %v2295_v41, %v3313_v32  ;;  %v2297_v59 = vpop.eup %2296 }
 0x3b2   :  { %v1897_v39 = vpop.permute.xlu1 %1896  ;;  %v1847_v6 = vmax.f32 %v1815_v45, 0.0  ;;  %v2299_v58 = vpop.eup %2298 }
 0x3b3   :  { %v1941_v0 = vsel %vm1252_vm1, %v1845_v9, %v1897_v39  ;;  %v1891_v50 = vpop.permute.xlu0 %1890  ;;  %v1719_v39 = vmul.f32 %v1687_v30, %v3498_v36 }
 0x3b4   :  { %1957 = vst [vmem:[#allocation2 + $0x18] sm:$0xff] %v1941_v0  ;;  %v1938_v3 = vsel %vm1252_vm1, %v1842_v2, %v1891_v50  ;;  %v1716_v2 = vmul.f32 %v1684_v49, %v3493_v4  ;;  %v3570_v0 = vmul.f32 0.015625, %v3399_v13  ;;  %v1717_v4 = vmul.f32 %v1685_v33, %v3511_v7 }
 0x3b5   :  { %1954 = vst [vmem:[#allocation2] sm:$0xff] %v1938_v3  ;;  %v1757_v22 = vsub.f32 %v3325_v10, %v1719_v39  ;;  %v1365_v13 = vmul.f32 0.015625, %v3405_v11  ;;  %v1787_v11 = vmul.f32 %v1685_v33, %v3641_v15 }
 0x3b6   :  { %v1893_v12 = vpop.permute.xlu1 %1892  ;;  %v1754_v36 = vsub.f32 %v3325_v10, %v1716_v2  ;;  %v1555_v47 = vmul.f32 %v3570_v0, %v3570_v0  ;;  %v1755_v34 = vsub.f32 %v3325_v10, %v1717_v4 }
 0x3b7   :  { %v1939_v27 = vsel %vm1252_vm1, %v1843_v35, %v1893_v12  ;;  %v1523_v35 = vmul.f32 0.015625, %v3505_v42  ;;  %v1789_v12 = vmul.f32 %v1687_v30, %v3639_v40  ;;  %v1525_v42 = vmul.f32 0.015625, %v3521_v17 }
 0x3b8   :  { %1955 = vst [vmem:[#allocation2 + $0x8] sm:$0xff] %v1939_v27  ;;  %v1818_v61 = vadd.f32 %v1786_v1, %v1754_v36  ;;  %v1557_v7 = vmul.f32 %v1365_v13, %v1365_v13  ;;  %v1819_v29 = vadd.f32 %v1787_v11, %v1755_v34  ;;  %v1688_v17 = vmul.f32 %v2297_v59, %v3313_v32 }
 0x3b9   :  { %v1587_v27 = vsub.f32 %v1523_v35, %v1555_v47  ;;  %v1821_v54 = vadd.f32 %v1789_v12, %v1757_v22  ;;  %v3645_v47 = vld [vmem:[#allocation9_spill] sm:$0xff] }
 0x3ba   :  { %v1589_v19 = vsub.f32 %v1525_v42, %v1557_v7  ;;  %v1850_v25 = vmax.f32 %v1818_v61, 0.0  ;;  %v1720_v18 = vmul.f32 %v1688_v17, %v3533_v43 }
 0x3bb   :  { %v1619_v52 = vadd.f32 1e-05, %v1587_v27  ;;  %v1853_v48 = vmax.f32 %v1821_v54, 0.0 }
 0x3bc   :  { %v1621_v5 = vadd.f32 1e-05, %v1589_v19  ;;  %v1758_v8 = vsub.f32 %v3325_v10, %v1720_v18 }
 0x3bd   :  { %2300 = vrsqrt.f32 %v1619_v52 }
 0x3be   :  { %v1903_v28 = vpop.permute.xlu0 %1902  ;;  %2302 = vrsqrt.f32 %v1621_v5 }
 0x3bf   :  { %v1944_v14 = vsel %vm1252_vm1, %v1848_v21, %v1903_v28  ;;  %v1851_v28 = vmax.f32 %v1819_v29, 0.0 }
 0x3c0   :  { %1960 = vst [vmem:[#allocation2 + $0x30] sm:$0xff] %v1944_v14  ;;  %v1690_v14 = vmul.f32 %v2299_v58, %v3313_v32 }
 0x3c2   :  { %v1905_v9 = vpop.permute.xlu1 %1904  ;;  %v1722_v41 = vmul.f32 %v1690_v14, %v3544_v23 }
 0x3c3   :  { %v1945_v55 = vsel %vm1252_vm1, %v1849_v56, %v1905_v9  ;;  %v1899_v57 = vpop.permute.xlu0 %1898  ;;  %v3642_v56 = vld [vmem:[#allocation10_spill] sm:$0xff]  ;;  %v3643_v9 = vld [vmem:[#allocation11_spill] sm:$0xff] }
 0x3c4   :  { %1961 = vst [vmem:[#allocation2 + $0x38] sm:$0xff] %v1945_v55  ;;  %v1942_v53 = vsel %vm1252_vm1, %v1846_v24, %v1899_v57  ;;  %v1790_v45 = vmul.f32 %v1688_v17, %v3642_v56  ;;  %v1760_v49 = vsub.f32 %v3325_v10, %v1722_v41  ;;  %v1792_v24 = vmul.f32 %v1690_v14, %v3643_v9 }
 0x3c5   :  { %1958 = vst [vmem:[#allocation2 + $0x20] sm:$0xff] %v1942_v53 }
 0x3c6   :  { %v1901_v50 = vpop.permute.xlu1 %1900  ;;  %v1822_v30 = vadd.f32 %v1790_v45, %v1758_v8  ;;  %v1824_v57 = vadd.f32 %v1792_v24, %v1760_v49 }
 0x3c7   :  { %v1943_v3 = vsel %vm1252_vm1, %v1847_v6, %v1901_v50 }
 0x3c8   :  { %1959 = vst [vmem:[#allocation2 + $0x28] sm:$0xff] %v1943_v3  ;;  %v1854_v43 = vmax.f32 %v1822_v30, 0.0  ;;  %v1856_v6 = vmax.f32 %v1824_v57, 0.0 }
 0x3ca   :  { %v2301_v55 = vpop.eup %2300 }
 0x3cb   :  { %v1689_v39 = vmul.f32 %v2301_v55, %v3313_v32  ;;  %v2303_v2 = vpop.eup %2302 }
 0x3cc   :  { %v1691_v16 = vmul.f32 %v2303_v2, %v3313_v32 }
 0x3cd   :  { %v1721_v50 = vmul.f32 %v1689_v39, %v3570_v0  ;;  %v1791_v22 = vmul.f32 %v1689_v39, %v3644_v38 }
 0x3ce   :  { %v1723_v35 = vmul.f32 %v1691_v16, %v1365_v13  ;;  %v1793_v40 = vmul.f32 %v1691_v16, %v3645_v47 }
 0x3cf   :  { %v1911_v31 = vpop.permute.xlu0 %1910  ;;  %v1759_v3 = vsub.f32 %v3325_v10, %v1721_v50 }
 0x3d0   :  { %v1948_v60 = vsel %vm1252_vm1, %v1852_v46, %v1911_v31  ;;  %v1761_v4 = vsub.f32 %v3325_v10, %v1723_v35 }
 0x3d1   :  { %1964 = vst [vmem:[#allocation2 + $0x50] sm:$0xff] %v1948_v60  ;;  %v1823_v36 = vadd.f32 %v1791_v22, %v1759_v3 }
 0x3d2   :  { %v1913_v20 = vpop.permute.xlu1 %1912  ;;  %v1825_v26 = vadd.f32 %v1793_v40, %v1761_v4 }
 0x3d3   :  { %v1907_v62 = vpop.permute.xlu0 %1906  ;;  %v1949_v21 = vsel %vm1252_vm1, %v1853_v48, %v1913_v20  ;;  %v1855_v12 = vmax.f32 %v1823_v36, 0.0 }
 0x3d4   :  { %v1946_v44 = vsel %vm1252_vm1, %v1850_v25, %v1907_v62  ;;  %1965 = vst [vmem:[#allocation2 + $0x58] sm:$0xff] %v1949_v21  ;;  %v1857_v0 = vmax.f32 %v1825_v26, 0.0 }
 0x3d5   :  { %1962 = vst [vmem:[#allocation2 + $0x40] sm:$0xff] %v1946_v44 }
 0x3d6   :  { %v1909_v51 = vpop.permute.xlu1 %1908 }
 0x3d7   :  { %v1947_v63 = vsel %vm1252_vm1, %v1851_v28, %v1909_v51 }
 0x3d8   :  { %1963 = vst [vmem:[#allocation2 + $0x48] sm:$0xff] %v1947_v63 }
 0x3e3   :  { %v1915_v53 = vpop.permute.xlu0 %1914 }
 0x3e4   :  { %v1950_v37 = vsel %vm1252_vm1, %v1854_v43, %v1915_v53 }
 0x3e5   :  { %1966 = vst [vmem:[#allocation2 + $0x60] sm:$0xff] %v1950_v37 }
 0x3e7   :  { %v1919_v33 = vpop.permute.xlu0 %1918 }
 0x3e8   :  { %v1952_v23 = vsel %vm1252_vm1, %v1856_v6, %v1919_v33 }
 0x3e9   :  { %1968 = vst [vmem:[#allocation2 + $0x70] sm:$0xff] %v1952_v23 }
 0x3f6   :  { %v1917_v1 = vpop.permute.xlu1 %1916 }
 0x3f7   :  { %v1951_v27 = vsel %vm1252_vm1, %v1855_v12, %v1917_v1 }
 0x3f8   :  { %1967 = vst [vmem:[#allocation2 + $0x68] sm:$0xff] %v1951_v27 }
 0x3fa   :  { %v1921_v32 = vpop.permute.xlu1 %1920 }
 0x3fb   :  { %v1953_v13 = vsel %vm1252_vm1, %v1857_v0, %v1921_v32 }
 0x3fc   :  { %1969 = vst [vmem:[#allocation2 + $0x78] sm:$0xff] %v1953_v13 }
 0x3fd   :  { %2315 = shalt.err (!%p2312_p4)
}
 0x3fe   :  { %s2328_s13 = smov 128   ;;  %s2329_s14 = smov 8  }
 0x3ff   :  { %1981 = dma.vmem_to_hbm [thread:$0]  %s1976_s11, 2048, %s3621_s9, [#allocation3], %s2328_s13, %s2328_s13, %s2329_s14  }
 0x400   :  { %2324 = dma.done.wait [#allocation3], 2048  }
 0x401   :  { %2325 = vsyncadd [#allocation3], 4294965248 }
 0x402   :  { %1985 = vsyncpa [#allocation3], 1 }

</bundles_post_ra>
